<compile_context>
chip_gen: v7x
topology: tpu7x:2x2x1
jax: 0.10.0
libtpu: 0.0.40
codegen_flags: <defaults>
</compile_context>

<pallas_src>
import functools

import jax
import jax.numpy as jnp
from jax.experimental import pallas as pl
from jax.experimental.pallas import tpu as pltpu


# ---------------------------------------------------------------------------
# Pallas kernel: one image per grid step, all matmuls on (HW, *) slabs.
# ---------------------------------------------------------------------------
def sem_kernel(x_ref, w1_ref, w3_ref, bias_ref, wg1_ref, wg2_ref, wr_ref,
               o_ref, *, H, W):
    HW = H * W
    C = x_ref.shape[-1]
    R = w1_ref.shape[-1]

    x = x_ref[...].reshape(HW, C).astype(jnp.float32)      # (HW, C)
    bias = bias_ref[...]                                   # (3, C)
    b1 = bias[0:1, :R]                                     # (1, R)
    b2 = bias[1:2, :]                                      # (1, C)
    b3 = bias[2:3, :]                                      # (1, C)

    # --- semantic_injection (1): 1x1 conv (BN scale folded) + bias + ReLU --
    t = jnp.dot(x, w1_ref[...], preferred_element_type=jnp.float32) + b1
    t = jnp.maximum(t, 0.0)                                # (HW, R)

    # --- semantic_injection (2): 3x3 SAME conv as 9 shifted matmuls --------
    # Row m = h*W + w.  Tap (dy, dx) needs t[m + dy*W + dx]; the row shift is
    # a static slice of a (W+1)-zero-padded copy of t (covers h-boundary
    # taps), and pre-masked copies of t stop w-boundary leakage of dx=+-1
    # taps (sources with w == W-1 are never used by dx=-1, w == 0 never used
    # by dx=+1, so they are zeroed before the shift).
    w_idx = jax.lax.broadcasted_iota(jnp.int32, (HW, 1), 0) % W
    t_l = jnp.where(w_idx < W - 1, t, 0.0)                 # sources for dx=-1
    t_r = jnp.where(w_idx > 0, t, 0.0)                     # sources for dx=+1
    pad = jnp.zeros((W + 1, R), jnp.float32)
    padded = {
        -1: jnp.concatenate([pad, t_l, pad], axis=0),
        0: jnp.concatenate([pad, t, pad], axis=0),
        1: jnp.concatenate([pad, t_r, pad], axis=0),
    }

    w3 = w3_ref[...]                                       # (9, R, C) folded
    taps = [(dy, dx) for dy in (-1, 0, 1) for dx in (-1, 0, 1)]
    sem = None
    for k, (dy, dx) in enumerate(taps):
        off = dy * W + dx
        if off == 0:
            src = t
        else:
            start = W + 1 + off
            src = padded[dx][start:start + HW, :]          # (HW, R)
        part = jnp.dot(src, w3[k], preferred_element_type=jnp.float32)
        sem = part if sem is None else sem + part
    sem = sem + b2                                         # (HW, C), BN bias

    # --- gated_channel_guidance: GAP -> 1x1 -> ReLU -> 1x1 -> Sigmoid ------
    xavg = jnp.mean(x, axis=0, keepdims=True)              # (1, C)
    g1 = jnp.maximum(
        jnp.dot(xavg, wg1_ref[...], preferred_element_type=jnp.float32), 0.0)
    g = jax.nn.sigmoid(
        jnp.dot(g1, wg2_ref[...], preferred_element_type=jnp.float32))  # (1,C)

    # --- gating + residual + feature_refine (1x1 conv + bias + ReLU) -------
    y = sem * g + x                                        # (HW, C)
    out = jnp.dot(y, wr_ref[...], preferred_element_type=jnp.float32) + b3
    o_ref[...] = jnp.maximum(out, 0.0).reshape(1, HW, C).astype(o_ref.dtype)


# ---------------------------------------------------------------------------
# Wrapper
# ---------------------------------------------------------------------------
def semantic_enhancement(x, params):
    """x: (B, H, W, C) float32, NHWC layout."""
    B, H, W, C = x.shape
    HW = H * W
    x2 = x.reshape(B, HW, C)           # contiguous HBM reshape (free)

    def const_spec(arr):
        nd = arr.ndim
        return pl.BlockSpec(arr.shape, lambda b: (0,) * nd)

    kernel = functools.partial(sem_kernel, H=H, W=W)

    out = pl.pallas_call(
        kernel,
        out_shape=jax.ShapeDtypeStruct((B, HW, C), jnp.float32),
        grid_spec=pltpu.PrefetchScalarGridSpec(
            num_scalar_prefetch=0,
            grid=(B,),
            in_specs=[
                pl.BlockSpec((1, HW, C), lambda b: (b, 0, 0)),   # x, per image
                const_spec(params["w1_f"]),
                const_spec(params["w3_f"]),
                const_spec(params["bias"]),
                const_spec(params["wg1"]),
                const_spec(params["wg2"]),
                const_spec(params["wr_f"]),
            ],
            out_specs=pl.BlockSpec((1, HW, C), lambda b: (b, 0, 0)),
        ),
        compiler_params=pltpu.CompilerParams(
            dimension_semantics=("parallel",),
            vmem_limit_bytes=32 * 1024 * 1024,
        ),
    )(x2, params["w1_f"], params["w3_f"], params["bias"],
      params["wg1"], params["wg2"], params["wr_f"])
    return out.reshape(B, H, W, C)


# ---------------------------------------------------------------------------
# Pure-JAX reference (NHWC, unfolded BN) for verification
# ---------------------------------------------------------------------------
def reference(x, p):
    B, H, W, C = x.shape
    xm = x.reshape(B, H * W, C)
    t = jnp.maximum(jnp.einsum("bnc,cr->bnr", xm, p["w1"]) * p["s1"] + p["b1"],
                    0.0)
    t = t.reshape(B, H, W, -1)
    conv = jax.lax.conv_general_dilated(
        t, p["w3_hwio"], (1, 1), "SAME",
        dimension_numbers=("NHWC", "HWIO", "NHWC"))
    sem = conv * p["s2"] + p["b2"]
    xavg = xm.mean(axis=1)                               # (B, C)
    g = jnp.maximum(xavg @ p["wg1"], 0.0)
    g = jax.nn.sigmoid(g @ p["wg2"])                     # (B, C)
    y = sem * g[:, None, None, :] + x
    out = jnp.einsum("bhwc,cd->bhwd", y, p["wr"]) * p["s3"] + p["b3"]
    return jnp.maximum(out, 0.0)


# ---------------------------------------------------------------------------
# Deterministic parameters; eval-mode BN folded into scale/bias, then the
# scales folded into the preceding conv weights (perf review item).
# ---------------------------------------------------------------------------
def make_params(key, C, reduction=4, eps=1e-5):
    R = max(C // reduction, 16)
    ks = jax.random.split(key, 17)

    def bn_fold(kg, kb, km, kv, n):
        gamma = jax.random.uniform(kg, (n,), minval=0.5, maxval=1.5)
        beta = jax.random.normal(kb, (n,)) * 0.1
        mean = jax.random.normal(km, (n,)) * 0.1
        var = jax.random.uniform(kv, (n,), minval=0.5, maxval=1.5)
        scale = gamma * jax.lax.rsqrt(var + eps)
        bias = beta - mean * scale
        return scale, bias

    w1 = jax.random.normal(ks[0], (C, R)) * 0.1
    s1, b1 = bn_fold(ks[1], ks[2], ks[3], ks[4], R)
    w3_hwio = jax.random.normal(ks[5], (3, 3, R, C)) * 0.1
    s2, b2 = bn_fold(ks[6], ks[7], ks[8], ks[9], C)
    wg1 = jax.random.normal(ks[10], (C, R)) * 0.1
    wg2 = jax.random.normal(ks[11], (R, C)) * 0.1
    wr = jax.random.normal(ks[12], (C, C)) * 0.1
    s3, b3 = bn_fold(ks[13], ks[14], ks[15], ks[16], C)

    # Fold BN scales into the conv weights feeding them.
    w1_f = w1 * s1[None, :]                                        # (C, R)
    w3_f = (w3_hwio * s2[None, None, None, :]).reshape(9, R, C)    # (9, R, C)
    wr_f = wr * s3[None, :]                                        # (C, C)

    # Pack the three remaining bias vectors into one small array.
    bias_pack = jnp.zeros((3, C), jnp.float32)
    bias_pack = bias_pack.at[0, :R].set(b1)
    bias_pack = bias_pack.at[1, :].set(b2)
    bias_pack = bias_pack.at[2, :].set(b3)

    return {
        # kernel params (folded)
        "w1_f": w1_f, "w3_f": w3_f, "wr_f": wr_f, "bias": bias_pack,
        "wg1": wg1, "wg2": wg2,
        # reference params (unfolded)
        "w1": w1, "s1": s1, "b1": b1,
        "w3_hwio": w3_hwio, "s2": s2, "b2": b2,
        "wr": wr, "s3": s3, "b3": b3,
    }


if __name__ == "__main__":
    B, C, H, W = 2, 32, 16, 16          # reduction=4 -> reduced_channels = 16
    key = jax.random.PRNGKey(0)
    kx, kp = jax.random.split(key)
    x = jax.random.normal(kx, (B, H, W, C), jnp.float32)   # NHWC
    params = make_params(kp, C)

    # TODO(synk): BatchNorm is implemented in inference mode (folded running
    # stats); PyTorch training-mode batch statistics are not reproduced.
    out = semantic_enhancement(x, params)
    out = jax.block_until_ready(out)

    ref = reference(x, params)
    assert out.shape == (B, H, W, C)
    assert jnp.allclose(out, ref, atol=1e-4, rtol=1e-4), (
        float(jnp.max(jnp.abs(out - ref))))
    print("KERNEL_OK")
</pallas_src>

<mosaic_0001>
module attributes {stable_mosaic.version = 11 : i64} {
  func.func @sem_kernel(%arg0: i32, %arg1: memref<1x256x32xf32, #tpu.memory_space<vmem>>, %arg2: memref<32x16xf32, #tpu.memory_space<vmem>>, %arg3: memref<9x16x32xf32, #tpu.memory_space<vmem>>, %arg4: memref<3x32xf32, #tpu.memory_space<vmem>>, %arg5: memref<32x16xf32, #tpu.memory_space<vmem>>, %arg6: memref<16x32xf32, #tpu.memory_space<vmem>>, %arg7: memref<32x32xf32, #tpu.memory_space<vmem>>, %arg8: memref<1x256x32xf32, #tpu.memory_space<vmem>>) attributes {dimension_semantics = [#tpu.dimension_semantics<parallel>], iteration_bounds = array<i64: 2>, scalar_prefetch = 0 : i64, scratch_operands = 0 : i64, tpu.core_type = #tpu.core_type<tc>, window_params = [{transform_indices = @transform_0, window_bounds = array<i64: 1, 256, 32>}, {pipeline_mode = #tpu.pipeline_mode<synchronous>, transform_indices = @transform_1, window_bounds = array<i64: 32, 16>}, {pipeline_mode = #tpu.pipeline_mode<synchronous>, transform_indices = @transform_2, window_bounds = array<i64: 9, 16, 32>}, {pipeline_mode = #tpu.pipeline_mode<synchronous>, transform_indices = @transform_3, window_bounds = array<i64: 3, 32>}, {pipeline_mode = #tpu.pipeline_mode<synchronous>, transform_indices = @transform_4, window_bounds = array<i64: 32, 16>}, {pipeline_mode = #tpu.pipeline_mode<synchronous>, transform_indices = @transform_5, window_bounds = array<i64: 16, 32>}, {pipeline_mode = #tpu.pipeline_mode<synchronous>, transform_indices = @transform_6, window_bounds = array<i64: 32, 32>}, {transform_indices = @transform_7, window_bounds = array<i64: 1, 256, 32>}]} {
    %c0 = arith.constant 0 : index
    %c0_0 = arith.constant 0 : index
    %c0_1 = arith.constant 0 : index
    %0 = vector.load %arg1[%c0, %c0_0, %c0_1] : memref<1x256x32xf32, #tpu.memory_space<vmem>>, vector<1x256x32xf32>
    %1 = vector.shape_cast %0 : vector<1x256x32xf32> to vector<256x32xf32>
    %c0_2 = arith.constant 0 : index
    %c0_3 = arith.constant 0 : index
    %2 = vector.load %arg4[%c0_2, %c0_3] : memref<3x32xf32, #tpu.memory_space<vmem>>, vector<3x32xf32>
    %3 = vector.extract_strided_slice %2 {offsets = [0, 0], sizes = [1, 16], strides = [1, 1]} : vector<3x32xf32> to vector<1x16xf32>
    %4 = vector.extract_strided_slice %2 {offsets = [1, 0], sizes = [1, 32], strides = [1, 1]} : vector<3x32xf32> to vector<1x32xf32>
    %5 = vector.extract_strided_slice %2 {offsets = [2, 0], sizes = [1, 32], strides = [1, 1]} : vector<3x32xf32> to vector<1x32xf32>
    %c0_4 = arith.constant 0 : index
    %c0_5 = arith.constant 0 : index
    %6 = vector.load %arg2[%c0_4, %c0_5] : memref<32x16xf32, #tpu.memory_space<vmem>>, vector<32x16xf32>
    %cst = arith.constant dense<0.000000e+00> : vector<256x16xf32>
    %7 = tpu.matmul %1, %6, %cst {dimension_numbers = #tpu.dot_dimension_numbers<[1], [0], [0], [1], [0, 0, 1, 1], [], []>} : vector<256x32xf32>, vector<32x16xf32>, vector<256x16xf32> -> vector<256x16xf32>
    %8 = vector.broadcast %3 : vector<1x16xf32> to vector<256x16xf32>
    %9 = arith.addf %7, %8 : vector<256x16xf32>
    %cst_6 = arith.constant 0.000000e+00 : f32
    %10 = vector.broadcast %cst_6 : f32 to vector<256x16xf32>
    %11 = arith.maximumf %9, %10 : vector<256x16xf32>
    %12 = tpu.iota {dimensions = array<i32: 0>} : vector<256x1xi32>
    %c16_i32 = arith.constant 16 : i32
    %c0_i32 = arith.constant 0 : i32
    %13 = arith.cmpi eq, %c16_i32, %c0_i32 : i32
    %c1_i32 = arith.constant 1 : i32
    %14 = arith.select %13, %c1_i32, %c16_i32 : i32
    %15 = vector.broadcast %14 : i32 to vector<256x1xi32>
    %16 = arith.remsi %12, %15 : vector<256x1xi32>
    %c0_i32_7 = arith.constant 0 : i32
    %17 = vector.broadcast %c0_i32_7 : i32 to vector<256x1xi32>
    %18 = arith.cmpi ne, %16, %17 : vector<256x1xi32>
    %c0_i32_8 = arith.constant 0 : i32
    %19 = vector.broadcast %c0_i32_8 : i32 to vector<256x1xi32>
    %20 = arith.cmpi slt, %16, %19 : vector<256x1xi32>
    %c0_i32_9 = arith.constant 0 : i32
    %21 = arith.cmpi slt, %14, %c0_i32_9 : i32
    %22 = vector.broadcast %21 : i1 to vector<256x1xi1>
    %23 = vector.broadcast %22 : vector<256x1xi1> to vector<256x1xi1>
    %24 = arith.xori %20, %23 : vector<256x1xi1>
    %25 = arith.andi %24, %18 : vector<256x1xi1>
    %26 = vector.broadcast %14 : i32 to vector<256x1xi32>
    %27 = arith.addi %16, %26 : vector<256x1xi32>
    %28 = arith.select %25, %27, %16 : vector<256x1xi1>, vector<256x1xi32>
    %c15_i32 = arith.constant 15 : i32
    %29 = vector.broadcast %c15_i32 : i32 to vector<256x1xi32>
    %30 = arith.cmpi slt, %28, %29 : vector<256x1xi32>
    %cst_10 = arith.constant 0.000000e+00 : f32
    %31 = vector.shape_cast %30 : vector<256x1xi1> to vector<256x1xi1>
    %32 = vector.broadcast %31 : vector<256x1xi1> to vector<256x16xi1>
    %33 = vector.broadcast %cst_10 : f32 to vector<256x16xf32>
    %34 = arith.select %32, %11, %33 : vector<256x16xi1>, vector<256x16xf32>
    %c0_i32_11 = arith.constant 0 : i32
    %35 = vector.broadcast %c0_i32_11 : i32 to vector<256x1xi32>
    %36 = arith.cmpi sgt, %28, %35 : vector<256x1xi32>
    %cst_12 = arith.constant 0.000000e+00 : f32
    %37 = vector.shape_cast %36 : vector<256x1xi1> to vector<256x1xi1>
    %38 = vector.broadcast %37 : vector<256x1xi1> to vector<256x16xi1>
    %39 = vector.broadcast %cst_12 : f32 to vector<256x16xf32>
    %40 = arith.select %38, %11, %39 : vector<256x16xi1>, vector<256x16xf32>
    %cst_13 = arith.constant 0.000000e+00 : f32
    %41 = vector.broadcast %cst_13 : f32 to vector<17x16xf32>
    %42 = tpu.concatenate %41, %34, %41 in 0 : vector<17x16xf32>, vector<256x16xf32>, vector<17x16xf32> -> vector<290x16xf32>
    %43 = tpu.concatenate %41, %11, %41 in 0 : vector<17x16xf32>, vector<256x16xf32>, vector<17x16xf32> -> vector<290x16xf32>
    %44 = tpu.concatenate %41, %40, %41 in 0 : vector<17x16xf32>, vector<256x16xf32>, vector<17x16xf32> -> vector<290x16xf32>
    %c0_14 = arith.constant 0 : index
    %c0_15 = arith.constant 0 : index
    %c0_16 = arith.constant 0 : index
    %45 = vector.load %arg3[%c0_14, %c0_15, %c0_16] : memref<9x16x32xf32, #tpu.memory_space<vmem>>, vector<9x16x32xf32>
    %46 = vector.extract_strided_slice %42 {offsets = [0, 0], sizes = [256, 16], strides = [1, 1]} : vector<290x16xf32> to vector<256x16xf32>
    %47 = vector.extract_strided_slice %45 {offsets = [0, 0, 0], sizes = [1, 16, 32], strides = [1, 1, 1]} : vector<9x16x32xf32> to vector<1x16x32xf32>
    %48 = vector.shape_cast %47 : vector<1x16x32xf32> to vector<16x32xf32>
    %cst_17 = arith.constant dense<0.000000e+00> : vector<256x32xf32>
    %49 = tpu.matmul %46, %48, %cst_17 {dimension_numbers = #tpu.dot_dimension_numbers<[1], [0], [0], [1], [0, 0, 1, 1], [], []>} : vector<256x16xf32>, vector<16x32xf32>, vector<256x32xf32> -> vector<256x32xf32>
    %50 = vector.extract_strided_slice %43 {offsets = [1, 0], sizes = [256, 16], strides = [1, 1]} : vector<290x16xf32> to vector<256x16xf32>
    %51 = vector.extract_strided_slice %45 {offsets = [1, 0, 0], sizes = [1, 16, 32], strides = [1, 1, 1]} : vector<9x16x32xf32> to vector<1x16x32xf32>
    %52 = vector.shape_cast %51 : vector<1x16x32xf32> to vector<16x32xf32>
    %cst_18 = arith.constant dense<0.000000e+00> : vector<256x32xf32>
    %53 = tpu.matmul %50, %52, %cst_18 {dimension_numbers = #tpu.dot_dimension_numbers<[1], [0], [0], [1], [0, 0, 1, 1], [], []>} : vector<256x16xf32>, vector<16x32xf32>, vector<256x32xf32> -> vector<256x32xf32>
    %54 = arith.addf %49, %53 : vector<256x32xf32>
    %55 = vector.extract_strided_slice %44 {offsets = [2, 0], sizes = [256, 16], strides = [1, 1]} : vector<290x16xf32> to vector<256x16xf32>
    %56 = vector.extract_strided_slice %45 {offsets = [2, 0, 0], sizes = [1, 16, 32], strides = [1, 1, 1]} : vector<9x16x32xf32> to vector<1x16x32xf32>
    %57 = vector.shape_cast %56 : vector<1x16x32xf32> to vector<16x32xf32>
    %cst_19 = arith.constant dense<0.000000e+00> : vector<256x32xf32>
    %58 = tpu.matmul %55, %57, %cst_19 {dimension_numbers = #tpu.dot_dimension_numbers<[1], [0], [0], [1], [0, 0, 1, 1], [], []>} : vector<256x16xf32>, vector<16x32xf32>, vector<256x32xf32> -> vector<256x32xf32>
    %59 = arith.addf %54, %58 : vector<256x32xf32>
    %60 = vector.extract_strided_slice %42 {offsets = [16, 0], sizes = [256, 16], strides = [1, 1]} : vector<290x16xf32> to vector<256x16xf32>
    %61 = vector.extract_strided_slice %45 {offsets = [3, 0, 0], sizes = [1, 16, 32], strides = [1, 1, 1]} : vector<9x16x32xf32> to vector<1x16x32xf32>
    %62 = vector.shape_cast %61 : vector<1x16x32xf32> to vector<16x32xf32>
    %cst_20 = arith.constant dense<0.000000e+00> : vector<256x32xf32>
    %63 = tpu.matmul %60, %62, %cst_20 {dimension_numbers = #tpu.dot_dimension_numbers<[1], [0], [0], [1], [0, 0, 1, 1], [], []>} : vector<256x16xf32>, vector<16x32xf32>, vector<256x32xf32> -> vector<256x32xf32>
    %64 = arith.addf %59, %63 : vector<256x32xf32>
    %65 = vector.extract_strided_slice %45 {offsets = [4, 0, 0], sizes = [1, 16, 32], strides = [1, 1, 1]} : vector<9x16x32xf32> to vector<1x16x32xf32>
    %66 = vector.shape_cast %65 : vector<1x16x32xf32> to vector<16x32xf32>
    %cst_21 = arith.constant dense<0.000000e+00> : vector<256x32xf32>
    %67 = tpu.matmul %11, %66, %cst_21 {dimension_numbers = #tpu.dot_dimension_numbers<[1], [0], [0], [1], [0, 0, 1, 1], [], []>} : vector<256x16xf32>, vector<16x32xf32>, vector<256x32xf32> -> vector<256x32xf32>
    %68 = arith.addf %64, %67 : vector<256x32xf32>
    %69 = vector.extract_strided_slice %44 {offsets = [18, 0], sizes = [256, 16], strides = [1, 1]} : vector<290x16xf32> to vector<256x16xf32>
    %70 = vector.extract_strided_slice %45 {offsets = [5, 0, 0], sizes = [1, 16, 32], strides = [1, 1, 1]} : vector<9x16x32xf32> to vector<1x16x32xf32>
    %71 = vector.shape_cast %70 : vector<1x16x32xf32> to vector<16x32xf32>
    %cst_22 = arith.constant dense<0.000000e+00> : vector<256x32xf32>
    %72 = tpu.matmul %69, %71, %cst_22 {dimension_numbers = #tpu.dot_dimension_numbers<[1], [0], [0], [1], [0, 0, 1, 1], [], []>} : vector<256x16xf32>, vector<16x32xf32>, vector<256x32xf32> -> vector<256x32xf32>
    %73 = arith.addf %68, %72 : vector<256x32xf32>
    %74 = vector.extract_strided_slice %42 {offsets = [32, 0], sizes = [256, 16], strides = [1, 1]} : vector<290x16xf32> to vector<256x16xf32>
    %75 = vector.extract_strided_slice %45 {offsets = [6, 0, 0], sizes = [1, 16, 32], strides = [1, 1, 1]} : vector<9x16x32xf32> to vector<1x16x32xf32>
    %76 = vector.shape_cast %75 : vector<1x16x32xf32> to vector<16x32xf32>
    %cst_23 = arith.constant dense<0.000000e+00> : vector<256x32xf32>
    %77 = tpu.matmul %74, %76, %cst_23 {dimension_numbers = #tpu.dot_dimension_numbers<[1], [0], [0], [1], [0, 0, 1, 1], [], []>} : vector<256x16xf32>, vector<16x32xf32>, vector<256x32xf32> -> vector<256x32xf32>
    %78 = arith.addf %73, %77 : vector<256x32xf32>
    %79 = vector.extract_strided_slice %43 {offsets = [33, 0], sizes = [256, 16], strides = [1, 1]} : vector<290x16xf32> to vector<256x16xf32>
    %80 = vector.extract_strided_slice %45 {offsets = [7, 0, 0], sizes = [1, 16, 32], strides = [1, 1, 1]} : vector<9x16x32xf32> to vector<1x16x32xf32>
    %81 = vector.shape_cast %80 : vector<1x16x32xf32> to vector<16x32xf32>
    %cst_24 = arith.constant dense<0.000000e+00> : vector<256x32xf32>
    %82 = tpu.matmul %79, %81, %cst_24 {dimension_numbers = #tpu.dot_dimension_numbers<[1], [0], [0], [1], [0, 0, 1, 1], [], []>} : vector<256x16xf32>, vector<16x32xf32>, vector<256x32xf32> -> vector<256x32xf32>
    %83 = arith.addf %78, %82 : vector<256x32xf32>
    %84 = vector.extract_strided_slice %44 {offsets = [34, 0], sizes = [256, 16], strides = [1, 1]} : vector<290x16xf32> to vector<256x16xf32>
    %85 = vector.extract_strided_slice %45 {offsets = [8, 0, 0], sizes = [1, 16, 32], strides = [1, 1, 1]} : vector<9x16x32xf32> to vector<1x16x32xf32>
    %86 = vector.shape_cast %85 : vector<1x16x32xf32> to vector<16x32xf32>
    %cst_25 = arith.constant dense<0.000000e+00> : vector<256x32xf32>
    %87 = tpu.matmul %84, %86, %cst_25 {dimension_numbers = #tpu.dot_dimension_numbers<[1], [0], [0], [1], [0, 0, 1, 1], [], []>} : vector<256x16xf32>, vector<16x32xf32>, vector<256x32xf32> -> vector<256x32xf32>
    %88 = arith.addf %83, %87 : vector<256x32xf32>
    %89 = vector.broadcast %4 : vector<1x32xf32> to vector<256x32xf32>
    %90 = arith.addf %88, %89 : vector<256x32xf32>
    %cst_26 = arith.constant dense<0.000000e+00> : vector<32xf32>
    %91 = vector.multi_reduction <add>, %1, %cst_26 [0] : vector<256x32xf32> to vector<32xf32>
    %92 = vector.shape_cast %91 : vector<32xf32> to vector<1x32xf32>
    %cst_27 = arith.constant 2.560000e+02 : f32
    %93 = vector.broadcast %cst_27 : f32 to vector<1x32xf32>
    %94 = arith.divf %92, %93 : vector<1x32xf32>
    %c0_28 = arith.constant 0 : index
    %c0_29 = arith.constant 0 : index
    %95 = vector.load %arg5[%c0_28, %c0_29] : memref<32x16xf32, #tpu.memory_space<vmem>>, vector<32x16xf32>
    %cst_30 = arith.constant dense<0.000000e+00> : vector<1x16xf32>
    %96 = tpu.matmul %94, %95, %cst_30 {dimension_numbers = #tpu.dot_dimension_numbers<[1], [0], [0], [1], [0, 0, 1, 1], [], []>} : vector<1x32xf32>, vector<32x16xf32>, vector<1x16xf32> -> vector<1x16xf32>
    %cst_31 = arith.constant 0.000000e+00 : f32
    %97 = vector.broadcast %cst_31 : f32 to vector<1x16xf32>
    %98 = arith.maximumf %96, %97 : vector<1x16xf32>
    %c0_32 = arith.constant 0 : index
    %c0_33 = arith.constant 0 : index
    %99 = vector.load %arg6[%c0_32, %c0_33] : memref<16x32xf32, #tpu.memory_space<vmem>>, vector<16x32xf32>
    %cst_34 = arith.constant dense<0.000000e+00> : vector<1x32xf32>
    %100 = tpu.matmul %98, %99, %cst_34 {dimension_numbers = #tpu.dot_dimension_numbers<[1], [0], [0], [1], [0, 0, 1, 1], [], []>} : vector<1x16xf32>, vector<16x32xf32>, vector<1x32xf32> -> vector<1x32xf32>
    %101 = arith.negf %100 : vector<1x32xf32>
    %102 = math.exp %101 : vector<1x32xf32>
    %cst_35 = arith.constant 1.000000e+00 : f32
    %103 = vector.broadcast %cst_35 : f32 to vector<1x32xf32>
    %104 = arith.addf %103, %102 : vector<1x32xf32>
    %105 = arith.divf %103, %104 : vector<1x32xf32>
    %106 = vector.broadcast %105 : vector<1x32xf32> to vector<256x32xf32>
    %107 = arith.mulf %90, %106 : vector<256x32xf32>
    %108 = arith.addf %107, %1 : vector<256x32xf32>
    %c0_36 = arith.constant 0 : index
    %c0_37 = arith.constant 0 : index
    %109 = vector.load %arg7[%c0_36, %c0_37] : memref<32x32xf32, #tpu.memory_space<vmem>>, vector<32x32xf32>
    %cst_38 = arith.constant dense<0.000000e+00> : vector<256x32xf32>
    %110 = tpu.matmul %108, %109, %cst_38 {dimension_numbers = #tpu.dot_dimension_numbers<[1], [0], [0], [1], [0, 0, 1, 1], [], []>} : vector<256x32xf32>, vector<32x32xf32>, vector<256x32xf32> -> vector<256x32xf32>
    %111 = vector.broadcast %5 : vector<1x32xf32> to vector<256x32xf32>
    %112 = arith.addf %110, %111 : vector<256x32xf32>
    %cst_39 = arith.constant 0.000000e+00 : f32
    %113 = vector.broadcast %cst_39 : f32 to vector<256x32xf32>
    %114 = arith.maximumf %112, %113 : vector<256x32xf32>
    %115 = vector.shape_cast %114 : vector<256x32xf32> to vector<1x256x32xf32>
    %c0_40 = arith.constant 0 : index
    %c0_41 = arith.constant 0 : index
    %c0_42 = arith.constant 0 : index
    %116 = vector.load %arg8[%c0_40, %c0_41, %c0_42] : memref<1x256x32xf32, #tpu.memory_space<vmem>>, vector<1x256x32xf32>
    tpu.vector_store %arg8[%c0_40, %c0_41, %c0_42], %115 {strides = array<i32>} : memref<1x256x32xf32, #tpu.memory_space<vmem>>, vector<1x256x32xf32>,
    return
  }
  func.func @transform_0(%arg0: i32) -> (i32, i32, i32) {
    %c0_i32 = arith.constant 0 : i32
    %c0_i32_0 = arith.constant 0 : i32
    %c0_i32_1 = arith.constant 0 : i32
    return %arg0, %c0_i32, %c0_i32_0 : i32, i32, i32
  }
  func.func @transform_1(%arg0: i32) -> (i32, i32) {
    %c0_i32 = arith.constant 0 : i32
    %c0_i32_0 = arith.constant 0 : i32
    %c0_i32_1 = arith.constant 0 : i32
    return %c0_i32, %c0_i32_0 : i32, i32
  }
  func.func @transform_2(%arg0: i32) -> (i32, i32, i32) {
    %c0_i32 = arith.constant 0 : i32
    %c0_i32_0 = arith.constant 0 : i32
    %c0_i32_1 = arith.constant 0 : i32
    %c0_i32_2 = arith.constant 0 : i32
    return %c0_i32, %c0_i32_0, %c0_i32_1 : i32, i32, i32
  }
  func.func @transform_3(%arg0: i32) -> (i32, i32) {
    %c0_i32 = arith.constant 0 : i32
    %c0_i32_0 = arith.constant 0 : i32
    %c0_i32_1 = arith.constant 0 : i32
    return %c0_i32, %c0_i32_0 : i32, i32
  }
  func.func @transform_4(%arg0: i32) -> (i32, i32) {
    %c0_i32 = arith.constant 0 : i32
    %c0_i32_0 = arith.constant 0 : i32
    %c0_i32_1 = arith.constant 0 : i32
    return %c0_i32, %c0_i32_0 : i32, i32
  }
  func.func @transform_5(%arg0: i32) -> (i32, i32) {
    %c0_i32 = arith.constant 0 : i32
    %c0_i32_0 = arith.constant 0 : i32
    %c0_i32_1 = arith.constant 0 : i32
    return %c0_i32, %c0_i32_0 : i32, i32
  }
  func.func @transform_6(%arg0: i32) -> (i32, i32) {
    %c0_i32 = arith.constant 0 : i32
    %c0_i32_0 = arith.constant 0 : i32
    %c0_i32_1 = arith.constant 0 : i32
    return %c0_i32, %c0_i32_0 : i32, i32
  }
  func.func @transform_7(%arg0: i32) -> (i32, i32, i32) {
    %c0_i32 = arith.constant 0 : i32
    %c0_i32_0 = arith.constant 0 : i32
    %c0_i32_1 = arith.constant 0 : i32
    return %arg0, %c0_i32, %c0_i32_0 : i32, i32, i32
  }
}

</mosaic_0001>

<bundles_post_ra>
// kernel: tpu_custom_call.1
= control target key start
LH: loop header
LB: loop body
LE: loop exit
PB: predicated region body
PF: predicated region fallthrough
CT: control target
= control target key end

     0   :  { %s6889_s24 = smov 0   ;;  %s9359_s0 = inlined_call_operand.vmem [shape: f32[2,256,32], index: 0, kind: input, shape index: {}]   ;;  %s9360_s1 = inlined_call_operand.vmem [shape: f32[32,16], index: 1, kind: input, shape index: {}]   ;;  %s9361_s2 = inlined_call_operand.vmem [shape: f32[9,16,32], index: 2, kind: input, shape index: {}]   ;;  %s9362_s3 = inlined_call_operand.vmem [shape: f32[3,32], index: 3, kind: input, shape index: {}]   ;;  %s9363_s4 = inlined_call_operand.vmem [shape: f32[32,16], index: 4, kind: input, shape index: {}]   ;;  %s9364_s5 = inlined_call_operand.vmem [shape: f32[16,32], index: 5, kind: input, shape index: {}]   ;;  %s9365_s6 = inlined_call_operand.vmem [shape: f32[32,32], index: 6, kind: input, shape index: {}]   ;;  %s9366_s7 = inlined_call_operand.vmem [shape: f32[2,256,32], index: 7, kind: output, shape index: {}]  }
   0x1 LB: > { %s5114_s25 = sadd.s32 4294967295, %s6844_s24   ;;  %p5118_p0 = scmp.ge.s32.totalorder %s6844_s24, 1  ;;  %s6844_s24 = sphi %s6889_s24, %s17_s24  }
   0x2   : > { %p237_p1 = scmp.lt.s32.totalorder %s6844_s24, 3 }
   0x4   : > { %p238_p2 = pnand %p5118_p0, %p237_p1 }
   0x6   : > { %241 = sbr.rel (%p238_p2) target bundleno = 1224 (0x4c8), region = 48 }
   0xd   : > { %v312_v0 = vld [vmem:[%s9360_s1] sm:$0xff]  ;;  %v313_v1 = vld [vmem:[%s9360_s1 + $0x8] sm:$0xff]  ;;  %v314_v2 = vld [vmem:[%s9360_s1 + $0x10] sm:$0xff]  ;;  %p269_p3 = scmp.lt.s32.totalorder %s5114_s25, 1  ;;  %vm9467_vm0 = vcmask 261120   ;;  %v9368_v41 = vmov 0.0   ;;  %v316_v52 = vlaneseq }
   0xe   : > { %v6463_v3 = vpack.c.bf16 %v313_v1, %v312_v0  ;;  %v315_v4 = vld [vmem:[%s9360_s1 + $0x18] sm:$0xff]  ;;  %v1647_v6 = vld [vmem:[%s9361_s2 + $0x10] sm:$0xff]  ;;  %v7008_v42 = vrot.slane %v9368_v41, 1  ;;  %vm1730_vm1 = vcmask 130048   ;;  %v1645_v43 = vld [vmem:[%s9361_s2] sm:$0xff]  ;;  %vm1379_vm2 = vcmask 1040384  }
   0xf   : > { %v6467_v5 = vpack.c.bf16 %v315_v4, %v314_v2  ;;  %s10009_s25 = smov (!%p269_p3, %s5114_s25), 1  ;;  %v1648_v7 = vld [vmem:[%s9361_s2 + $0x18] sm:$0xff]  ;;  %v1646_v44 = vld [vmem:[%s9361_s2 + $0x8] sm:$0xff]  ;;  %v1651_v46 = vld [vmem:[%s9361_s2 + $0x30] sm:$0xff]  ;;  %v7044_v56 = vshrl.u32 %v316_v52, 7  ;;  %vm1665_vm3 = vcmask 1046528  }
  0x10   : > { %6464 = vmatprep.subr.bf16.mxu0 %v6463_v3  ;;  %s5477_s15 = sshll.u32 %s10009_s25, 8  ;;  %v6471_v8 = vpack.c.bf16 %v1648_v7, %v1647_v6  ;;  %9545 = vst [vmem:[#allocation2_spill] sm:$0xff] %v7008_v42  ;;  %v7018_v45 = vpack.c.bf16 %v1646_v44, %v1645_v43  ;;  %v1652_v47 = vld [vmem:[%s9361_s2 + $0x38] sm:$0xff]  ;;  %v1653_v49 = vld [vmem:[%s9361_s2 + $0x40] sm:$0xff]  ;;  %v1654_v50 = vld [vmem:[%s9361_s2 + $0x48] sm:$0xff] }
  0x11   : > { %6466 = vmatpush3.bf16.msra.mxu0 %v6463_v3  ;;  %s6923_s18 = scalar_lea.vmem %s9359_s0, %s5477_s15  ;;  %v7027_v48 = vpack.c.bf16 %v1652_v47, %v1651_v46  ;;  %v7037_v51 = vpack.c.bf16 %v1654_v50, %v1653_v49  ;;  %9547 = vst [vmem:[#allocation4_spill] sm:$0xff] %v7044_v56  ;;  %v9367_v59 = vsub.s32 0, %v7044_v56  ;;  %v311_v61 = vld [vmem:[%s9362_s3] sm:$0x7]  ;;  %v7059_v0 = vadd.s32 8, %v7044_v56  ;;  %s9259_s19 = scalar_lea.vmem %s9366_s7, %s5477_s15 }
  0x12   : > { %6468 = vmatprep.subr.bf16.mxu0 %v6467_v5  ;;  %v6926_v9 = vld [vmem:[%s6923_s18] sm:$0xff]  ;;  %v6931_v10 = vld [vmem:[%s6923_s18 + $0x8] sm:$0xff]  ;;  %v6934_v11 = vld [vmem:[%s6923_s18 + $0x10] sm:$0xff]  ;;  %v7068_v4 = vadd.s32 24, %v7044_v56  ;;  %v7137_v43 = vadd.s32 96, %v7044_v56  ;;  %v7145_v50 = vadd.s32 120, %v7044_v56 }
  0x13   : > { %5873 = vmatprep.mubr.msk.f32.mxu0 %vm9467_vm0, %v6926_v9  ;;  %v6941_v12 = vld [vmem:[%s6923_s18 + $0x18] sm:$0xff]  ;;  %v6944_v13 = vld [vmem:[%s6923_s18 + $0x20] sm:$0xff]  ;;  %v6951_v14 = vld [vmem:[%s6923_s18 + $0x28] sm:$0xff]  ;;  %9546 = vst [vmem:[#allocation3_spill] sm:$0xff] %v7027_v48  ;;  %6524 = vmatprep.subr.bf16.mxu1 %v7027_v48  ;;  %v4368_v53 = vsel %vm9467_vm0, %v6926_v9, 0.0  ;;  %v4369_v54 = vsel %vm9467_vm0, %v6931_v10, 0.0  ;;  %v7056_v63 = vrot.slane %v311_v61, %v9367_v59 }
  0x14   : > { %v285_v15 = vld [vmem:[%s6923_s18 + $0x30] sm:$0xff]  ;;  %v286_v16 = vld [vmem:[%s6923_s18 + $0x38] sm:$0xff]  ;;  %v287_v17 = vld [vmem:[%s6923_s18 + $0x40] sm:$0xff]  ;;  %6525 = vmatpush3.bf16.msra.mxu1 %v7027_v48  ;;  %v4370_v55 = vadd.f32 %v4369_v54, %v4368_v53  ;;  %v4371_v57 = vsel %vm9467_vm0, %v6934_v11, 0.0  ;;  %v4373_v60 = vsel %vm9467_vm0, %v6941_v12, 0.0  ;;  %v4375_v1 = vsel %vm9467_vm0, %v6944_v13, 0.0 }
  0x15   : > { %6470 = vmatpush3.bf16.msra.mxu0 %v6467_v5  ;;  %v288_v18 = vld [vmem:[%s6923_s18 + $0x48] sm:$0xff]  ;;  %v289_v19 = vld [vmem:[%s6923_s18 + $0x50] sm:$0xff]  ;;  %v290_v20 = vld [vmem:[%s6923_s18 + $0x58] sm:$0xff]  ;;  %6488 = vmatprep.subr.bf16.mxu1 %v7037_v51  ;;  %v7065_v2 = vsel %vm9467_vm0, %v6951_v14, 0.0  ;;  %v7071_v5 = vadd.s32 40, %v7044_v56  ;;  %v7152_v54 = vadd.s32 112, %v7044_v56 }
  0x16   : > { %6472 = vmatprep.subr.bf16.mxu0 %v6471_v8  ;;  %v291_v21 = vld [vmem:[%s6923_s18 + $0x60] sm:$0xff]  ;;  %v292_v22 = vld [vmem:[%s6923_s18 + $0x68] sm:$0xff]  ;;  %v293_v23 = vld [vmem:[%s6923_s18 + $0x70] sm:$0xff]  ;;  %v4372_v58 = vadd.f32 %v4371_v57, %v4370_v55  ;;  %9548 = vst [vmem:[#allocation5_spill] sm:$0xff] %v7065_v2  ;;  %v7160_v61 = vadd.s32 136, %v7044_v56 }
  0x17   : > { %v294_v24 = vld [vmem:[%s6923_s18 + $0x78] sm:$0xff]  ;;  %v295_v25 = vld [vmem:[%s6923_s18 + $0x80] sm:$0xff]  ;;  %v296_v26 = vld [vmem:[%s6923_s18 + $0x88] sm:$0xff] }
  0x18   : > { %5874 = vmatmul.mubr.msk.f32.vlgmr.msra.gmra.mrb[0].mxu0 %vm9467_vm0, %v6931_v10  ;;  %v297_v27 = vld [vmem:[%s6923_s18 + $0x90] sm:$0xff]  ;;  %v298_v28 = vld [vmem:[%s6923_s18 + $0x98] sm:$0xff]  ;;  %v299_v29 = vld [vmem:[%s6923_s18 + $0xa0] sm:$0xff]  ;;  %v4374_v62 = vadd.f32 %v4373_v60, %v4372_v58  ;;  %v7078_v10 = vadd.s32 56, %v7044_v56 }
  0x19   : > { %5876 = vmatprep.mubr.msk.f32.mxu0 %vm9467_vm0, %v6934_v11  ;;  %6474 = vmatpush3.bf16.msra.mxu0 %v6471_v8  ;;  %v300_v30 = vld [vmem:[%s6923_s18 + $0xa8] sm:$0xff]  ;;  %v301_v31 = vld [vmem:[%s6923_s18 + $0xb0] sm:$0xff]  ;;  %v302_v32 = vld [vmem:[%s6923_s18 + $0xb8] sm:$0xff] }
  0x1a   : > { %v303_v33 = vld [vmem:[%s6923_s18 + $0xc0] sm:$0xff]  ;;  %v304_v34 = vld [vmem:[%s6923_s18 + $0xc8] sm:$0xff]  ;;  %v305_v35 = vld [vmem:[%s6923_s18 + $0xd0] sm:$0xff]  ;;  %6476 = vmatprep.subr.bf16.mxu0 %v7018_v45  ;;  %v7073_v6 = vadd.f32 %v4375_v1, %v4374_v62 }
  0x1b   : > { %v306_v36 = vld [vmem:[%s6923_s18 + $0xd8] sm:$0xff]  ;;  %v307_v37 = vld [vmem:[%s6923_s18 + $0xe0] sm:$0xff]  ;;  %v308_v38 = vld [vmem:[%s6923_s18 + $0xe8] sm:$0xff] }
  0x1c   : > { %5877 = vmatmul.mubr.msk.f32.gmra.mrb[2].mxu0 %vm9467_vm0, %v6941_v12  ;;  %v309_v39 = vld [vmem:[%s6923_s18 + $0xf0] sm:$0xff]  ;;  %v310_v40 = vld [vmem:[%s6923_s18 + $0xf8] sm:$0xff]  ;;  %9549 = vst [vmem:[#allocation6_spill] sm:$0xff] %v7073_v6  ;;  %v7082_v12 = vadd.s32 48, %v7044_v56 }
  0x1d   : > { %5879 = vmatprep.mubr.msk.f32.mxu0 %vm9467_vm0, %v6944_v13  ;;  %v7085_v13 = vadd.s32 72, %v7044_v56 }
  0x20   : > { %5880 = vmatmul.mubr.msk.f32.gmra.mrb[4].mxu0 %vm9467_vm0, %v6951_v14 }
  0x21   : > { %5882 = vmatprep.mubr.msk.f32.mxu0 %vm9467_vm0, %v285_v15  ;;  %v7090_v15 = vadd.s32 64, %v7044_v56 }
  0x24   : > { %5883 = vmatmul.mubr.msk.f32.gmra.mrb[6].mxu0 %vm9467_vm0, %v286_v16  ;;  %v7093_v16 = vadd.s32 88, %v7044_v56 }
  0x25   : > { %5885 = vmatprep.mubr.msk.f32.mxu0 %vm9467_vm0, %v287_v17  ;;  %v7096_v17 = vadd.s32 80, %v7044_v56 }
  0x28   : > { %5886 = vmatmul.mubr.msk.f32.gmra.mrb[8].mxu0 %vm9467_vm0, %v288_v18 }
  0x29   : > { %5888 = vmatprep.mubr.msk.f32.mxu0 %vm9467_vm0, %v289_v19 }
  0x2c   : > { %5889 = vmatmul.mubr.msk.f32.gmra.mrb[10].mxu0 %vm9467_vm0, %v290_v20  ;;  %v7386_v20 = vadd.s32 216, %v7044_v56 }
  0x2d   : > { %5891 = vmatprep.mubr.msk.f32.mxu0 %vm9467_vm0, %v291_v21 }
  0x30   : > { %5892 = vmatmul.mubr.msk.f32.gmra.mrb[12].mxu0 %vm9467_vm0, %v292_v22 }
  0x31   : > { %5894 = vmatprep.mubr.msk.f32.mxu0 %vm9467_vm0, %v293_v23 }
  0x34   : > { %5895 = vmatmul.mubr.msk.f32.gmra.mrb[14].mxu0 %vm9467_vm0, %v294_v24 }
  0x35   : > { %5897 = vmatprep.mubr.msk.f32.mxu0 %vm9467_vm0, %v295_v25  ;;  %v7252_v25 = vadd.s32 184, %v7044_v56 }
  0x38   : > { %5898 = vmatmul.mubr.msk.f32.gmra.mrb[16].mxu0 %vm9467_vm0, %v296_v26  ;;  %v7108_v26 = vadd.s32 104, %v7044_v56 }
  0x39   : > { %5900 = vmatprep.mubr.msk.f32.mxu0 %vm9467_vm0, %v297_v27 }
  0x3a   : > { %v802_v49 = vand.u32 15, %v7108_v26 }
  0x3c   : > { %5901 = vmatmul.mubr.msk.f32.gmra.mrb[18].mxu0 %vm9467_vm0, %v298_v28  ;;  %vm7218_vm5 = vcmp.lt.s32.totalorder %v802_v49, 15 }
  0x3d   : > { %5903 = vmatprep.mubr.msk.f32.mxu0 %vm9467_vm0, %v299_v29 }
  0x40   : > { %5904 = vmatmul.mubr.msk.f32.gmra.mrb[20].mxu0 %vm9467_vm0, %v300_v30 }
  0x41   : > { %5906 = vmatprep.mubr.msk.f32.mxu0 %vm9467_vm0, %v301_v31 }
  0x44   : > { %5907 = vmatmul.mubr.msk.f32.gmra.mrb[22].mxu0 %vm9467_vm0, %v302_v32 }
  0x45   : > { %5909 = vmatprep.mubr.msk.f32.mxu0 %vm9467_vm0, %v303_v33  ;;  %v788_v33 = vand.u32 15, %v7093_v16 }
  0x47   : > { %vm7202_vm4 = vcmp.lt.s32.totalorder %v788_v33, 15 }
  0x48   : > { %5910 = vmatmul.mubr.msk.f32.gmra.mrb[24].mxu0 %vm9467_vm0, %v304_v34 }
  0x49   : > { %5912 = vmatprep.mubr.msk.f32.mxu0 %vm9467_vm0, %v305_v35  ;;  %v1649_v35 = vld [vmem:[%s9361_s2 + $0x20] sm:$0xff] }
  0x4c   : > { %5913 = vmatmul.mubr.msk.f32.gmra.mrb[26].mxu0 %vm9467_vm0, %v306_v36  ;;  %v1650_v36 = vld [vmem:[%s9361_s2 + $0x28] sm:$0xff] }
  0x4d   : > { %5915 = vmatprep.mubr.msk.f32.mxu0 %vm9467_vm0, %v307_v37  ;;  %v7154_v55 = vpack.c.bf16 %v1650_v36, %v1649_v35  ;;  %v7184_v35 = vadd.s32 152, %v7044_v56  ;;  %v7187_v36 = vadd.s32 144, %v7044_v56 }
  0x4f   : > { %9555 = vst [vmem:[#allocation12_spill] sm:$0xff] %v7154_v55 }
  0x50   : > { %5916 = vmatmul.mubr.msk.f32.gmra.mrb[28].mxu0 %vm9467_vm0, %v308_v38 }
  0x51   : > { %5918 = vmatprep.mubr.msk.f32.mxu0 %vm9467_vm0, %v309_v39 }
  0x54   : > { %5919 = vmatmul.mubr.msk.f32.gmra.mrb[30].mxu0 %vm9467_vm0, %v310_v40 }
  0x55   : > { %5925 = vmatprep.mubr.msk.f32.mxu0 %vm1730_vm1, %v7008_v42 }
  0xeb   : > { %v5875_v3 = vpop.f32.mrb[0].mxu0 }
  0xec   : > { %v489_v7 = vadd.f32 %v5875_v3, %v7056_v63  ;;  %v483_v9 = vpop.f32.mrb[1].mxu0 }
  0xed   : > { %v484_v11 = vadd.f32 %v483_v9, %v7056_v63  ;;  %v7170_v9 = vadd.s32 128, %v7044_v56 }
  0xee   : > { %v7087_v14 = vmax.f32 %v489_v7, 0.0 }
  0xef   : > { %v7098_v18 = vmax.f32 %v484_v11, 0.0  ;;  %v5878_v19 = vpop.f32.mrb[2].mxu0 }
  0xf0   : > { %9550 = vst [vmem:[#allocation7_spill] sm:$0xff] %v7087_v14  ;;  %v7103_v22 = vrot.slane %v7087_v14, 7  ;;  %v499_v23 = vadd.f32 %v5878_v19, %v7056_v63  ;;  %v493_v24 = vpop.f32.mrb[3].mxu0 }
  0xf1   : > { %v7111_v27 = vrot.slane %v7098_v18, 7  ;;  %v494_v28 = vadd.f32 %v493_v24, %v7056_v63 }
  0xf2   : > { %9551 = vst [vmem:[#allocation8_spill] sm:$0xff] %v7103_v22  ;;  %v7116_v31 = vmax.f32 %v499_v23, 0.0 }
  0xf3   : > { %v7129_v37 = vsel %vm1379_vm2, 0.0, %v7111_v27  ;;  %v7131_v38 = vmax.f32 %v494_v28, 0.0  ;;  %v5881_v39 = vpop.f32.mrb[4].mxu0  ;;  %v1481_v40 = vsel %vm1379_vm2, %v7111_v27, %v7103_v22  ;;  %v816_v28 = vand.u32 15, %v7145_v50 }
  0xf4   : > { %9552 = vst [vmem:[#allocation9_spill] sm:$0xff] %v7129_v37  ;;  %v1668_v44 = vrot.slane %v7129_v37, 1  ;;  %v7141_v46 = vrot.slane %v7116_v31, 7  ;;  %v503_v47 = vpop.f32.mrb[5].mxu0  ;;  %v509_v53 = vadd.f32 %v5881_v39, %v7056_v63  ;;  %v1670_v60 = vrot.slane %v1481_v40, 1 }
  0xf5   : > { %9553 = vst [vmem:[#allocation10_spill] sm:$0xff] %v7131_v38  ;;  %v7148_v52 = vrot.slane %v7131_v38, 7  ;;  %v504_v57 = vadd.f32 %v503_v47, %v7056_v63  ;;  %vm7258_vm6 = vcmp.lt.s32.totalorder %v816_v28, 15 }
  0xf6   : > { %9554 = vst [vmem:[#allocation11_spill] sm:$0xff] %v7141_v46  ;;  %v1669_v58 = vsel %vm1665_vm3, %v7008_v42, %v1668_v44  ;;  %v7162_v62 = vmax.f32 %v509_v53, 0.0  ;;  %v1671_v23 = vsel %vm1665_vm3, %v1668_v44, %v1670_v60 }
  0xf7   : > { %v5884_v1 = vpop.f32.mrb[6].mxu0  ;;  %5926 = vmatmul.mubr.msk.f32.vlgmr.msra.gmra.mrb[32].mxu0 %vm1730_vm1, %v1669_v58  ;;  %v1483_v3 = vsel %vm1379_vm2, %v7103_v22, %v7148_v52  ;;  %v7172_v11 = vmax.f32 %v504_v57, 0.0  ;;  %v1485_v24 = vsel %vm1379_vm2, %v7148_v52, %v7141_v46 }
  0xf8   : > { %v519_v16 = vadd.f32 %v5884_v1, %v7056_v63  ;;  %6478 = vmatpush3.bf16.msra.mxu0 %v7018_v45  ;;  %v513_v19 = vpop.f32.mrb[7].mxu0  ;;  %5928 = vmatprep.mubr.msk.f32.mxu0 %vm1730_vm1, %v1671_v23  ;;  %v7198_v47 = vrot.slane %v7162_v62, 7  ;;  %v1672_v57 = vrot.slane %v1483_v3, 1  ;;  %v1674_v58 = vrot.slane %v1485_v24, 1 }
  0xf9   : > { %9556 = vst [vmem:[#allocation13_spill] sm:$0xff] %v7172_v11  ;;  %v514_v26 = vadd.f32 %v513_v19, %v7056_v63  ;;  %6480 = vmatprep.subr.bf16.mxu0 %v7154_v55  ;;  %v7191_v45 = vrot.slane %v7172_v11, 7 }
  0xfa   : > { %v7193_v39 = vmax.f32 %v519_v16, 0.0  ;;  %9558 = vst [vmem:[#allocation15_spill] sm:$0xff] %v7198_v47  ;;  %v1673_v33 = vsel %vm1665_vm3, %v1670_v60, %v1672_v57  ;;  %v7227_v40 = vsel %vm1665_vm3, %v1672_v57, %v1674_v58  ;;  %v7233_v60 = vadd.s32 160, %v7044_v56 }
  0xfb   : > { %9557 = vst [vmem:[#allocation14_spill] sm:$0xff] %v7191_v45  ;;  %v7200_v50 = vmax.f32 %v514_v26, 0.0  ;;  %v5887_v53 = vpop.f32.mrb[8].mxu0  ;;  %v1487_v59 = vsel %vm1379_vm2, %v7141_v46, %v7191_v45  ;;  %5929 = vmatmul.mubr.msk.f32.gmra.mrb[34].mxu0 %vm1730_vm1, %v1673_v33  ;;  %9565 = vst [vmem:[#allocation18_spill] sm:$0xff] %v7227_v40  ;;  %v7230_v26 = vadd.s32 168, %v7044_v56  ;;  %v7295_v46 = vadd.s32 200, %v7044_v56 }
  0xfc   : > { %v7207_v19 = vrot.slane %v7193_v39, 7  ;;  %v529_v16 = vadd.f32 %v5887_v53, %v7056_v63  ;;  %v523_v23 = vpop.f32.mrb[9].mxu0  ;;  %5931 = vmatprep.mubr.msk.f32.mxu0 %vm1730_vm1, %v7227_v40  ;;  %v1676_v53 = vrot.slane %v1487_v59, 1  ;;  %v9598_v40 = vand.u32 15, %v7252_v25 }
  0xfd   : > { %v7215_v41 = vrot.slane %v7200_v50, 7  ;;  %v524_v30 = vadd.f32 %v523_v23, %v7056_v63  ;;  %v1489_v23 = vsel %vm1379_vm2, %v7191_v45, %v7198_v47 }
  0xfe   : > { %9561 = vst [vmem:[#allocation16_spill] sm:$0xff] %v7207_v19  ;;  %v7235_v49 = vmax.f32 %v529_v16, 0.0  ;;  %v7255_v59 = vsel %vm1665_vm3, %v1674_v58, %v1676_v53  ;;  %v1678_v21 = vrot.slane %v1489_v23, 1  ;;  %vm7435_vm10 = vcmp.lt.s32.totalorder %v9598_v40, 15 }
  0xff   : > { %9562 = vst [vmem:[#allocation17_spill] sm:$0xff] %v7215_v41  ;;  %v5890_v7 = vpop.f32.mrb[10].mxu0  ;;  %v1491_v57 = vsel %vm1379_vm2, %v7198_v47, %v7215_v41  ;;  %v7245_v33 = vmax.f32 %v524_v30, 0.0  ;;  %v1493_v16 = vsel %vm1379_vm2, %v7215_v41, %v7207_v19  ;;  %9566 = vst [vmem:[#allocation19_spill] sm:$0xff] %v7255_v59  ;;  %v7263_v30 = vadd.s32 176, %v7044_v56  ;;  %5932 = vmatmul.mubr.msk.f32.gmra.mrb[36].mxu0 %vm1730_vm1, %v7255_v59 }
 0x100   : > { %v539_v34 = vadd.f32 %v5890_v7, %v7056_v63  ;;  %v533_v32 = vpop.f32.mrb[11].mxu0  ;;  %v1680_v58 = vrot.slane %v1491_v57, 1  ;;  %v7279_v23 = vsel %vm1665_vm3, %v1676_v53, %v1678_v21  ;;  %v1682_v42 = vrot.slane %v1493_v16, 1 }
 0x101   : > { %v534_v29 = vadd.f32 %v533_v32, %v7056_v63  ;;  %v7266_v7 = vrot.slane %v7245_v33, 7  ;;  %v7274_v32 = vrot.slane %v7235_v49, 7  ;;  %9572 = vst [vmem:[#allocation23_spill] sm:$0xff] %v7279_v23  ;;  %5934 = vmatprep.mubr.msk.f32.mxu0 %vm1730_vm1, %v7279_v23  ;;  %v9576_v16 = vand.u32 15, %v7160_v61 }
 0x102   : > { %v7268_v8 = vmax.f32 %v539_v34, 0.0  ;;  %v7285_v59 = vsel %vm1665_vm3, %v1678_v21, %v1680_v58  ;;  %v7305_v24 = vsel %vm1665_vm3, %v1680_v58, %v1682_v42 }
 0x103   : > { %9569 = vst [vmem:[#allocation20_spill] sm:$0xff] %v7266_v7  ;;  %9571 = vst [vmem:[#allocation22_spill] sm:$0xff] %v7274_v32  ;;  %v7276_v28 = vmax.f32 %v534_v29, 0.0  ;;  %v5893_v44 = vpop.f32.mrb[12].mxu0  ;;  %5935 = vmatmul.mubr.msk.f32.gmra.mrb[38].mxu0 %vm1730_vm1, %v7285_v59  ;;  %vm7312_vm7 = vcmp.lt.s32.totalorder %v9576_v16, 15  ;;  %v1497_v23 = vsel %vm1379_vm2, %v7266_v7, %v7274_v32 }
 0x104   : > { %9570 = vst [vmem:[#allocation21_spill] sm:$0xff] %v7268_v8  ;;  %v549_v34 = vadd.f32 %v5893_v44, %v7056_v63  ;;  %9573 = vst [vmem:[#allocation24_spill] sm:$0xff] %v7285_v59  ;;  %v543_v57 = vpop.f32.mrb[13].mxu0  ;;  %v1198_v21 = vsel %vm7202_vm4, %v7268_v8, 0.0  ;;  %v7317_v1 = vrot.slane %v7268_v8, 7  ;;  %5937 = vmatprep.mubr.msk.f32.mxu0 %vm1730_vm1, %v7305_v24  ;;  %v1686_v8 = vrot.slane %v1497_v23, 1 }
 0x105   : > { %v7290_v29 = vrot.slane %v7276_v28, 7  ;;  %v544_v53 = vadd.f32 %v543_v57, %v7056_v63  ;;  %9575 = vst [vmem:[#allocation26_spill] sm:$0xff] %v7305_v24  ;;  %v1495_v57 = vsel %vm1379_vm2, %v7207_v19, %v7266_v7  ;;  %v7333_v2 = vrot.slane %v1198_v21, 7 }
 0x106   : > { %v7300_v44 = vmax.f32 %v549_v34, 0.0  ;;  %9579 = vst [vmem:[#allocation27_spill] sm:$0xff] %v7317_v1  ;;  %v1684_v59 = vrot.slane %v1495_v57, 1  ;;  %v9581_v7 = vand.u32 15, %v7184_v35 }
 0x107   : > { %v7319_v34 = vmax.f32 %v544_v53, 0.0  ;;  %v5896_v58 = vpop.f32.mrb[14].mxu0  ;;  %v1499_v53 = vsel %vm1379_vm2, %v7274_v32, %v7290_v29 }
 0x108   : > { %9574 = vst [vmem:[#allocation25_spill] sm:$0xff] %v7300_v44  ;;  %v1200_v61 = vsel %vm7218_vm5, %v7300_v44, 0.0  ;;  %v559_v16 = vadd.f32 %v5896_v58, %v7056_v63  ;;  %v553_v22 = vpop.f32.mrb[15].mxu0  ;;  %v7337_v6 = vsel %vm1665_vm3, %v1682_v42, %v1684_v59  ;;  %vm7341_vm8 = vcmp.lt.s32.totalorder %v9581_v7, 15 }
 0x109   : > { %v1405_v24 = vrot.slane %v1200_v61, 7  ;;  %v1403_v57 = vrot.slane %v7319_v34, 7  ;;  %9580 = vst [vmem:[#allocation28_spill] sm:$0xff] %v7337_v6  ;;  %5938 = vmatmul.mubr.msk.f32.gmra.mrb[40].mxu0 %vm1730_vm1, %v7337_v6  ;;  %v554_v23 = vadd.f32 %v553_v22, %v7056_v63  ;;  %v7351_v21 = vsel %vm1665_vm3, %v1684_v59, %v1686_v8 }
 0x10a   : > { %v7345_v58 = vmax.f32 %v559_v16, 0.0  ;;  %9585 = vst [vmem:[#allocation30_spill] sm:$0xff] %v7351_v21  ;;  %v7354_v61 = vadd.s32 192, %v7044_v56  ;;  %5940 = vmatprep.mubr.msk.f32.mxu0 %vm1730_vm1, %v7351_v21  ;;  %v1688_v35 = vrot.slane %v1499_v53, 1  ;;  %v1501_v7 = vsel %vm1379_vm2, %v7290_v29, %v7317_v1 }
 0x10b   : > { %v5899_v42 = vpop.f32.mrb[16].mxu0  ;;  %v7363_v16 = vsel %vm1379_vm2, %v7333_v2, %v1403_v57  ;;  %v7366_v22 = vsel %vm1379_vm2, %v1403_v57, %v1405_v24  ;;  %v7369_v59 = vrot.slane %v7300_v44, 7  ;;  %v7374_v6 = vmax.f32 %v554_v23, 0.0 }
 0x10c   : > { %9584 = vst [vmem:[#allocation29_spill] sm:$0xff] %v7345_v58  ;;  %9586 = vst [vmem:[#allocation31_spill] sm:$0xff] %v7363_v16  ;;  %v1202_v21 = vsel %vm7258_vm6, %v7345_v58, 0.0  ;;  %v569_v53 = vadd.f32 %v5899_v42, %v7056_v63  ;;  %v563_v41 = vpop.f32.mrb[17].mxu0  ;;  %6099 = vmatprep.mubr.msk.f32.mxu1 %vm1730_vm1, %v7363_v16  ;;  %v7380_v45 = vsel %vm1665_vm3, %v1686_v8, %v1688_v35  ;;  %v1690_v37 = vrot.slane %v1501_v7, 1 }
 0x10d   : > { %9587 = vst [vmem:[#allocation32_spill] sm:$0xff] %v7366_v22  ;;  %9588 = vst [vmem:[#allocation33_spill] sm:$0xff] %v7369_v59  ;;  %v564_v48 = vadd.f32 %v563_v41, %v7056_v63  ;;  %6100 = vmatmul.mubr.msk.f32.vlgmr.msra.gmra.mrb[0].mxu1 %vm1730_vm1, %v7366_v22  ;;  %v1409_v23 = vrot.slane %v1202_v21, 7  ;;  %v7389_v44 = vrot.slane %v7345_v58, 7  ;;  %5941 = vmatmul.mubr.msk.f32.gmra.mrb[42].mxu0 %vm1730_vm1, %v7380_v45  ;;  %v9592_v41 = vand.u32 15, %v7230_v26 }
 0x10e   : > { %9589 = vst [vmem:[#allocation34_spill] sm:$0xff] %v7380_v45  ;;  %v7391_v42 = vmax.f32 %v569_v53, 0.0  ;;  %v1503_v8 = vsel %vm1379_vm2, %v7317_v1, %v1403_v57  ;;  %6490 = vmatpush3.bf16.msra.mxu1 %v7037_v51  ;;  %v1407_v21 = vrot.slane %v7374_v6, 7  ;;  %v7408_v53 = vsel %vm1665_vm3, %v1688_v35, %v1690_v37 }
 0x10f   : > { %9590 = vst [vmem:[#allocation35_spill] sm:$0xff] %v7389_v44  ;;  %vm7399_vm9 = vcmp.lt.s32.totalorder %v9592_v41, 15  ;;  %v7405_v22 = vmax.f32 %v564_v48, 0.0  ;;  %9595 = vst [vmem:[#allocation37_spill] sm:$0xff] %v7408_v53  ;;  %v5902_v16 = vpop.f32.mrb[18].mxu0  ;;  %v1692_v45 = vrot.slane %v1503_v8, 1  ;;  %5943 = vmatprep.mubr.msk.f32.mxu0 %vm1730_vm1, %v7408_v53  ;;  %v1505_v58 = vsel %vm1379_vm2, %v1403_v57, %v7369_v59 }
 0x110   : > { %9591 = vst [vmem:[#allocation36_spill] sm:$0xff] %v7391_v42  ;;  %v579_v26 = vadd.f32 %v5902_v16, %v7056_v63  ;;  %v573_v41 = vpop.f32.mrb[19].mxu0  ;;  %v886_v51 = vand.u32 15, %v7295_v46  ;;  %v1204_v48 = vsel %vm7312_vm7, %v7391_v42, 0.0  ;;  %v7425_v53 = vadd.s32 208, %v7044_v56 }
 0x111   : > { %v7421_v35 = vsel %vm1665_vm3, %v1690_v37, %v1692_v45  ;;  %v1411_v16 = vrot.slane %v7405_v22, 7  ;;  %v574_v46 = vadd.f32 %v573_v41, %v7056_v63  ;;  %v1694_v57 = vrot.slane %v1505_v58, 1 }
 0x112   : > { %9596 = vst [vmem:[#allocation38_spill] sm:$0xff] %v7421_v35  ;;  %v7428_v11 = vmax.f32 %v579_v26, 0.0  ;;  %5944 = vmatmul.mubr.msk.f32.gmra.mrb[44].mxu0 %vm1730_vm1, %v7421_v35  ;;  %v7440_v55 = vsel %vm1379_vm2, %v1405_v24, %v1407_v21  ;;  %v7443_v8 = vsel %vm1379_vm2, %v1407_v21, %v1409_v23  ;;  %v1507_v1 = vsel %vm1379_vm2, %v7369_v59, %v1407_v21 }
 0x113   : > { %9601 = vst [vmem:[#allocation40_spill] sm:$0xff] %v7440_v55  ;;  %9602 = vst [vmem:[#allocation41_spill] sm:$0xff] %v7443_v8  ;;  %v5905_v26 = vpop.f32.mrb[20].mxu0  ;;  %v1509_v41 = vsel %vm1379_vm2, %v1407_v21, %v7389_v44  ;;  %v9603_v58 = vand.u32 15, %v7059_v0  ;;  %v1413_v40 = vrot.slane %v1204_v48, 7  ;;  %v7458_v35 = vmax.f32 %v574_v46, 0.0  ;;  %6102 = vmatprep.mubr.msk.f32.mxu1 %vm1730_vm1, %v7440_v55 }
 0x114   : > { %9597 = vst [vmem:[#allocation39_spill] sm:$0xff] %v7428_v11  ;;  %v1206_v24 = vsel %vm7341_vm8, %v7428_v11, 0.0  ;;  %v7461_v32 = vsel %vm1665_vm3, %v1692_v45, %v1694_v57  ;;  %v583_v21 = vpop.f32.mrb[21].mxu0  ;;  %6103 = vmatmul.mubr.msk.f32.gmra.mrb[2].mxu1 %vm1730_vm1, %v7443_v8  ;;  %v589_v0 = vadd.f32 %v5905_v26, %v7056_v63  ;;  %v1696_v48 = vrot.slane %v1507_v1, 1 }
 0x115   : > { %vm7451_vm11 = vcmp.lt.s32.totalorder %v9603_v58, 15  ;;  %9606 = vst [vmem:[#allocation42_spill] sm:$0xff] %v7461_v32  ;;  %5946 = vmatprep.mubr.msk.f32.mxu0 %vm1730_vm1, %v7461_v32  ;;  %v584_v3 = vadd.f32 %v583_v21, %v7056_v63  ;;  %v704_v46 = vadd.s32 232, %v7044_v56  ;;  %v7473_v45 = vrot.slane %v7391_v42, 7 }
 0x116   : > { %v1417_v58 = vrot.slane %v1206_v24, 7  ;;  %v1698_v59 = vrot.slane %v1509_v41, 1  ;;  %v7476_v55 = vsel %vm1379_vm2, %v1409_v23, %v1411_v16  ;;  %v1415_v32 = vrot.slane %v7458_v35, 7 }
 0x117   : > { %9607 = vst [vmem:[#allocation43_spill] sm:$0xff] %v7473_v45  ;;  %9608 = vst [vmem:[#allocation44_spill] sm:$0xff] %v7476_v55  ;;  %v7479_v38 = vmax.f32 %v589_v0, 0.0  ;;  %v7482_v8 = vsel %vm1665_vm3, %v1694_v57, %v1696_v48  ;;  %v7484_v1 = vmax.f32 %v584_v3, 0.0  ;;  %6105 = vmatprep.mubr.msk.f32.mxu1 %vm1730_vm1, %v7476_v55  ;;  %v5908_v26 = vpop.f32.mrb[22].mxu0  ;;  %vm7488_vm12 = vcmp.lt.s32.totalorder %v886_v51, 15 }
 0x118   : > { %9610 = vst [vmem:[#allocation46_spill] sm:$0xff] %v7482_v8  ;;  %5947 = vmatmul.mubr.msk.f32.gmra.mrb[46].mxu0 %vm1730_vm1, %v7482_v8  ;;  %v7495_v23 = vsel %vm1665_vm3, %v1696_v48, %v1698_v59  ;;  %v7498_v41 = vsel %vm1379_vm2, %v1411_v16, %v1413_v40  ;;  %v599_v57 = vadd.f32 %v5908_v26, %v7056_v63  ;;  %v593_v0 = vpop.f32.mrb[23].mxu0  ;;  %v914_v3 = vand.u32 15, %v704_v46 }
 0x119   : > { %9609 = vst [vmem:[#allocation45_spill] sm:$0xff] %v7479_v38  ;;  %9613 = vst [vmem:[#allocation47_spill] sm:$0xff] %v7495_v23  ;;  %v1511_v24 = vsel %vm1379_vm2, %v7389_v44, %v1411_v16  ;;  %v1208_v51 = vsel %vm7399_vm9, %v7479_v38, 0.0  ;;  %5949 = vmatprep.mubr.msk.f32.mxu0 %vm1730_vm1, %v7495_v23  ;;  %6106 = vmatmul.mubr.msk.f32.gmra.mrb[4].mxu1 %vm1730_vm1, %v7498_v41  ;;  %v7512_v8 = vadd.s32 224, %v7044_v56  ;;  %v7515_v26 = vrot.slane %v7428_v11, 7 }
 0x11a   : > { %9614 = vst [vmem:[#allocation48_spill] sm:$0xff] %v7498_v41  ;;  %v7517_v55 = vmax.f32 %v599_v57, 0.0  ;;  %v1700_v42 = vrot.slane %v1511_v24, 1  ;;  %v7520_v7 = vadd.s32 248, %v7044_v56  ;;  %v594_v23 = vadd.f32 %v593_v0, %v7056_v63 }
 0x11b   : > { %9615 = vst [vmem:[#allocation49_spill] sm:$0xff] %v7515_v26  ;;  %v1513_v41 = vsel %vm1379_vm2, %v1411_v16, %v7473_v45  ;;  %v7526_v48 = vsel %vm1379_vm2, %v1413_v40, %v1415_v32  ;;  %v7529_v46 = vsel %vm1379_vm2, %v1415_v32, %v1417_v58  ;;  %v5911_v44 = vpop.f32.mrb[24].mxu0  ;;  %v1421_v11 = vrot.slane %v1208_v51, 7 }
 0x11c   : > { %9616 = vst [vmem:[#allocation50_spill] sm:$0xff] %v7517_v55  ;;  %9617 = vst [vmem:[#allocation51_spill] sm:$0xff] %v7526_v48  ;;  %v1419_v57 = vrot.slane %v7484_v1, 7  ;;  %v7533_v24 = vsel %vm1665_vm3, %v1698_v59, %v1700_v42  ;;  %v1702_v56 = vrot.slane %v1513_v41, 1  ;;  %6108 = vmatprep.mubr.msk.f32.mxu1 %vm1730_vm1, %v7526_v48  ;;  %v603_v0 = vpop.f32.mrb[25].mxu0  ;;  %v9620_v16 = vand.u32 15, %v7386_v20 }
 0x11d   : > { %9618 = vst [vmem:[#allocation52_spill] sm:$0xff] %v7529_v46  ;;  %9619 = vst [vmem:[#allocation53_spill] sm:$0xff] %v7533_v24  ;;  %v1210_v51 = vsel %vm7435_vm10, %v7517_v55, 0.0  ;;  %5950 = vmatmul.mubr.msk.f32.gmra.mrb[48].mxu0 %vm1730_vm1, %v7533_v24  ;;  %v7548_v59 = vmax.f32 %v594_v23, 0.0  ;;  %6109 = vmatmul.mubr.msk.f32.gmra.mrb[6].mxu1 %vm1730_vm1, %v7529_v46  ;;  %v609_v41 = vadd.f32 %v5911_v44, %v7056_v63  ;;  %vm7561_vm14 = vcmp.lt.s32.totalorder %v914_v3, 15 }
 0x11e   : > { %vm7539_vm13 = vcmp.lt.s32.totalorder %v9620_v16, 15  ;;  %v1515_v20 = vsel %vm1379_vm2, %v7473_v45, %v1415_v32  ;;  %v7556_v16 = vsel %vm1665_vm3, %v1700_v42, %v1702_v56  ;;  %v604_v37 = vadd.f32 %v603_v0, %v7056_v63 }
 0x11f   : > { %9623 = vst [vmem:[#allocation54_spill] sm:$0xff] %v7556_v16  ;;  %v1704_v48 = vrot.slane %v1515_v20, 1  ;;  %v1517_v19 = vsel %vm1379_vm2, %v1415_v32, %v7515_v26  ;;  %v1188_v44 = vsel %vm7451_vm11, %v7087_v14, 0.0  ;;  %v7569_v24 = vrot.slane %v7479_v38, 7  ;;  %5952 = vmatprep.mubr.msk.f32.mxu0 %vm1730_vm1, %v7556_v16  ;;  %v5914_v20 = vpop.f32.mrb[26].mxu0 }
 0x120   : > { %v7573_v42 = vmax.f32 %v609_v41, 0.0  ;;  %v1706_v0 = vrot.slane %v1517_v19, 1  ;;  %v1423_v32 = vrot.slane %v7548_v59, 7  ;;  %v7579_v46 = vmax.f32 %v604_v37, 0.0  ;;  %v613_v45 = vpop.f32.mrb[27].mxu0 }
 0x121   : > { %v7577_v3 = vsel %vm1665_vm3, %v1702_v56, %v1704_v48  ;;  %v7582_v25 = vsel %vm1379_vm2, %v1417_v58, %v1419_v57  ;;  %v1425_v38 = vrot.slane %v1210_v51, 7  ;;  %v7592_v19 = vsel %vm1379_vm2, %v1419_v57, %v1421_v11 }
 0x122   : > { %9626 = vst [vmem:[#allocation55_spill] sm:$0xff] %v7577_v3  ;;  %9627 = vst [vmem:[#allocation56_spill] sm:$0xff] %v7579_v46  ;;  %5953 = vmatmul.mubr.msk.f32.gmra.mrb[50].mxu0 %vm1730_vm1, %v7577_v3  ;;  %v7587_v41 = vsel %vm1665_vm3, %v1704_v48, %v1706_v0  ;;  %6111 = vmatprep.mubr.msk.f32.mxu1 %vm1730_vm1, %v7582_v25  ;;  %v928_v56 = vand.u32 15, %v7520_v7  ;;  %v7595_v37 = vrot.slane %v1188_v44, 7  ;;  %v7598_v58 = vrot.slane %v7517_v55, 7 }
 0x123   : > { %9628 = vst [vmem:[#allocation57_spill] sm:$0xff] %v7582_v25  ;;  %9629 = vst [vmem:[#allocation58_spill] sm:$0xff] %v7587_v41  ;;  %v1212_v51 = vsel %vm7488_vm12, %v7573_v42, 0.0  ;;  %5955 = vmatprep.mubr.msk.f32.mxu0 %vm1730_vm1, %v7587_v41  ;;  %6112 = vmatmul.mubr.msk.f32.gmra.mrb[8].mxu1 %vm1730_vm1, %v7592_v19  ;;  %v619_v48 = vadd.f32 %v5914_v20, %v7056_v63  ;;  %v7609_v3 = vrot.slane %v7579_v46, 7  ;;  %v5917_v16 = vpop.f32.mrb[28].mxu0  ;;  %v9631_v25 = vand.u32 15, %v7068_v4 }
 0x124   : > { %9630 = vst [vmem:[#allocation59_spill] sm:$0xff] %v7592_v19  ;;  %v1519_v7 = vsel %vm1379_vm2, %v7515_v26, %v1419_v57  ;;  %v614_v44 = vadd.f32 %v613_v45, %v7056_v63  ;;  %v1521_v21 = vsel %vm1379_vm2, %v1419_v57, %v7569_v24  ;;  %v7625_v14 = vsel %vm1379_vm2, %v1421_v11, %v1423_v32  ;;  %v623_v26 = vpop.f32.mrb[29].mxu0 }
 0x125   : > { %vm7618_vm15 = vcmp.lt.s32.totalorder %v9631_v25, 15  ;;  %v7622_v19 = vmax.f32 %v619_v48, 0.0  ;;  %v1708_v20 = vrot.slane %v1519_v7, 1  ;;  %v1710_v55 = vrot.slane %v1521_v21, 1  ;;  %9635 = vst [vmem:[#allocation61_spill] sm:$0xff] %v7625_v14  ;;  %6114 = vmatprep.mubr.msk.f32.mxu1 %vm1730_vm1, %v7625_v14 }
 0x126   : > { %v9636_v45 = vand.u32 15, %v7071_v5  ;;  %v7633_v57 = vmax.f32 %v614_v44, 0.0  ;;  %v7638_v4 = vsel %vm1379_vm2, %v1423_v32, %v1425_v38  ;;  %v629_v25 = vadd.f32 %v5917_v16, %v7056_v63 }
 0x127   : > { %9634 = vst [vmem:[#allocation60_spill] sm:$0xff] %v7622_v19  ;;  %9639 = vst [vmem:[#allocation62_spill] sm:$0xff] %v7638_v4  ;;  %v1523_v11 = vsel %vm1379_vm2, %v7569_v24, %v1423_v32  ;;  %v9640_v48 = vand.u32 15, %v7082_v12  ;;  %v1429_v7 = vrot.slane %v1212_v51, 7  ;;  %v7650_v44 = vsel %vm1665_vm3, %v1706_v0, %v1708_v20  ;;  %6115 = vmatmul.mubr.msk.f32.gmra.mrb[10].mxu1 %vm1730_vm1, %v7638_v4  ;;  %v5920_v51 = vpop.f32.mrb[30].mxu0 }
 0x128   : > { %vm7629_vm4 = vcmp.lt.s32.totalorder %v9636_v45, 15  ;;  %9643 = vst [vmem:[#allocation63_spill] sm:$0xff] %v7650_v44  ;;  %v7653_v21 = vsel %vm1665_vm3, %v1708_v20, %v1710_v55  ;;  %v1214_v12 = vsel %vm7539_vm13, %v7622_v19, 0.0  ;;  %5956 = vmatmul.mubr.msk.f32.gmra.mrb[52].mxu0 %vm1730_vm1, %v7650_v44  ;;  %v7663_v45 = vmax.f32 %v629_v25, 0.0  ;;  %v633_v16 = vpop.f32.mrb[31].mxu0 }
 0x129   : > { %vm7645_vm5 = vcmp.gt.s32.totalorder %v9640_v48, 0  ;;  %9644 = vst [vmem:[#allocation64_spill] sm:$0xff] %v7653_v21  ;;  %vm7665_vm6 = vcmp.lt.s32.totalorder %v928_v56, 15  ;;  %v7672_v20 = vsel %vm1379_vm2, %v7111_v27, %v7595_v37  ;;  %v7675_v48 = vrot.slane %v7573_v42, 7  ;;  %5958 = vmatprep.mubr.msk.f32.mxu0 %vm1730_vm1, %v7653_v21 }
 0x12a   : > { %9645 = vst [vmem:[#allocation65_spill] sm:$0xff] %v7663_v45  ;;  %9648 = vst [vmem:[#allocation66_spill] sm:$0xff] %v7672_v20  ;;  %v1712_v40 = vrot.slane %v1523_v11, 1  ;;  %v624_v25 = vadd.f32 %v623_v26, %v7056_v63  ;;  %v1525_v56 = vsel %vm1379_vm2, %v1423_v32, %v7598_v58  ;;  %v9649_v44 = vand.u32 15, %v7078_v10 }
 0x12b   : > { %v9652_v27 = vand.u32 15, %v7090_v15  ;;  %v1431_v11 = vrot.slane %v7633_v57, 7  ;;  %v1216_v26 = vsel %vm7561_vm14, %v7663_v45, 0.0  ;;  %v1714_v32 = vrot.slane %v1525_v56, 1 }
 0x12c   : > { %vm7684_vm7 = vcmp.lt.s32.totalorder %v9649_v44, 15  ;;  %v7700_v10 = vsel %vm1379_vm2, %v1425_v38, %v7609_v3  ;;  %v1433_v44 = vrot.slane %v1214_v12, 7  ;;  %v7703_v21 = vsel %vm1665_vm3, %v1710_v55, %v1712_v40 }
 0x12d   : > { %vm7690_vm8 = vcmp.gt.s32.totalorder %v9652_v27, 0  ;;  %9655 = vst [vmem:[#allocation67_spill] sm:$0xff] %v7700_v10  ;;  %9656 = vst [vmem:[#allocation68_spill] sm:$0xff] %v7703_v21  ;;  %v7705_v15 = vmax.f32 %v624_v25, 0.0  ;;  %6117 = vmatprep.mubr.msk.f32.mxu1 %vm1730_vm1, %v7700_v10  ;;  %v7711_v27 = vsel %vm1379_vm2, %v7609_v3, %v1429_v7  ;;  %v9658_v23 = vand.u32 15, %v7096_v17  ;;  %5959 = vmatmul.mubr.msk.f32.gmra.mrb[54].mxu0 %vm1730_vm1, %v7703_v21 }
 0x12e   : > { %9657 = vst [vmem:[#allocation69_spill] sm:$0xff] %v7711_v27  ;;  %v7720_v38 = vrot.slane %v7622_v19, 7  ;;  %v7725_v55 = vsel %vm1665_vm3, %v1712_v40, %v1714_v32  ;;  %6118 = vmatmul.mubr.msk.f32.gmra.mrb[12].mxu1 %vm1730_vm1, %v7711_v27  ;;  %v639_v12 = vadd.f32 %v5920_v51, %v7056_v63  ;;  %v1527_v17 = vsel %vm1379_vm2, %v7598_v58, %v7609_v3 }
 0x12f   : > { %vm7715_vm9 = vcmp.gt.s32.totalorder %v9658_v23, 0  ;;  %9661 = vst [vmem:[#allocation70_spill] sm:$0xff] %v7725_v55  ;;  %v9662_v25 = vand.u32 15, %v7137_v43  ;;  %v1437_v10 = vrot.slane %v1216_v26, 7  ;;  %v7740_v21 = vrot.slane %v7663_v45, 7  ;;  %5961 = vmatprep.mubr.msk.f32.mxu0 %vm1730_vm1, %v7725_v55 }
 0x130   : > { %v1716_v40 = vrot.slane %v1527_v17, 1  ;;  %v634_v51 = vadd.f32 %v633_v16, %v7056_v63  ;;  %v9666_v27 = vand.u32 15, %v7152_v54  ;;  %v9669_v43 = vand.u32 15, %v7170_v9 }
 0x131   : > { %vm7735_vm10 = vcmp.gt.s32.totalorder %v9662_v25, 0  ;;  %9665 = vst [vmem:[#allocation71_spill] sm:$0xff] %v7740_v21  ;;  %v9672_v26 = vand.u32 15, %v7187_v36  ;;  %v1435_v63 = vrot.slane %v7705_v15, 7  ;;  %v7764_v16 = vmax.f32 %v639_v12, 0.0 }
 0x132   : > { %vm7747_vm11 = vcmp.gt.s32.totalorder %v9666_v27, 0  ;;  %vm7753_vm12 = vcmp.gt.s32.totalorder %v9669_v43, 0  ;;  %v1529_v54 = vsel %vm1379_vm2, %v7609_v3, %v7675_v48  ;;  %v7770_v9 = vsel %vm1379_vm2, %v1429_v7, %v1431_v11  ;;  %v9711_v43 = vld [vmem:[#allocation16_spill] sm:$0xff] }
 0x133   : > { %vm7759_vm13 = vcmp.gt.s32.totalorder %v9672_v26, 0  ;;  %9675 = vst [vmem:[#allocation72_spill] sm:$0xff] %v7770_v9  ;;  %v9676_v27 = vand.u32 15, %v7085_v13  ;;  %v9677_v17 = vmov 0  ;;  %v9679_v36 = vand.u32 15, %v7233_v60  ;;  %6120 = vmatprep.mubr.msk.f32.mxu1 %vm1730_vm1, %v7770_v9 }
 0x134   : > { %v7785_v12 = vsel %vm1665_vm3, %v1714_v32, %v1716_v40  ;;  %v7787_v26 = vmax.f32 %v634_v51, 0.0  ;;  %v1718_v3 = vrot.slane %v1529_v54, 1  ;;  %v7792_v13 = vsel %vm1379_vm2, %v1431_v11, %v1433_v44 }
 0x135   : > { %vm7774_vm14 = vcmp.lt.s32.totalorder %v9676_v27, 15  ;;  %vm7780_vm0 = vcmp.gt.s32.totalorder %v9679_v36, 0  ;;  %9682 = vst [vmem:[#allocation73_spill] sm:$0xff] %v7785_v12  ;;  %9683 = vst [vmem:[#allocation74_spill] sm:$0xff] %v7792_v13  ;;  %v1190_v60 = vsel %vm7618_vm15, %v7116_v31, 0.0  ;;  %v9684_v7 = vand.u32 15, %v7263_v30  ;;  %5962 = vmatmul.mubr.msk.f32.gmra.mrb[56].mxu0 %vm1730_vm1, %v7785_v12  ;;  %6121 = vmatmul.mubr.msk.f32.gmra.mrb[14].mxu1 %vm1730_vm1, %v7792_v13 }
 0x136   : > { %v9678_v17 = vsel %vm7774_vm14, 4294967295, %v9677_v17  ;;  %v1218_v32 = vsel %vm7665_vm6, %v7764_v16, 0.0  ;;  %v1531_v41 = vsel %vm1379_vm2, %v7675_v48, %v1431_v11  ;;  %v1533_v30 = vsel %vm1379_vm2, %v1431_v11, %v7720_v38 }
 0x137   : > { %vm7799_vm14 = vcmp.gt.s32.totalorder %v9684_v7, 0  ;;  %v1192_v51 = vsel %vm7629_vm4, %v7162_v62, 0.0  ;;  %v9687_v54 = vand.u32 15, %v7354_v61  ;;  %v7823_v36 = vrot.slane %v1218_v32, 7 }
 0x138   : > { %v7826_v7 = vrot.slane %v7787_v26, 7  ;;  %v7829_v12 = vsel %vm1665_vm3, %v1716_v40, %v1718_v3  ;;  %v1321_v11 = vsel %vm7645_vm5, %v7200_v50, 0.0  ;;  %v1720_v61 = vrot.slane %v1531_v41, 1 }
 0x139   : > { %vm7819_vm15 = vcmp.gt.s32.totalorder %v9687_v54, 0  ;;  %9690 = vst [vmem:[#allocation75_spill] sm:$0xff] %v7823_v36  ;;  %9691 = vst [vmem:[#allocation76_spill] sm:$0xff] %v7829_v12  ;;  %5964 = vmatprep.mubr.msk.f32.mxu0 %vm1730_vm1, %v7829_v12  ;;  %v1722_v46 = vrot.slane %v1533_v30, 1  ;;  %v7837_v54 = vsel %vm1379_vm2, %v1433_v44, %v1435_v63  ;;  %v7842_v32 = vsel %vm1379_vm2, %v1435_v63, %v1437_v10 }
 0x13a   : > { %9692 = vst [vmem:[#allocation77_spill] sm:$0xff] %v7837_v54  ;;  %6123 = vmatprep.mubr.msk.f32.mxu1 %vm1730_vm1, %v7837_v54  ;;  %9693 = vst [vmem:[#allocation78_spill] sm:$0xff] %v7842_v32  ;;  %v1535_v40 = vsel %vm1379_vm2, %v7720_v38, %v1435_v63  ;;  %v1537_v5 = vsel %vm1379_vm2, %v1435_v63, %v7740_v21  ;;  %v7850_v12 = vsel %vm1379_vm2, %v1437_v10, %v7826_v7  ;;  %vm2309_vm6 = vcmask 1045504  }
 0x13b   : > { %9694 = vst [vmem:[#allocation79_spill] sm:$0xff] %v7850_v12  ;;  %v7853_v41 = vsel %vm1665_vm3, %v1718_v3, %v1720_v61  ;;  %v7856_v44 = vsel %vm1665_vm3, %v1720_v61, %v1722_v46  ;;  %6124 = vmatmul.mubr.msk.f32.gmra.mrb[16].mxu1 %vm1730_vm1, %v7842_v32  ;;  %v1724_v30 = vrot.slane %v1535_v40, 1  ;;  %v1726_v55 = vrot.slane %v1537_v5, 1  ;;  %v9729_v40 = vld [vmem:[#allocation9_spill] sm:$0xff] }
 0x13c   : > { %9695 = vst [vmem:[#allocation80_spill] sm:$0xff] %v7853_v41  ;;  %9696 = vst [vmem:[#allocation81_spill] sm:$0xff] %v7856_v44  ;;  %v1194_v54 = vsel %vm7684_vm7, %v7193_v39, 0.0  ;;  %v1323_v10 = vsel %vm7690_vm8, %v7245_v33, 0.0  ;;  %v9697_v63 = vand.u32 15, %v7425_v53  ;;  %5965 = vmatmul.mubr.msk.f32.gmra.mrb[58].mxu0 %vm1730_vm1, %v7853_v41  ;;  %6126 = vmatprep.mubr.msk.f32.mxu1 %vm1730_vm1, %v7850_v12  ;;  %v7879_v4 = vsel %vm1379_vm2, %v7826_v7, %v7823_v36 }
 0x13d   : > { %9700 = vst [vmem:[#allocation82_spill] sm:$0xff] %v7879_v4  ;;  %v7884_v14 = vsel %vm1379_vm2, %v7740_v21, %v7826_v7  ;;  %v7886_v53 = vrot.slane %v1190_v60, 7  ;;  %v9701_v61 = vand.u32 15, %v7512_v8  ;;  %5967 = vmatprep.mubr.msk.f32.mxu0 %vm1730_vm1, %v7856_v44  ;;  %v7897_v5 = vsel %vm1665_vm3, %v1722_v46, %v1724_v30  ;;  %v1655_v8 = vld [vmem:[%s9361_s2 + $0x50] sm:$0xff]  ;;  %v1656_v60 = vld [vmem:[%s9361_s2 + $0x58] sm:$0xff] }
 0x13e   : > { %vm7868_vm4 = vcmp.gt.s32.totalorder %v9697_v63, 0  ;;  %9704 = vst [vmem:[#allocation83_spill] sm:$0xff] %v7897_v5  ;;  %v7903_v41 = vsel %vm1379_vm2, %v7595_v37, %v7148_v52  ;;  %v1589_v46 = vrot.slane %v1321_v11, 7  ;;  %v1325_v63 = vsel %vm7715_vm9, %v7276_v28, 0.0 }
 0x13f   : > { %vm7890_vm5 = vcmp.gt.s32.totalorder %v9701_v61, 0  ;;  %9705 = vst [vmem:[#allocation84_spill] sm:$0xff] %v7903_v41  ;;  %v7911_v61 = vrot.slane %v1192_v51, 7  ;;  %v7917_v44 = vsel %vm1665_vm3, %v1724_v30, %v1726_v55  ;;  %v7919_v37 = vrot.slane %v1194_v54, 7  ;;  %6127 = vmatmul.mubr.msk.f32.gmra.mrb[18].mxu1 %vm1730_vm1, %v7879_v4  ;;  %v9713_v4 = vld [vmem:[#allocation56_spill] sm:$0xff] }
 0x140   : > { %9706 = vst [vmem:[#allocation85_spill] sm:$0xff] %v7917_v44  ;;  %v1593_v36 = vrot.slane %v1323_v10, 7  ;;  %v1327_v12 = vsel %vm7735_vm10, %v7319_v34, 0.0  ;;  %v7929_v51 = vsel %vm1379_vm2, %v7290_v29, %v7333_v2  ;;  %v1329_v56 = vsel %vm7747_vm11, %v7374_v6, 0.0  ;;  %5968 = vmatmul.mubr.msk.f32.gmra.mrb[60].mxu0 %vm1730_vm1, %v7897_v5  ;;  %6133 = vmatprep.mubr.msk.f32.mxu1 %vm1730_vm1, %v7098_v18 }
 0x141   : > { %v1331_v11 = vsel %vm7753_vm12, %v7405_v22, 0.0  ;;  %v1333_v23 = vsel %vm7759_vm13, %v7458_v35, 0.0  ;;  %v6491_v2 = vpack.c.bf16 %v1656_v60, %v1655_v8  ;;  %vm9707_vm7 = vnez %v9678_v17  ;;  %5970 = vmatprep.mubr.msk.f32.mxu0 %vm1730_vm1, %v7917_v44 }
 0x142   : > { %v1597_v54 = vrot.slane %v1325_v63, 7  ;;  %v1335_v25 = vsel %vm7780_vm0, %v7484_v1, 0.0  ;;  %v9708_v45 = vrot.slane %v7884_v14, 1  ;;  %v1601_v10 = vrot.slane %v1327_v12, 7  ;;  %v9714_v12 = vld [vmem:[#allocation7_spill] sm:$0xff] }
 0x143   : > { %v1337_v8 = vsel %vm7799_vm14, %v7548_v59, 0.0  ;;  %6492 = vmatprep.subr.bf16.mxu1 %v6491_v2  ;;  %v7962_v63 = vsel %vm1379_vm2, %v7198_v47, %v1589_v46  ;;  %v7966_v60 = vsel %vm1379_vm2, %v1589_v46, %v9711_v43  ;;  %v1605_v19 = vrot.slane %v1329_v56, 7  ;;  %6134 = vmatmul.mubr.msk.f32.vlgmr.msra.gmra.mrb[20].mxu1 %vm1730_vm1, %v9714_v12  ;;  %v9718_v12 = vld [vmem:[#allocation22_spill] sm:$0xff] }
 0x144   : > { %v7955_v30 = vsel %vm1665_vm3, %v1726_v55, %v9708_v45  ;;  %9710 = vst [vmem:[#allocation87_spill] sm:$0xff] %v7962_v63  ;;  %9712 = vst [vmem:[#allocation16_spill] sm:$0xff] %v7966_v60  ;;  %v1609_v44 = vrot.slane %v1331_v11, 7  ;;  %v1613_v5 = vrot.slane %v1333_v23, 7  ;;  %v1339_v55 = vsel %vm7819_vm15, %v9713_v4, 0.0  ;;  %v9715_v45 = vld [vmem:[#allocation10_spill] sm:$0xff]  ;;  %6494 = vmatpush3.bf16.msra.mxu1 %v6491_v2 }
 0x145   : > { %9709 = vst [vmem:[#allocation86_spill] sm:$0xff] %v7955_v30  ;;  %v1617_v27 = vrot.slane %v1335_v25, 7  ;;  %5971 = vmatmul.mubr.msk.f32.gmra.mrb[62].mxu0 %vm1730_vm1, %v7955_v30  ;;  %6136 = vmatprep.mubr.msk.f32.mxu1 %vm1730_vm1, %v9715_v45  ;;  %v9485_v56 = vrot.slane %v7966_v60, 2  ;;  %v7981_v11 = vsel %vm1379_vm2, %v9711_v43, %v1593_v36  ;;  %v1621_v0 = vrot.slane %v1337_v8, 7  ;;  %v9726_v25 = vld [vmem:[#allocation13_spill] sm:$0xff] }
 0x146   : > { %9716 = vst [vmem:[#allocation56_spill] sm:$0xff] %v7981_v11  ;;  %v9717_v23 = vmov 0.0   ;;  %v7987_v30 = vsel %vm1379_vm2, %v1593_v36, %v9718_v12  ;;  %v7991_v32 = vsel %vm1379_vm2, %v9718_v12, %v1597_v54  ;;  %v1625_v46 = vrot.slane %v1339_v55, 7  ;;  %v9723_v12 = vld [vmem:[#allocation27_spill] sm:$0xff] }
 0x147   : > { %5977 = vmatprep.mubr.f32.mxu0 %v9717_v23  ;;  %9719 = vst [vmem:[#allocation7_spill] sm:$0xff] %v7987_v30  ;;  %9720 = vst [vmem:[#allocation10_spill] sm:$0xff] %v7991_v32  ;;  %v9721_v43 = vrot.slane %v7962_v63, 2  ;;  %v9491_v2 = vrot.slane %v7987_v30, 2  ;;  %v1341_v36 = vsel %vm7868_vm4, %v7633_v57, 0.0  ;;  %6137 = vmatmul.mubr.msk.f32.gmra.mrb[22].mxu1 %vm1730_vm1, %v7116_v31  ;;  %v8009_v55 = vsel %vm1379_vm2, %v1597_v54, %v9723_v12  ;;  %v9730_v30 = vld [vmem:[#allocation35_spill] sm:$0xff] }
 0x148   : > { %9724 = vst [vmem:[#allocation27_spill] sm:$0xff] %v8009_v55  ;;  %v8013_v60 = vsel %vm1379_vm2, %v9723_v12, %v1601_v10  ;;  %v1343_v3 = vsel %vm7890_vm5, %v7705_v15, 0.0  ;;  %6139 = vmatprep.mubr.msk.f32.mxu1 %vm1730_vm1, %v9726_v25  ;;  %v9727_v31 = vrot.slane %v7981_v11, 2  ;;  %v9494_v12 = vrot.slane %v8009_v55, 2 }
 0x149   : > { %v7998_v8 = vsel %vm2309_vm6, %v9721_v43, %v9485_v56  ;;  %v9725_v43 = vld [vmem:[#allocation33_spill] sm:$0xff]  ;;  %5978 = vmatmul.mubr.f32.vlgmr.msra.gmra.mrb[32].mxu0 %v9717_v23  ;;  %v8044_v11 = vsel %vm1379_vm2, %v1605_v19, %v9730_v30  ;;  %vm9760_vm0 = vcmask 261120  }
 0x14a   : > { %9722 = vst [vmem:[#allocation22_spill] sm:$0xff] %v7998_v8  ;;  %v8017_v56 = vsel %vm1379_vm2, %v1601_v10, %v9725_v43  ;;  %v8030_v54 = vsel %vm2309_vm6, %v9727_v31, %v9491_v2  ;;  %v9728_v8 = vld [vmem:[#allocation12_spill] sm:$0xff]  ;;  %5980 = vmatprep.mubr.msk.f32.mxu0 %vm1730_vm1, %v9729_v40  ;;  %v8040_v47 = vsel %vm1379_vm2, %v9725_v43, %v1605_v19  ;;  %v1629_v2 = vrot.slane %v1341_v36, 7  ;;  %v9731_v10 = vld [vmem:[#allocation3_spill] sm:$0xff]  ;;  %vm9767_vm8 = vmmov %vm9760_vm0 }
 0x14b   : > { %6482 = vmatpush3.bf16.msra.mxu0 %v9728_v8  ;;  %v8048_v31 = vsel %vm1379_vm2, %v9730_v30, %v1609_v44  ;;  %v9732_v8 = vrot.slane %v7991_v32, 2  ;;  %v9495_v40 = vrot.slane %v8044_v11, 2  ;;  %6140 = vmatmul.mubr.msk.f32.gmra.mrb[24].mxu1 %vm1730_vm1, %v7162_v62  ;;  %v9733_v19 = vrot.slane %v8017_v56, 2  ;;  %v9735_v32 = vld [vmem:[#allocation43_spill] sm:$0xff]  ;;  %vm9769_vm9 = vmmov %vm9760_vm0 }
 0x14c   : > { %6484 = vmatprep.subr.bf16.mxu0 %v9731_v10  ;;  %v9734_v30 = vrot.slane %v8013_v60, 2  ;;  %v1633_v43 = vrot.slane %v1343_v3, 7  ;;  %6142 = vmatprep.mubr.msk.f32.mxu1 %vm1730_vm1, %v7200_v50  ;;  %v9736_v62 = vrot.slane %v8040_v47, 2  ;;  %v9737_v3 = vld [vmem:[#allocation49_spill] sm:$0xff]  ;;  %vm9773_vm10 = vmmov %vm9760_vm0 }
 0x14d   : > { %v8056_v63 = vsel %vm2309_vm6, %v9732_v8, %v9494_v12  ;;  %v8072_v8 = vsel %vm1379_vm2, %v1609_v44, %v9735_v32  ;;  %v8076_v12 = vsel %vm1379_vm2, %v9735_v32, %v1613_v5  ;;  %5981 = vmatmul.mubr.msk.f32.gmra.mrb[34].mxu0 %vm1730_vm1, %v7672_v20  ;;  %v8092_v32 = vrot.slane %v7764_v16, 7  ;;  %vm9777_vm11 = vmmov %vm9760_vm0 }
 0x14e   : > { %v8067_v36 = vsel %vm2309_vm6, %v9734_v30, %v9733_v19  ;;  %v8087_v19 = vsel %vm2309_vm6, %v9736_v62, %v9495_v40  ;;  %v9499_v44 = vrot.slane %v8072_v8, 2  ;;  %5983 = vmatprep.mubr.msk.f32.mxu0 %vm1730_vm1, %v7903_v41  ;;  %v8098_v50 = vsel %vm1379_vm2, %v1613_v5, %v9737_v3  ;;  %vm9782_vm12 = vmmov %vm9760_vm0 }
 0x14f   : > { %v8102_v55 = vsel %vm1379_vm2, %v9737_v3, %v1617_v27  ;;  %v8106_v62 = vsel %vm1379_vm2, %v1617_v27, %v7569_v24  ;;  %v8111_v40 = vsel %vm1379_vm2, %v7148_v52, %v7886_v53  ;;  %v9740_v30 = vrot.slane %v8048_v31, 2  ;;  %6143 = vmatmul.mubr.msk.f32.gmra.mrb[26].mxu1 %vm1730_vm1, %v7193_v39  ;;  %vm9786_vm14 = vmmov %vm9760_vm0 }
 0x150   : > { %9738 = vst [vmem:[#allocation33_spill] sm:$0xff] %v8106_v62  ;;  %9739 = vst [vmem:[#allocation13_spill] sm:$0xff] %v8111_v40  ;;  %v9502_v20 = vrot.slane %v8098_v50, 2  ;;  %v9505_v27 = vrot.slane %v8106_v62, 2  ;;  %v8127_v52 = vsel %vm1379_vm2, %v7569_v24, %v1621_v0  ;;  %v8131_v41 = vsel %vm1379_vm2, %v1621_v0, %v7598_v58  ;;  %6145 = vmatprep.mubr.msk.f32.mxu1 %vm1730_vm1, %v7245_v33  ;;  %v9755_v62 = vld [vmem:[#allocation5_spill] sm:$0xff] }
 0x151   : > { %v8118_v5 = vsel %vm2309_vm6, %v9740_v30, %v9499_v44  ;;  %9741 = vst [vmem:[#allocation12_spill] sm:$0xff] %v8131_v41  ;;  %v8135_v30 = vsel %vm1379_vm2, %v7598_v58, %v1625_v46  ;;  %5984 = vmatmul.mubr.msk.f32.gmra.mrb[36].mxu0 %vm1730_vm1, %v8111_v40  ;;  %v9743_v44 = vld [vmem:[#allocation14_spill] sm:$0xff]  ;;  %v9745_v24 = vrot.slane %v8076_v12, 2  ;;  %v9507_v58 = vrot.slane %v8127_v52, 2  ;;  %vm9789_vm4 = vmmov %vm9760_vm0 }
 0x152   : > { %9742 = vst [vmem:[#allocation35_spill] sm:$0xff] %v8135_v30  ;;  %v8142_v39 = vsel %vm1379_vm2, %v7886_v53, %v9743_v44  ;;  %v9506_v3 = vrot.slane %v8131_v41, 2  ;;  %v9746_v53 = vrot.slane %v8102_v55, 2  ;;  %v8184_v40 = vsel %vm1379_vm2, %v8092_v32, 0.0 }
 0x153   : > { %9744 = vst [vmem:[#allocation3_spill] sm:$0xff] %v8142_v39  ;;  %v8151_v0 = vsel %vm2309_vm6, %v9745_v24, %v9502_v20  ;;  %5986 = vmatprep.mubr.msk.f32.mxu0 %vm1730_vm1, %v8142_v39  ;;  %v8167_v24 = vsel %vm1379_vm2, %v1625_v46, %v7675_v48  ;;  %v8171_v20 = vsel %vm1379_vm2, %v7675_v48, %v1629_v2  ;;  %v1657_v48 = vld [vmem:[%s9361_s2 + $0x60] sm:$0xff]  ;;  %v1658_v46 = vld [vmem:[%s9361_s2 + $0x68] sm:$0xff] }
 0x154   : > { %v8162_v33 = vsel %vm2309_vm6, %v9746_v53, %v9505_v27  ;;  %9747 = vst [vmem:[#allocation43_spill] sm:$0xff] %v8167_v24  ;;  %v8178_v39 = vsel %vm2309_vm6, %v9507_v58, %v9506_v3  ;;  %v8195_v3 = vsel %vm1379_vm2, %v9743_v44, %v7911_v61  ;;  %6146 = vmatmul.mubr.msk.f32.gmra.mrb[28].mxu1 %vm1730_vm1, %v7235_v49  ;;  %v9750_v44 = vld [vmem:[#allocation17_spill] sm:$0xff] }
 0x155   : > { %9748 = vst [vmem:[#allocation49_spill] sm:$0xff] %v8178_v39  ;;  %9749 = vst [vmem:[#allocation14_spill] sm:$0xff] %v8195_v3  ;;  %v8201_v58 = vsel %vm1379_vm2, %v1629_v2, %v7720_v38  ;;  %v8205_v27 = vsel %vm1379_vm2, %v7720_v38, %v1633_v43  ;;  %v8209_v53 = vsel %vm1379_vm2, %v1633_v43, %v7740_v21  ;;  %5987 = vmatmul.mubr.msk.f32.gmra.mrb[38].mxu0 %vm1730_vm1, %v8195_v3 }
 0x156   : > { %v8216_v41 = vsel %vm1379_vm2, %v7911_v61, %v9750_v44  ;;  %6148 = vmatprep.mubr.msk.f32.mxu1 %vm1730_vm1, %v7276_v28  ;;  %v9752_v2 = vrot.slane %v8167_v24, 2  ;;  %v9753_v38 = vrot.slane %v8135_v30, 2  ;;  %v9519_v43 = vrot.slane %v8201_v58, 2  ;;  %v9754_v24 = vld [vmem:[#allocation6_spill] sm:$0xff] }
 0x157   : > { %9751 = vst [vmem:[#allocation17_spill] sm:$0xff] %v8216_v41  ;;  %5989 = vmatprep.mubr.msk.f32.mxu0 %vm1730_vm1, %v8216_v41  ;;  %v9518_v61 = vrot.slane %v8209_v53, 2  ;;  %v9521_v21 = vrot.slane %v8184_v40, 2  ;;  %v8233_v28 = vpack.c.bf16 %v1658_v46, %v1657_v48  ;;  %v4378_v30 = vadd.f32 %v9755_v62, %v9754_v24  ;;  %v9758_v46 = vld [vmem:[#allocation21_spill] sm:$0xff] }
 0x158   : > { %v8225_v39 = vsel %vm2309_vm6, %v9753_v38, %v9752_v2  ;;  %v9756_v2 = vrot.slane %v8171_v20, 2  ;;  %v9757_v3 = vsel %vm9707_vm7, %v7235_v49, 0.0  ;;  %v8251_v48 = vsel %vm1379_vm2, %v9750_v44, %v7919_v37  ;;  %6149 = vmatmul.mubr.msk.f32.gmra.mrb[30].mxu1 %vm1730_vm1, %v9758_v46  ;;  %v6797_v49 = vld [vmem:[%s6923_s18 + $0x30] sm:$0xff]  ;;  %vm9795_vm7 = vmmov %vm9760_vm0 }
 0x159   : > { %v1397_v41 = vrot.slane %v9757_v3, 7  ;;  %v8256_v62 = vrot.slane %v9717_v23, 2  ;;  %v9759_v24 = vrot.slane %v8205_v27, 2  ;;  %6496 = vmatprep.subr.bf16.mxu1 %v8233_v28  ;;  %v4379_v3 = vsel %vm9760_vm0, %v6797_v49, 0.0  ;;  %5990 = vmatmul.mubr.msk.f32.gmra.mrb[40].mxu0 %vm1730_vm1, %v8251_v48  ;;  %v9761_v44 = vld [vmem:[#allocation20_spill] sm:$0xff]  ;;  %v9783_v23 = vld [vmem:[#allocation51_spill] sm:$0xff] }
 0x15a   : > { %v8242_v38 = vsel %vm2309_vm6, %v9756_v2, %v9519_v43  ;;  %v8273_v2 = vsel %vm1379_vm2, %v7919_v37, %v9761_v44  ;;  %6151 = vmatprep.mubr.msk.f32.mxu1 %vm1730_vm1, %v7319_v34  ;;  %v1541_v46 = vsel %vm1379_vm2, %v7826_v7, %v8092_v32  ;;  %v9763_v43 = vld [vmem:[#allocation25_spill] sm:$0xff] }
 0x15b   : > { %v8263_v17 = vsel %vm2309_vm6, %v9759_v24, %v9518_v61  ;;  %5992 = vmatprep.mubr.msk.f32.mxu0 %vm1730_vm1, %v8273_v2  ;;  %v9520_v24 = vrot.slane %v8184_v40, 1  ;;  %v8287_v49 = vsel %vm2309_vm6, %v9521_v21, %v8256_v62  ;;  %v3804_v37 = vrot.slane %v1541_v46, 1  ;;  %v9776_v21 = vld [vmem:[#allocation41_spill] sm:$0xff] }
 0x15c   : > { %9762 = vst [vmem:[#allocation6_spill] sm:$0xff] %v8287_v49  ;;  %v4380_v61 = vadd.f32 %v4379_v3, %v4378_v30  ;;  %v8291_v34 = vsel %vm1379_vm2, %v9761_v44, %v1397_v41  ;;  %6152 = vmatmul.mubr.msk.f32.gmra.mrb[0].mxu1 %vm1730_vm1, %v9763_v43  ;;  %v8299_v7 = vsel %vm1379_vm2, %v1397_v41, %v7290_v29  ;;  %v9764_v46 = vrot.slane %v7884_v14, 1  ;;  %v6798_v3 = vld [vmem:[%s6923_s18 + $0x38] sm:$0xff]  ;;  %v6799_v41 = vld [vmem:[%s6923_s18 + $0x40] sm:$0xff]  ;;  %v9779_v49 = vld [vmem:[#allocation44_spill] sm:$0xff] }
 0x15d   : > { %5993 = vmatmul.mubr.msk.f32.gmra.mrb[42].mxu0 %vm1730_vm1, %v8291_v34  ;;  %6154 = vmatprep.mubr.msk.f32.mxu1 %vm1730_vm1, %v7374_v6  ;;  %v8311_v43 = vsel %vm1665_vm3, %v3804_v37, %v9520_v24  ;;  %v4381_v44 = vsel %vm9767_vm8, %v6798_v3, 0.0  ;;  %v9768_v29 = vld [vmem:[#allocation29_spill] sm:$0xff]  ;;  %v4383_v14 = vsel %vm9769_vm9, %v6799_v41, 0.0  ;;  %v9772_v24 = vld [vmem:[#allocation32_spill] sm:$0xff]  ;;  %vm9803_vm8 = vmmov %vm9760_vm0 }
 0x15e   : > { %v8306_v30 = vsel %vm1665_vm3, %v9764_v46, %v3804_v37  ;;  %9766 = vst [vmem:[#allocation21_spill] sm:$0xff] %v8311_v43  ;;  %5995 = vmatprep.mubr.msk.f32.mxu0 %vm1730_vm1, %v8299_v7  ;;  %v4382_v6 = vadd.f32 %v4381_v44, %v4380_v61  ;;  %v9770_v37 = vld [vmem:[#allocation31_spill] sm:$0xff]  ;;  %v9771_v46 = vld [vmem:[#allocation36_spill] sm:$0xff]  ;;  %v9780_v43 = vld [vmem:[#allocation45_spill] sm:$0xff] }
 0x15f   : > { %9765 = vst [vmem:[#allocation5_spill] sm:$0xff] %v8306_v30  ;;  %v6800_v61 = vld [vmem:[%s6923_s18 + $0x48] sm:$0xff]  ;;  %v9774_v44 = vld [vmem:[#allocation40_spill] sm:$0xff]  ;;  %vm9807_vm9 = vmmov %vm9760_vm0 }
 0x160   : > { %6155 = vmatmul.mubr.msk.f32.gmra.mrb[2].mxu1 %vm1730_vm1, %v9768_v29  ;;  %v4384_v3 = vadd.f32 %v4383_v14, %v4382_v6  ;;  %v9775_v29 = vld [vmem:[#allocation39_spill] sm:$0xff]  ;;  %v6801_v6 = vld [vmem:[%s6923_s18 + $0x50] sm:$0xff] }
 0x161   : > { %5996 = vmatmul.mubr.msk.f32.gmra.mrb[44].mxu0 %vm1730_vm1, %v7929_v51  ;;  %6157 = vmatprep.mubr.msk.f32.mxu1 %vm1730_vm1, %v7405_v22  ;;  %v4385_v22 = vsel %vm9773_vm10, %v6800_v61, 0.0  ;;  %v9778_v14 = vld [vmem:[#allocation4_spill] sm:$0xff]  ;;  %vm9809_vm10 = vmmov %vm9760_vm0 }
 0x162   : > { %5998 = vmatprep.mubr.msk.f32.mxu0 %vm1730_vm1, %v9770_v37  ;;  %v4386_v41 = vadd.f32 %v4385_v22, %v4384_v3  ;;  %v711_v61 = vand.u32 15, %v9778_v14  ;;  %v9781_v22 = vld [vmem:[#allocation48_spill] sm:$0xff]  ;;  %v679_v30 = vadd.s32 32, %v9778_v14 }
 0x164   : > { %6158 = vmatmul.mubr.msk.f32.gmra.mrb[4].mxu1 %vm1730_vm1, %v9771_v46  ;;  %v677_v46 = vadd.s32 16, %v9778_v14  ;;  %vm1219_vm13 = vcmp.gt.s32.totalorder %v711_v61, 0 }
 0x165   : > { %5999 = vmatmul.mubr.msk.f32.gmra.mrb[46].mxu0 %vm1730_vm1, %v9772_v24  ;;  %6160 = vmatprep.mubr.msk.f32.mxu1 %vm1730_vm1, %v7458_v35  ;;  %v4387_v35 = vsel %vm9777_vm11, %v6801_v6, 0.0  ;;  %vm9814_vm11 = vmmov %vm9760_vm0 }
 0x166   : > { %6001 = vmatprep.mubr.msk.f32.mxu0 %vm1730_vm1, %v9774_v44  ;;  %v4388_v3 = vadd.f32 %v4387_v35, %v4386_v41  ;;  %v725_v6 = vand.u32 15, %v677_v46  ;;  %v9785_v41 = vld [vmem:[#allocation52_spill] sm:$0xff]  ;;  %v1315_v46 = vsel %vm1219_vm13, %v7098_v18, 0.0  ;;  %v6804_v18 = vld [vmem:[%s6923_s18 + $0x68] sm:$0xff]  ;;  %vm9826_vm13 = vmmov %vm9760_vm0 }
 0x167   : > { %v1578_v61 = vrot.slane %v1315_v46, 7 }
 0x168   : > { %6161 = vmatmul.mubr.msk.f32.gmra.mrb[6].mxu1 %vm1730_vm1, %v9775_v29  ;;  %vm1221_vm15 = vcmp.gt.s32.totalorder %v725_v6, 0 }
 0x169   : > { %6002 = vmatmul.mubr.msk.f32.gmra.mrb[48].mxu0 %vm1730_vm1, %v9776_v21  ;;  %6163 = vmatprep.mubr.msk.f32.mxu1 %vm1730_vm1, %v7484_v1  ;;  %v6802_v1 = vld [vmem:[%s6923_s18 + $0x58] sm:$0xff] }
 0x16a   : > { %6004 = vmatprep.mubr.msk.f32.mxu0 %vm1730_vm1, %v9779_v49  ;;  %v4389_v29 = vsel %vm9782_vm12, %v6802_v1, 0.0  ;;  %v9784_v49 = vld [vmem:[#allocation50_spill] sm:$0xff]  ;;  %v739_v1 = vand.u32 15, %v679_v30  ;;  %v9790_v30 = vld [vmem:[#allocation61_spill] sm:$0xff]  ;;  %vm9820_vm12 = vmmov %vm9760_vm0 }
 0x16c   : > { %6164 = vmatmul.mubr.msk.f32.gmra.mrb[8].mxu1 %vm1730_vm1, %v9780_v43  ;;  %v4390_v43 = vadd.f32 %v4389_v29, %v4388_v3  ;;  %v1317_v3 = vsel %vm1221_vm15, %v9715_v45, 0.0  ;;  %v9788_v29 = vld [vmem:[#allocation59_spill] sm:$0xff]  ;;  %vm1223_vm5 = vcmp.gt.s32.totalorder %v739_v1, 0  ;;  %v1643_v45 = vsel %vm1379_vm2, 0.0, %v1578_v61  ;;  %v8393_v1 = vld [vmem:[%s6923_s18 + $0x70] sm:$0xff]  ;;  %vm9835_vm15 = vmmov %vm9760_vm0 }
 0x16d   : > { %6005 = vmatmul.mubr.msk.f32.gmra.mrb[50].mxu0 %vm1730_vm1, %v9781_v22  ;;  %6166 = vmatprep.mubr.msk.f32.mxu1 %vm1730_vm1, %v7548_v59  ;;  %v6803_v59 = vld [vmem:[%s6923_s18 + $0x60] sm:$0xff]  ;;  %v1581_v6 = vrot.slane %v1317_v3, 7  ;;  %9794 = vst [vmem:[#allocation20_spill] sm:$0xff] %v8393_v1  ;;  %v4395_v3 = vsel %vm9795_vm7, %v8393_v1, 0.0  ;;  %vm9847_vm7 = vmmov %vm9760_vm0 }
 0x16e   : > { %6007 = vmatprep.mubr.msk.f32.mxu0 %vm1730_vm1, %v9783_v23  ;;  %v4391_v35 = vsel %vm9786_vm14, %v6803_v59, 0.0  ;;  %v9787_v23 = vld [vmem:[#allocation57_spill] sm:$0xff]  ;;  %v1319_v59 = vsel %vm1223_vm5, %v9726_v25, 0.0  ;;  %vm9831_vm14 = vmmov %vm9760_vm0 }
 0x16f   : > { %vm9843_vm5 = vmmov %vm9760_vm0 }
 0x170   : > { %6167 = vmatmul.mubr.msk.f32.gmra.mrb[10].mxu1 %vm1730_vm1, %v9784_v49  ;;  %v4392_v49 = vadd.f32 %v4391_v35, %v4390_v43  ;;  %v9792_v35 = vld [vmem:[#allocation62_spill] sm:$0xff] }
 0x171   : > { %6008 = vmatmul.mubr.msk.f32.gmra.mrb[52].mxu0 %vm1730_vm1, %v9785_v41  ;;  %6169 = vmatprep.mubr.msk.f32.mxu1 %vm1730_vm1, %v9713_v4  ;;  %v4393_v4 = vsel %vm9789_vm4, %v6804_v18, 0.0  ;;  %v1585_v18 = vrot.slane %v1319_v59, 7  ;;  %vm9839_vm4 = vmmov %vm9760_vm0 }
 0x172   : > { %6010 = vmatprep.mubr.msk.f32.mxu0 %vm1730_vm1, %v9787_v23  ;;  %v4394_v43 = vadd.f32 %v4393_v4, %v4392_v49  ;;  %v9796_v49 = vld [vmem:[#allocation67_spill] sm:$0xff]  ;;  %v9797_v4 = vld [vmem:[#allocation65_spill] sm:$0xff] }
 0x174   : > { %6170 = vmatmul.mubr.msk.f32.gmra.mrb[12].mxu1 %vm1730_vm1, %v7573_v42  ;;  %v9791_v42 = vld [vmem:[#allocation60_spill] sm:$0xff] }
 0x175   : > { %6011 = vmatmul.mubr.msk.f32.gmra.mrb[54].mxu0 %vm1730_vm1, %v9788_v29  ;;  %6172 = vmatprep.mubr.msk.f32.mxu1 %vm1730_vm1, %v7633_v57  ;;  %v9793_v57 = vld [vmem:[#allocation8_spill] sm:$0xff] }
 0x176   : > { %6013 = vmatprep.mubr.msk.f32.mxu0 %vm1730_vm1, %v9790_v30  ;;  %v1580_v46 = vsel %vm1379_vm2, %v1578_v61, %v9793_v57  ;;  %v1582_v25 = vsel %vm1379_vm2, %v9793_v57, %v1581_v6  ;;  %v9798_v30 = vld [vmem:[#allocation69_spill] sm:$0xff]  ;;  %v9799_v61 = vld [vmem:[#allocation11_spill] sm:$0xff] }
 0x177   : > { %v1584_v1 = vsel %vm1379_vm2, %v1581_v6, %v9799_v61  ;;  %v1659_v6 = vld [vmem:[%s9361_s2 + $0x70] sm:$0xff] }
 0x178   : > { %6173 = vmatmul.mubr.msk.f32.gmra.mrb[14].mxu1 %vm1730_vm1, %v9791_v42  ;;  %v2312_v42 = vrot.slane %v1643_v45, 2  ;;  %v2316_v45 = vrot.slane %v1582_v25, 2  ;;  %v2318_v57 = vrot.slane %v1584_v1, 2  ;;  %v8433_v25 = vld [vmem:[%s6923_s18 + $0x80] sm:$0xff] }
 0x179   : > { %6014 = vmatmul.mubr.msk.f32.gmra.mrb[56].mxu0 %vm1730_vm1, %v9792_v35  ;;  %6175 = vmatprep.mubr.msk.f32.mxu1 %vm1730_vm1, %v7705_v15  ;;  %v2314_v15 = vrot.slane %v1580_v46, 2  ;;  %v4396_v35 = vadd.f32 %v4395_v3, %v4394_v43  ;;  %v1586_v46 = vsel %vm1379_vm2, %v9799_v61, %v1585_v18  ;;  %v1660_v3 = vld [vmem:[%s9361_s2 + $0x78] sm:$0xff]  ;;  %9802 = vst [vmem:[#allocation29_spill] sm:$0xff] %v8433_v25  ;;  %v4399_v61 = vsel %vm9803_vm8, %v8433_v25, 0.0  ;;  %v8451_v25 = vld [vmem:[%s6923_s18 + $0x88] sm:$0xff]  ;;  %vm9853_vm8 = vmmov %vm9839_vm4 }
 0x17a   : > { %6016 = vmatprep.mubr.msk.f32.mxu0 %vm1730_vm1, %v9796_v49  ;;  %v8410_v49 = vld [vmem:[%s6923_s18 + $0x78] sm:$0xff]  ;;  %9806 = vst [vmem:[#allocation31_spill] sm:$0xff] %v8451_v25 }
 0x17b   : > { %9800 = vst [vmem:[#allocation25_spill] sm:$0xff] %v8410_v49  ;;  %v4397_v59 = vsel %vm9760_vm0, %v8410_v49, 0.0  ;;  %v2315_v43 = vsel %vm2309_vm6, %v2312_v42, %v2314_v15  ;;  %v9804_v49 = vld [vmem:[#allocation77_spill] sm:$0xff] }
 0x17c   : > { %6176 = vmatmul.mubr.msk.f32.gmra.mrb[16].mxu1 %vm1730_vm1, %v9797_v4  ;;  %v4398_v4 = vadd.f32 %v4397_v59, %v4396_v35  ;;  %v2320_v35 = vrot.slane %v1586_v46, 2  ;;  %v8440_v59 = vpack.c.bf16 %v1660_v3, %v1659_v6  ;;  %v2313_v46 = vsel %vm2309_vm6, %v8256_v62, %v2312_v42  ;;  %v9810_v42 = vld [vmem:[#allocation87_spill] sm:$0xff] }
 0x17d   : > { %6017 = vmatmul.mubr.msk.f32.gmra.mrb[58].mxu0 %vm1730_vm1, %v9798_v30  ;;  %6178 = vmatprep.mubr.msk.f32.mxu1 %vm1730_vm1, %v7787_v26 }
 0x17e   : > { %6019 = vmatprep.mubr.msk.f32.mxu0 %vm1730_vm1, %v7770_v9  ;;  %v2317_v9 = vsel %vm2309_vm6, %v2314_v15, %v2316_v45  ;;  %v4401_v15 = vsel %vm9807_vm9, %v8451_v25, 0.0  ;;  %vm9859_vm9 = vmmov %vm9839_vm4  ;;  %v9879_v25 = vld [vmem:[#allocation66_spill] sm:$0xff] }
 0x180   : > { %6179 = vmatmul.mubr.msk.f32.gmra.mrb[18].mxu1 %vm1730_vm1, %v7764_v16  ;;  %v9801_v16 = vld [vmem:[#allocation15_spill] sm:$0xff] }
 0x181   : > { %6020 = vmatmul.mubr.msk.f32.gmra.mrb[60].mxu0 %vm1730_vm1, %v7792_v13  ;;  %6185 = vmatprep.mubr.msk.f32.mxu1 %vm1730_vm1, %v2315_v43  ;;  %v1588_v1 = vsel %vm1379_vm2, %v1585_v18, %v9801_v16  ;;  %v8444_v13 = vsel %vm2309_vm6, %v2316_v45, %v2318_v57  ;;  %v4400_v18 = vadd.f32 %v4399_v61, %v4398_v4  ;;  %v9805_v16 = vld [vmem:[#allocation78_spill] sm:$0xff]  ;;  %v9811_v4 = vrot.slane %v9810_v42, 2 }
 0x182   : > { %6022 = vmatprep.mubr.msk.f32.mxu0 %vm1730_vm1, %v9804_v49  ;;  %v2322_v30 = vrot.slane %v1588_v1, 2  ;;  %v8459_v45 = vsel %vm2309_vm6, %v2318_v57, %v2320_v35  ;;  %v9528_v61 = vmov 0.0|0.0  }
 0x183   : > { %v4402_v3 = vadd.f32 %v4401_v15, %v4400_v18  ;;  %v9812_v18 = vld [vmem:[#allocation22_spill] sm:$0xff] }
 0x184   : > { %6186 = vmatmul.mubr.msk.f32.vlgmr.msra.gmra.mrb[20].mxu1 %vm1730_vm1, %v2317_v9  ;;  %v8467_v6 = vsel %vm2309_vm6, %v2320_v35, %v2322_v30  ;;  %v8482_v1 = vsel %vm2309_vm6, %v2322_v30, %v9811_v4  ;;  %v9815_v30 = vld [vmem:[#allocation56_spill] sm:$0xff] }
 0x185   : > { %6023 = vmatmul.mubr.msk.f32.gmra.mrb[62].mxu0 %vm1730_vm1, %v9805_v16  ;;  %6188 = vmatprep.mubr.msk.f32.mxu1 %vm1730_vm1, %v8444_v13  ;;  %v9816_v15 = vrot.slane %v9815_v30, 2  ;;  %v9821_v30 = vld [vmem:[#allocation10_spill] sm:$0xff] }
 0x186   : > { %6029 = vmatprep.mubr.msk.f32.mxu0 %vm1730_vm1, %v8256_v62  ;;  %6498 = vmatpush3.bf16.msra.mxu1 %v8233_v28  ;;  %v8473_v28 = vld [vmem:[%s6923_s18 + $0x90] sm:$0xff] }
 0x187   : > { %6500 = vmatprep.subr.bf16.mxu1 %v8440_v59  ;;  %9808 = vst [vmem:[#allocation36_spill] sm:$0xff] %v8473_v28  ;;  %v4403_v57 = vsel %vm9809_vm10, %v8473_v28, 0.0  ;;  %vm9865_vm10 = vmmov %vm9839_vm4 }
 0x188   : > { %6189 = vmatmul.mubr.msk.f32.gmra.mrb[22].mxu1 %vm1730_vm1, %v8459_v45  ;;  %v4404_v35 = vadd.f32 %v4403_v57, %v4402_v3  ;;  %v8511_v57 = vld [vmem:[%s6923_s18 + $0xa0] sm:$0xff] }
 0x189   : > { %6030 = vmatmul.mubr.msk.f32.vlgmr.msra.gmra.mrb[32].mxu0 %vm1730_vm1, %v2313_v46  ;;  %6191 = vmatprep.mubr.msk.f32.mxu1 %vm1730_vm1, %v8467_v6  ;;  %v9817_v46 = vld [vmem:[#allocation16_spill] sm:$0xff]  ;;  %9819 = vst [vmem:[#allocation40_spill] sm:$0xff] %v8511_v57  ;;  %v4407_v4 = vsel %vm9820_vm12, %v8511_v57, 0.0  ;;  %vm9872_vm12 = vmmov %vm9839_vm4 }
 0x18a   : > { %6486 = vmatpush3.bf16.msra.mxu0 %v9731_v10  ;;  %6032 = vmatprep.mubr.msk.f32.mxu0 %vm1730_vm1, %v2315_v43  ;;  %v8491_v10 = vld [vmem:[%s6923_s18 + $0x98] sm:$0xff]  ;;  %v9818_v42 = vrot.slane %v9817_v46, 2  ;;  %v9823_v46 = vld [vmem:[#allocation7_spill] sm:$0xff] }
 0x18b   : > { %6507 = vmatprep.subr.bf16.mxu0 %v9528_v61  ;;  %9813 = vst [vmem:[#allocation32_spill] sm:$0xff] %v8491_v10  ;;  %v4405_v43 = vsel %vm9814_vm11, %v8491_v10, 0.0  ;;  %v8531_v61 = vld [vmem:[%s6923_s18 + $0xa8] sm:$0xff]  ;;  %vm9869_vm11 = vmmov %vm9839_vm4  ;;  %v9878_v10 = vld [vmem:[#allocation14_spill] sm:$0xff] }
 0x18c   : > { %6192 = vmatmul.mubr.msk.f32.gmra.mrb[24].mxu1 %vm1730_vm1, %v8482_v1  ;;  %v8502_v3 = vsel %vm2309_vm6, %v9818_v42, %v9816_v15  ;;  %v9822_v15 = vrot.slane %v9821_v30, 2  ;;  %v9824_v42 = vrot.slane %v9823_v46, 2  ;;  %9825 = vst [vmem:[#allocation39_spill] sm:$0xff] %v8531_v61  ;;  %v4409_v30 = vsel %vm9826_vm13, %v8531_v61, 0.0  ;;  %v9828_v46 = vld [vmem:[#allocation27_spill] sm:$0xff]  ;;  %v8551_v61 = vld [vmem:[%s6923_s18 + $0xb0] sm:$0xff]  ;;  %vm9884_vm13 = vmmov %vm9839_vm4 }
 0x18d   : > { %6033 = vmatmul.mubr.msk.f32.gmra.mrb[34].mxu0 %vm1730_vm1, %v2317_v9  ;;  %6194 = vmatprep.mubr.msk.f32.mxu1 %vm1730_vm1, %v9812_v18  ;;  %v4406_v9 = vadd.f32 %v4405_v43, %v4404_v35  ;;  %9830 = vst [vmem:[#allocation41_spill] sm:$0xff] %v8551_v61 }
 0x18e   : > { %6035 = vmatprep.mubr.msk.f32.mxu0 %vm1730_vm1, %v8444_v13  ;;  %v8522_v35 = vsel %vm2309_vm6, %v9824_v42, %v9822_v15  ;;  %v9827_v15 = vrot.slane %v8013_v60, 2  ;;  %v9829_v42 = vrot.slane %v9828_v46, 2  ;;  %v4411_v60 = vsel %vm9831_vm14, %v8551_v61, 0.0 }
 0x18f   : > { %v4408_v43 = vadd.f32 %v4407_v4, %v4406_v9  ;;  %v9833_v46 = vrot.slane %v8017_v56, 2  ;;  %v9836_v56 = vrot.slane %v8048_v31, 2 }
 0x190   : > { %6195 = vmatmul.mubr.msk.f32.gmra.mrb[26].mxu1 %vm1730_vm1, %v8502_v3  ;;  %v8542_v9 = vsel %vm2309_vm6, %v9829_v42, %v9827_v15  ;;  %v9832_v15 = vrot.slane %v8040_v47, 2  ;;  %v8571_v42 = vld [vmem:[%s6923_s18 + $0xb8] sm:$0xff] }
 0x191   : > { %6036 = vmatmul.mubr.msk.f32.gmra.mrb[36].mxu0 %vm1730_vm1, %v8459_v45  ;;  %6197 = vmatprep.mubr.msk.f32.mxu1 %vm1730_vm1, %v8030_v54  ;;  %v4410_v4 = vadd.f32 %v4409_v30, %v4408_v43  ;;  %9834 = vst [vmem:[#allocation4_spill] sm:$0xff] %v8571_v42  ;;  %v4413_v47 = vsel %vm9835_vm15, %v8571_v42, 0.0 }
 0x192   : > { %6038 = vmatprep.mubr.msk.f32.mxu0 %vm1730_vm1, %v8467_v6  ;;  %v8562_v43 = vsel %vm2309_vm6, %v9833_v46, %v9832_v15  ;;  %v9837_v15 = vrot.slane %v8044_v11, 2  ;;  %v8591_v46 = vld [vmem:[%s6923_s18 + $0xc0] sm:$0xff]  ;;  %v705_v11 = vadd.s32 240, %v9778_v14 }
 0x193   : > { %v4412_v30 = vadd.f32 %v4411_v60, %v4410_v4  ;;  %9838 = vst [vmem:[#allocation45_spill] sm:$0xff] %v8591_v46  ;;  %v4415_v31 = vsel %vm9839_vm4, %v8591_v46, 0.0  ;;  %v8612_v46 = vld [vmem:[%s6923_s18 + $0xc8] sm:$0xff] }
 0x194   : > { %6198 = vmatmul.mubr.msk.f32.gmra.mrb[28].mxu1 %vm1730_vm1, %v8522_v35  ;;  %v8582_v4 = vsel %vm2309_vm6, %v9837_v15, %v9836_v56  ;;  %v9840_v56 = vrot.slane %v8076_v12, 2  ;;  %9842 = vst [vmem:[#allocation48_spill] sm:$0xff] %v8612_v46  ;;  %v4417_v12 = vsel %vm9843_vm5, %v8612_v46, 0.0  ;;  %v921_v42 = vand.u32 15, %v705_v11  ;;  %v8632_v11 = vld [vmem:[%s6923_s18 + $0xd0] sm:$0xff] }
 0x195   : > { %6039 = vmatmul.mubr.msk.f32.gmra.mrb[38].mxu0 %vm1730_vm1, %v8482_v1  ;;  %6200 = vmatprep.mubr.msk.f32.mxu1 %vm1730_vm1, %v8056_v63  ;;  %v4414_v60 = vadd.f32 %v4413_v47, %v4412_v30  ;;  %v9841_v30 = vrot.slane %v8072_v8, 2  ;;  %v9844_v8 = vrot.slane %v8102_v55, 2  ;;  %9846 = vst [vmem:[#allocation50_spill] sm:$0xff] %v8632_v11  ;;  %v4419_v55 = vsel %vm9847_vm7, %v8632_v11, 0.0  ;;  %v8653_v11 = vld [vmem:[%s6923_s18 + $0xd8] sm:$0xff] }
 0x196   : > { %6041 = vmatprep.mubr.msk.f32.mxu0 %vm1730_vm1, %v9812_v18  ;;  %vm1249_vm0 = vcmp.gt.s32.totalorder %v921_v42, 0  ;;  %v9851_v42 = vld [vmem:[#allocation49_spill] sm:$0xff]  ;;  %9852 = vst [vmem:[#allocation52_spill] sm:$0xff] %v8653_v11 }
 0x197   : > { %v8603_v47 = vsel %vm2309_vm6, %v9841_v30, %v9840_v56  ;;  %v4416_v15 = vadd.f32 %v4415_v31, %v4414_v60  ;;  %v9845_v56 = vrot.slane %v8098_v50, 2  ;;  %v9848_v50 = vrot.slane %v8127_v52, 2  ;;  %v9849_v30 = vld [vmem:[#allocation33_spill] sm:$0xff] }
 0x198   : > { %6201 = vmatmul.mubr.msk.f32.gmra.mrb[30].mxu1 %vm1730_vm1, %v8542_v9  ;;  %v4421_v52 = vsel %vm9853_vm8, %v8653_v11, 0.0  ;;  %v8673_v11 = vld [vmem:[%s6923_s18 + $0xe0] sm:$0xff] }
 0x199   : > { %6042 = vmatmul.mubr.msk.f32.gmra.mrb[40].mxu0 %vm1730_vm1, %v8502_v3  ;;  %6203 = vmatprep.mubr.msk.f32.mxu1 %vm1730_vm1, %v8067_v36  ;;  %v8623_v60 = vsel %vm2309_vm6, %v9845_v56, %v9844_v8  ;;  %v4418_v31 = vadd.f32 %v4417_v12, %v4416_v15  ;;  %v9850_v8 = vrot.slane %v9849_v30, 2  ;;  %v1345_v56 = vsel %vm1249_vm0, %v7787_v26, 0.0  ;;  %9858 = vst [vmem:[#allocation57_spill] sm:$0xff] %v8673_v11 }
 0x19a   : > { %6044 = vmatprep.mubr.msk.f32.mxu0 %vm1730_vm1, %v8030_v54 }
 0x19b   : > { %v8643_v15 = vsel %vm2309_vm6, %v9850_v8, %v9848_v50  ;;  %v4420_v12 = vadd.f32 %v4419_v55, %v4418_v31  ;;  %v9854_v50 = vld [vmem:[#allocation35_spill] sm:$0xff]  ;;  %v9856_v8 = vld [vmem:[#allocation12_spill] sm:$0xff]  ;;  %v1637_v55 = vrot.slane %v1345_v56, 7  ;;  %v9860_v56 = vrot.slane %v8171_v20, 2 }
 0x19c   : > { %6204 = vmatmul.mubr.msk.f32.gmra.mrb[0].mxu1 %vm1730_vm1, %v8562_v43  ;;  %v9855_v30 = vrot.slane %v9854_v50, 2  ;;  %v9857_v31 = vrot.slane %v9856_v8, 2  ;;  %v4423_v50 = vsel %vm9859_vm9, %v8673_v11, 0.0  ;;  %v9877_v11 = vld [vmem:[#allocation9_spill] sm:$0xff] }
 0x19d   : > { %6045 = vmatmul.mubr.msk.f32.gmra.mrb[42].mxu0 %vm1730_vm1, %v8522_v35  ;;  %6206 = vmatprep.mubr.msk.f32.mxu1 %vm1730_vm1, %v8087_v19  ;;  %v4422_v46 = vadd.f32 %v4421_v52, %v4420_v12  ;;  %v9863_v52 = vld [vmem:[#allocation71_spill] sm:$0xff]  ;;  %v1640_v20 = vsel %vm1379_vm2, %v1637_v55, %v8092_v32 }
 0x19e   : > { %6047 = vmatprep.mubr.msk.f32.mxu0 %vm1730_vm1, %v8056_v63  ;;  %v8664_v26 = vsel %vm2309_vm6, %v9857_v31, %v9855_v30  ;;  %v9861_v30 = vld [vmem:[#allocation43_spill] sm:$0xff]  ;;  %v1638_v31 = vsel %vm1379_vm2, %v9863_v52, %v1637_v55  ;;  %v3278_v32 = vrot.slane %v1640_v20, 2 }
 0x19f   : > { %v9862_v8 = vrot.slane %v9861_v30, 2  ;;  %v4424_v61 = vadd.f32 %v4423_v50, %v4422_v46  ;;  %v8697_v30 = vld [vmem:[%s6923_s18 + $0xe8] sm:$0xff]  ;;  %v9867_v46 = vrot.slane %v8201_v58, 2  ;;  %v2372_v52 = vrot.slane %v1638_v31, 2 }
 0x1a0   : > { %6207 = vmatmul.mubr.msk.f32.gmra.mrb[2].mxu1 %vm1730_vm1, %v8582_v4  ;;  %9864 = vst [vmem:[#allocation59_spill] sm:$0xff] %v8697_v30  ;;  %v9870_v58 = vrot.slane %v8209_v53, 2 }
 0x1a1   : > { %6048 = vmatmul.mubr.msk.f32.gmra.mrb[44].mxu0 %vm1730_vm1, %v8542_v9  ;;  %6209 = vmatprep.mubr.msk.f32.mxu1 %vm1730_vm1, %v8118_v5  ;;  %v8684_v12 = vsel %vm2309_vm6, %v9862_v8, %v9860_v56  ;;  %v4425_v56 = vsel %vm9865_vm10, %v8697_v30, 0.0  ;;  %v9866_v8 = vrot.slane %v8205_v27, 2  ;;  %v8717_v30 = vld [vmem:[%s6923_s18 + $0xf0] sm:$0xff] }
 0x1a2   : > { %6050 = vmatprep.mubr.msk.f32.mxu0 %vm1730_vm1, %v8067_v36  ;;  %v4426_v55 = vadd.f32 %v4425_v56, %v4424_v61  ;;  %9868 = vst [vmem:[#allocation60_spill] sm:$0xff] %v8717_v30  ;;  %v4427_v27 = vsel %vm9869_vm11, %v8717_v30, 0.0  ;;  %v8726_v31 = vsel %vm2309_vm6, %v9870_v58, %v2372_v52  ;;  %v8731_v61 = vsel %vm2309_vm6, %v2372_v52, %v3278_v32  ;;  %v8738_v56 = vld [vmem:[%s6923_s18 + $0xf8] sm:$0xff]  ;;  %v1661_v52 = vld [vmem:[%s9361_s2 + $0x80] sm:$0xff]  ;;  %v9874_v58 = vld [vmem:[#allocation84_spill] sm:$0xff] }
 0x1a3   : > { %v8708_v50 = vsel %vm2309_vm6, %v9867_v46, %v9866_v8  ;;  %9871 = vst [vmem:[#allocation8_spill] sm:$0xff] %v8738_v56  ;;  %v4429_v53 = vsel %vm9872_vm12, %v8738_v56, 0.0  ;;  %v9873_v8 = vrot.slane %v8184_v40, 2  ;;  %v9876_v30 = vld [vmem:[#allocation3_spill] sm:$0xff] }
 0x1a4   : > { %6210 = vmatmul.mubr.msk.f32.gmra.mrb[4].mxu1 %vm1730_vm1, %v8603_v47  ;;  %v4428_v20 = vadd.f32 %v4427_v27, %v4426_v55  ;;  %v1662_v55 = vld [vmem:[%s9361_s2 + $0x88] sm:$0xff] }
 0x1a5   : > { %6051 = vmatmul.mubr.msk.f32.gmra.mrb[46].mxu0 %vm1730_vm1, %v8562_v43  ;;  %6212 = vmatprep.mubr.msk.f32.mxu1 %vm1730_vm1, %v8151_v0  ;;  %v8747_v46 = vsel %vm2309_vm6, %v3278_v32, %v9873_v8  ;;  %v4439_v32 = vld [vmem:[%s9363_s4] sm:$0xff]  ;;  %v4440_v8 = vld [vmem:[%s9363_s4 + $0x8] sm:$0xff]  ;;  %v8769_v56 = vpack.c.bf16 %v1662_v55, %v1661_v52  ;;  %v4441_v52 = vld [vmem:[%s9363_s4 + $0x10] sm:$0xff]  ;;  %vm6848_vm6 = vmmov 0  }
 0x1a6   : > { %6053 = vmatprep.mubr.msk.f32.mxu0 %vm1730_vm1, %v8087_v19  ;;  %v4430_v27 = vadd.f32 %v4429_v53, %v4428_v20  ;;  %v9875_v20 = vld [vmem:[#allocation13_spill] sm:$0xff]  ;;  %v6508_v57 = vpack.c.bf16 %v4440_v8, %v4439_v32  ;;  %v9881_v32 = vmov 0.0|0.0  }
 0x1a7   : > { %v4442_v55 = vld [vmem:[%s9363_s4 + $0x18] sm:$0xff] }
 0x1a8   : > { %6213 = vmatmul.mubr.msk.f32.gmra.mrb[6].mxu1 %vm1730_vm1, %v8623_v60  ;;  %v4431_v53 = vrot.slane %v4430_v27, 4 }
 0x1a9   : > { %6054 = vmatmul.mubr.msk.f32.gmra.mrb[48].mxu0 %vm1730_vm1, %v8582_v4  ;;  %6215 = vmatprep.mubr.msk.f32.mxu1 %vm1730_vm1, %v8162_v33 }
 0x1aa   : > { %6056 = vmatprep.mubr.msk.f32.mxu0 %vm1730_vm1, %v8118_v5  ;;  %v4432_v28 = vadd.f32 %v4431_v53, %v4430_v27  ;;  %v9898_v27 = vld [vmem:[#allocation24_spill] sm:$0xff]  ;;  %v9901_v53 = vld [vmem:[#allocation30_spill] sm:$0xff] }
 0x1ac   : > { %6216 = vmatmul.mubr.msk.f32.gmra.mrb[8].mxu1 %vm1730_vm1, %v8643_v15  ;;  %v4433_v8 = vrot.slane %v4432_v28, 2 }
 0x1ad   : > { %6057 = vmatmul.mubr.msk.f32.gmra.mrb[50].mxu0 %vm1730_vm1, %v8603_v47  ;;  %6218 = vmatprep.mubr.msk.f32.mxu1 %vm1730_vm1, %v9851_v42 }
 0x1ae   : > { %6059 = vmatprep.mubr.msk.f32.mxu0 %vm1730_vm1, %v8151_v0 }
 0x1b0   : > { %6219 = vmatmul.mubr.msk.f32.gmra.mrb[10].mxu1 %vm1730_vm1, %v8664_v26 }
 0x1b1   : > { %6060 = vmatmul.mubr.msk.f32.gmra.mrb[52].mxu0 %vm1730_vm1, %v8623_v60  ;;  %6221 = vmatprep.mubr.msk.f32.mxu1 %vm1730_vm1, %v8225_v39 }
 0x1b2   : > { %6062 = vmatprep.mubr.msk.f32.mxu0 %vm1730_vm1, %v8162_v33 }
 0x1b4   : > { %6222 = vmatmul.mubr.msk.f32.gmra.mrb[12].mxu1 %vm1730_vm1, %v8684_v12 }
 0x1b5   : > { %6063 = vmatmul.mubr.msk.f32.gmra.mrb[54].mxu0 %vm1730_vm1, %v8643_v15  ;;  %6224 = vmatprep.mubr.msk.f32.mxu1 %vm1730_vm1, %v8242_v38 }
 0x1b6   : > { %6065 = vmatprep.mubr.msk.f32.mxu0 %vm1730_vm1, %v9851_v42 }
 0x1b8   : > { %6225 = vmatmul.mubr.msk.f32.gmra.mrb[14].mxu1 %vm1730_vm1, %v8708_v50 }
 0x1b9   : > { %6066 = vmatmul.mubr.msk.f32.gmra.mrb[56].mxu0 %vm1730_vm1, %v8664_v26  ;;  %6227 = vmatprep.mubr.msk.f32.mxu1 %vm1730_vm1, %v8263_v17 }
 0x1ba   : > { %6068 = vmatprep.mubr.msk.f32.mxu0 %vm1730_vm1, %v8225_v39 }
 0x1bc   : > { %6228 = vmatmul.mubr.msk.f32.gmra.mrb[16].mxu1 %vm1730_vm1, %v8726_v31 }
 0x1bd   : > { %6069 = vmatmul.mubr.msk.f32.gmra.mrb[58].mxu0 %vm1730_vm1, %v8684_v12  ;;  %6230 = vmatprep.mubr.msk.f32.mxu1 %vm1730_vm1, %v8731_v61 }
 0x1be   : > { %6071 = vmatprep.mubr.msk.f32.mxu0 %vm1730_vm1, %v8242_v38 }
 0x1c0   : > { %6231 = vmatmul.mubr.msk.f32.gmra.mrb[18].mxu1 %vm1730_vm1, %v8747_v46 }
 0x1c1   : > { %6072 = vmatmul.mubr.msk.f32.gmra.mrb[60].mxu0 %vm1730_vm1, %v8708_v50  ;;  %6237 = vmatprep.mubr.msk.f32.mxu1 %vm1730_vm1, %v9874_v58 }
 0x1c2   : > { %6074 = vmatprep.mubr.msk.f32.mxu0 %vm1730_vm1, %v8263_v17 }
 0x1c4   : > { %6238 = vmatmul.mubr.msk.f32.vlgmr.msra.gmra.mrb[20].mxu1 %vm1730_vm1, %v9875_v20 }
 0x1c5   : > { %6075 = vmatmul.mubr.msk.f32.gmra.mrb[62].mxu0 %vm1730_vm1, %v8726_v31  ;;  %6240 = vmatprep.mubr.msk.f32.mxu1 %vm1730_vm1, %v9876_v30 }
 0x1c6   : > { %6081 = vmatprep.mubr.msk.f32.mxu0 %vm1730_vm1, %v9877_v11  ;;  %6502 = vmatpush3.bf16.msra.mxu1 %v8440_v59  ;;  %v9880_v11 = vld [vmem:[#allocation17_spill] sm:$0xff]  ;;  %v6511_v59 = vpack.c.bf16 %v4442_v55, %v4441_v52  ;;  %v9902_v52 = vld [vmem:[#allocation34_spill] sm:$0xff] }
 0x1c7   : > { %6504 = vmatprep.subr.bf16.mxu1 %v8769_v56  ;;  %v9903_v55 = vld [vmem:[#allocation37_spill] sm:$0xff] }
 0x1c8   : > { %6241 = vmatmul.mubr.msk.f32.gmra.mrb[22].mxu1 %vm1730_vm1, %v9878_v10 }
 0x1c9   : > { %6082 = vmatmul.mubr.msk.f32.vlgmr.msra.gmra.mrb[32].mxu0 %vm1730_vm1, %v9879_v25  ;;  %6243 = vmatprep.mubr.msk.f32.mxu1 %vm1730_vm1, %v9880_v11  ;;  %v4434_v25 = vadd.f32 %v4433_v8, %v4432_v28  ;;  %v9908_v8 = vld [vmem:[#allocation53_spill] sm:$0xff] }
 0x1ca   : > { %6509 = vmatpush3.bf16.msra.mxu0 %v6508_v57  ;;  %6084 = vmatprep.mubr.msk.f32.mxu0 %vm1730_vm1, %v9874_v58  ;;  %v9899_v58 = vld [vmem:[#allocation26_spill] sm:$0xff] }
 0x1cb   : > { %6510 = vmatprep.subr.bf16.mxu0 %v9881_v32  ;;  %v4435_v57 = vrot.slane %v4434_v25, 1 }
 0x1cc   : > { %6244 = vmatmul.mubr.msk.f32.gmra.mrb[24].mxu1 %vm1730_vm1, %v8251_v48 }
 0x1cd   : > { %6085 = vmatmul.mubr.msk.f32.gmra.mrb[34].mxu0 %vm1730_vm1, %v9875_v20  ;;  %6246 = vmatprep.mubr.msk.f32.mxu1 %vm1730_vm1, %v8273_v2  ;;  %v4436_v28 = vadd.f32 %v4435_v57, %v4434_v25  ;;  %v9900_v20 = vld [vmem:[#allocation28_spill] sm:$0xff]  ;;  %v9909_v25 = vld [vmem:[#allocation54_spill] sm:$0xff]  ;;  %v9910_v57 = vld [vmem:[#allocation55_spill] sm:$0xff] }
 0x1ce   : > { %6087 = vmatprep.mubr.msk.f32.mxu0 %vm1730_vm1, %v9876_v30  ;;  %6512 = vmatpush3.bf16.msra.mxu0 %v6511_v59  ;;  %v9895_v30 = vld [vmem:[#allocation18_spill] sm:$0xff] }
 0x1cf   : > { %6513 = vmatprep.subr.bf16.mxu0 %v9881_v32  ;;  %v9906_v59 = vld [vmem:[#allocation46_spill] sm:$0xff]  ;;  %v9907_v32 = vld [vmem:[#allocation47_spill] sm:$0xff] }
 0x1d0   : > { %6247 = vmatmul.mubr.msk.f32.gmra.mrb[26].mxu1 %vm1730_vm1, %v8291_v34 }
 0x1d1   : > { %6088 = vmatmul.mubr.msk.f32.gmra.mrb[36].mxu0 %vm1730_vm1, %v9878_v10  ;;  %6249 = vmatprep.mubr.msk.f32.mxu1 %vm1730_vm1, %v8299_v7 }
 0x1d2   : > { %6090 = vmatprep.mubr.msk.f32.mxu0 %vm1730_vm1, %v9880_v11  ;;  %v9904_v11 = vld [vmem:[#allocation38_spill] sm:$0xff] }
 0x1d4   : > { %6250 = vmatmul.mubr.msk.f32.gmra.mrb[28].mxu1 %vm1730_vm1, %v7929_v51 }
 0x1d5   : > { %6091 = vmatmul.mubr.msk.f32.gmra.mrb[38].mxu0 %vm1730_vm1, %v8251_v48  ;;  %6252 = vmatprep.mubr.msk.f32.mxu1 %vm1730_vm1, %v9770_v37  ;;  %v4438_v48 = vmul.f32 0.00390625, %v4436_v28  ;;  %v9889_v37 = vld [vmem:[#allocation69_spill] sm:$0xff]  ;;  %v9911_v28 = vld [vmem:[#allocation58_spill] sm:$0xff] }
 0x1d6   : > { %6093 = vmatprep.mubr.msk.f32.mxu0 %vm1730_vm1, %v8273_v2  ;;  %v9882_v2 = vld [vmem:[#allocation44_spill] sm:$0xff] }
 0x1d8   : > { %6253 = vmatmul.mubr.msk.f32.gmra.mrb[30].mxu1 %vm1730_vm1, %v9772_v24  ;;  %v9883_v24 = vmov 0.0  }
 0x1d9   : > { %6094 = vmatmul.mubr.msk.f32.gmra.mrb[40].mxu0 %vm1730_vm1, %v8291_v34  ;;  %6255 = vmatprep.mubr.msk.f32.mxu1 %vm1730_vm1, %v9774_v44  ;;  %v9885_v34 = vld [vmem:[#allocation51_spill] sm:$0xff]  ;;  %v9890_v44 = vld [vmem:[#allocation72_spill] sm:$0xff] }
 0x1da   : > { %6096 = vmatprep.mubr.msk.f32.mxu0 %vm1730_vm1, %v8299_v7  ;;  %v9888_v7 = vld [vmem:[#allocation67_spill] sm:$0xff] }
 0x1dc   : > { %6256 = vmatmul.mubr.msk.f32.gmra.mrb[0].mxu1 %vm1730_vm1, %v9776_v21  ;;  %v9886_v21 = vld [vmem:[#allocation61_spill] sm:$0xff] }
 0x1dd   : > { %6097 = vmatmul.mubr.msk.f32.gmra.mrb[42].mxu0 %vm1730_vm1, %v7929_v51  ;;  %6258 = vmatprep.mubr.msk.f32.mxu1 %vm1730_vm1, %v9882_v2  ;;  %v9887_v51 = vld [vmem:[#allocation62_spill] sm:$0xff]  ;;  %v9913_v2 = vld [vmem:[#allocation64_spill] sm:$0xff] }
 0x1de   : > { %6397 = vmatprep.mubr.msk.f32.mxu0 %vm6848_vm6, %v9883_v24 }
 0x1e0   : > { %6259 = vmatmul.mubr.msk.f32.gmra.mrb[2].mxu1 %vm1730_vm1, %v9781_v22  ;;  %v9891_v22 = vld [vmem:[#allocation74_spill] sm:$0xff] }
 0x1e1   : > { %6398 = vmatmul.mubr.msk.f32.vlgmr.msra.gmra.mrb[64].mxu0 %vm9884_vm13, %v4438_v48  ;;  %6261 = vmatprep.mubr.msk.f32.mxu1 %vm1730_vm1, %v9885_v34  ;;  %v9912_v48 = vld [vmem:[#allocation63_spill] sm:$0xff]  ;;  %v9915_v34 = vld [vmem:[#allocation70_spill] sm:$0xff] }
 0x1e2   : > { %6404 = vmatprep.mubr.msk.f32.mxu0 %vm6848_vm6, %v9883_v24 }
 0x1e4   : > { %6262 = vmatmul.mubr.msk.f32.gmra.mrb[4].mxu1 %vm1730_vm1, %v9785_v41  ;;  %v9893_v41 = vld [vmem:[#allocation82_spill] sm:$0xff] }
 0x1e5   : > { %6264 = vmatprep.mubr.msk.f32.mxu1 %vm1730_vm1, %v9787_v23  ;;  %v9892_v23 = vld [vmem:[#allocation79_spill] sm:$0xff] }
 0x1e8   : > { %6265 = vmatmul.mubr.msk.f32.gmra.mrb[6].mxu1 %vm1730_vm1, %v9788_v29  ;;  %v9894_v29 = vld [vmem:[#allocation75_spill] sm:$0xff] }
 0x1e9   : > { %6267 = vmatprep.mubr.msk.f32.mxu1 %vm1730_vm1, %v9886_v21  ;;  %v1446_v10 = vsel %vm1379_vm2, %v9894_v29, 0.0  ;;  %v9916_v21 = vld [vmem:[#allocation73_spill] sm:$0xff] }
 0x1ea   : > { %v9921_v29 = vld [vmem:[#allocation85_spill] sm:$0xff] }
 0x1ec   : > { %6268 = vmatmul.mubr.msk.f32.gmra.mrb[8].mxu1 %vm1730_vm1, %v9887_v51  ;;  %v9917_v51 = vld [vmem:[#allocation76_spill] sm:$0xff] }
 0x1ed   : > { %6270 = vmatprep.mubr.msk.f32.mxu1 %vm1730_vm1, %v9888_v7  ;;  %v9918_v7 = vld [vmem:[#allocation80_spill] sm:$0xff] }
 0x1f0   : > { %6271 = vmatmul.mubr.msk.f32.gmra.mrb[10].mxu1 %vm1730_vm1, %v9889_v37  ;;  %v9919_v37 = vld [vmem:[#allocation81_spill] sm:$0xff] }
 0x1f1   : > { %6273 = vmatprep.mubr.msk.f32.mxu1 %vm1730_vm1, %v9890_v44  ;;  %v4517_v44 = vld [vmem:[%s9364_s5] sm:$0xff] }
 0x1f4   : > { %6274 = vmatmul.mubr.msk.f32.gmra.mrb[12].mxu1 %vm1730_vm1, %v9891_v22  ;;  %v4518_v22 = vld [vmem:[%s9364_s5 + $0x8] sm:$0xff] }
 0x1f5   : > { %6276 = vmatprep.mubr.msk.f32.mxu1 %vm1730_vm1, %v9804_v49  ;;  %v9896_v49 = vld [vmem:[#allocation19_spill] sm:$0xff] }
 0x1f8   : > { %6277 = vmatmul.mubr.msk.f32.gmra.mrb[14].mxu1 %vm1730_vm1, %v9805_v16  ;;  %v9897_v16 = vld [vmem:[#allocation23_spill] sm:$0xff] }
 0x1f9   : > { %6279 = vmatprep.mubr.msk.f32.mxu1 %vm1730_vm1, %v9892_v23  ;;  %v6514_v23 = vpack.c.bf16 %v4518_v22, %v4517_v44 }
 0x1fb   : > { %6515 = vmatpush3.bf16.msra.mxu0 %v6514_v23 }
 0x1fc   : > { %6280 = vmatmul.mubr.msk.f32.gmra.mrb[16].mxu1 %vm1730_vm1, %v9893_v41  ;;  %v9920_v41 = vld [vmem:[#allocation83_spill] sm:$0xff] }
 0x1fd   : > { %6282 = vmatprep.mubr.msk.f32.mxu1 %vm1730_vm1, %v1446_v10  ;;  %v9922_v10 = vld [vmem:[#allocation86_spill] sm:$0xff] }
 0x200   : > { %6283 = vmatmul.mubr.f32.gmra.mrb[18].mxu1 %v9883_v24  ;;  %v9914_v24 = vld [vmem:[#allocation68_spill] sm:$0xff] }
 0x201   : > { %6289 = vmatprep.mubr.msk.f32.mxu1 %vm1730_vm1, %v9895_v30  ;;  %v9923_v30 = vld [vmem:[#allocation5_spill] sm:$0xff] }
 0x204   : > { %6290 = vmatmul.mubr.msk.f32.vlgmr.msra.gmra.mrb[20].mxu1 %vm1730_vm1, %v9896_v49  ;;  %v9924_v49 = vld [vmem:[#allocation21_spill] sm:$0xff] }
 0x205   : > { %6292 = vmatprep.mubr.msk.f32.mxu1 %vm1730_vm1, %v9897_v16  ;;  %6506 = vmatpush3.bf16.msra.mxu1 %v8769_v56  ;;  %v9905_v56 = vld [vmem:[#allocation42_spill] sm:$0xff] }
 0x206   : > { %v9925_v16 = vld [vmem:[#allocation2_spill] sm:$0xff] }
 0x208   : > { %6293 = vmatmul.mubr.msk.f32.gmra.mrb[22].mxu1 %vm1730_vm1, %v9898_v27  ;;  %v9926_v27 = vrot.slane %v8184_v40, 1 }
 0x209   : > { %6295 = vmatprep.mubr.msk.f32.mxu1 %vm1730_vm1, %v9899_v58 }
 0x20a   : > { %v3808_v58 = vsel %vm1665_vm3, %v9926_v27, %v9925_v16 }
 0x20c   : > { %6296 = vmatmul.mubr.msk.f32.gmra.mrb[24].mxu1 %vm1730_vm1, %v9900_v20 }
 0x20d   : > { %6298 = vmatprep.mubr.msk.f32.mxu1 %vm1730_vm1, %v9901_v53 }
 0x210   : > { %6299 = vmatmul.mubr.msk.f32.gmra.mrb[26].mxu1 %vm1730_vm1, %v9902_v52 }
 0x211   : > { %6301 = vmatprep.mubr.msk.f32.mxu1 %vm1730_vm1, %v9903_v55 }
 0x214   : > { %6302 = vmatmul.mubr.msk.f32.gmra.mrb[28].mxu1 %vm1730_vm1, %v9904_v11 }
 0x215   : > { %6304 = vmatprep.mubr.msk.f32.mxu1 %vm1730_vm1, %v9905_v56 }
 0x218   : > { %6305 = vmatmul.mubr.msk.f32.gmra.mrb[30].mxu1 %vm1730_vm1, %v9906_v59 }
 0x219   : > { %6307 = vmatprep.mubr.msk.f32.mxu1 %vm1730_vm1, %v9907_v32 }
 0x21c   : > { %6308 = vmatmul.mubr.msk.f32.gmra.mrb[0].mxu1 %vm1730_vm1, %v9908_v8 }
 0x21d   : > { %6310 = vmatprep.mubr.msk.f32.mxu1 %vm1730_vm1, %v9909_v25 }
 0x220   : > { %6311 = vmatmul.mubr.msk.f32.gmra.mrb[2].mxu1 %vm1730_vm1, %v9910_v57 }
 0x221   : > { %6313 = vmatprep.mubr.msk.f32.mxu1 %vm1730_vm1, %v9911_v28 }
 0x224   : > { %6314 = vmatmul.mubr.msk.f32.gmra.mrb[4].mxu1 %vm1730_vm1, %v9912_v48 }
 0x225   : > { %6316 = vmatprep.mubr.msk.f32.mxu1 %vm1730_vm1, %v9913_v2 }
 0x228   : > { %6317 = vmatmul.mubr.msk.f32.gmra.mrb[6].mxu1 %vm1730_vm1, %v9914_v24 }
 0x229   : > { %6319 = vmatprep.mubr.msk.f32.mxu1 %vm1730_vm1, %v9915_v34 }
 0x22c   : > { %6320 = vmatmul.mubr.msk.f32.gmra.mrb[8].mxu1 %vm1730_vm1, %v9916_v21 }
 0x22d   : > { %6322 = vmatprep.mubr.msk.f32.mxu1 %vm1730_vm1, %v9917_v51 }
 0x230   : > { %6323 = vmatmul.mubr.msk.f32.gmra.mrb[10].mxu1 %vm1730_vm1, %v9918_v7 }
 0x231   : > { %6325 = vmatprep.mubr.msk.f32.mxu1 %vm1730_vm1, %v9919_v37 }
 0x234   : > { %6326 = vmatmul.mubr.msk.f32.gmra.mrb[12].mxu1 %vm1730_vm1, %v9920_v41 }
 0x235   : > { %6328 = vmatprep.mubr.msk.f32.mxu1 %vm1730_vm1, %v9921_v29 }
 0x238   : > { %6329 = vmatmul.mubr.msk.f32.gmra.mrb[14].mxu1 %vm1730_vm1, %v9922_v10 }
 0x239   : > { %6331 = vmatprep.mubr.msk.f32.mxu1 %vm1730_vm1, %v9923_v30 }
 0x23c   : > { %6332 = vmatmul.mubr.msk.f32.gmra.mrb[16].mxu1 %vm1730_vm1, %v9924_v49 }
 0x23d   : > { %6334 = vmatprep.mubr.msk.f32.mxu1 %vm1730_vm1, %v3808_v58 }
 0x240   : > { %6335 = vmatmul.mubr.msk.f32.gmra.mrb[18].mxu1 %vm1730_vm1, %v9925_v16 }
 0x241   : > { %6341 = vmatprep.mubr.msk.f32.mxu1 %vm1730_vm1, %v8444_v13 }
 0x244   : > { %6342 = vmatmul.mubr.msk.f32.vlgmr.msra.gmra.mrb[20].mxu1 %vm1730_vm1, %v8459_v45 }
 0x245   : > { %6344 = vmatprep.mubr.msk.f32.mxu1 %vm1730_vm1, %v8467_v6 }
 0x248   : > { %6345 = vmatmul.mubr.msk.f32.gmra.mrb[22].mxu1 %vm1730_vm1, %v8482_v1 }
 0x249   : > { %6347 = vmatprep.mubr.msk.f32.mxu1 %vm1730_vm1, %v9812_v18 }
 0x24c   : > { %6348 = vmatmul.mubr.msk.f32.gmra.mrb[24].mxu1 %vm1730_vm1, %v8502_v3 }
 0x24d   : > { %6350 = vmatprep.mubr.msk.f32.mxu1 %vm1730_vm1, %v8030_v54 }
 0x250   : > { %6351 = vmatmul.mubr.msk.f32.gmra.mrb[26].mxu1 %vm1730_vm1, %v8522_v35 }
 0x251   : > { %6353 = vmatprep.mubr.msk.f32.mxu1 %vm1730_vm1, %v8056_v63 }
 0x254   : > { %6354 = vmatmul.mubr.msk.f32.gmra.mrb[28].mxu1 %vm1730_vm1, %v8542_v9 }
 0x255   : > { %6356 = vmatprep.mubr.msk.f32.mxu1 %vm1730_vm1, %v8067_v36 }
 0x258   : > { %6357 = vmatmul.mubr.msk.f32.gmra.mrb[30].mxu1 %vm1730_vm1, %v8562_v43 }
 0x259   : > { %6359 = vmatprep.mubr.msk.f32.mxu1 %vm1730_vm1, %v8087_v19 }
 0x25c   : > { %6360 = vmatmul.mubr.msk.f32.gmra.mrb[0].mxu1 %vm1730_vm1, %v8582_v4 }
 0x25d   : > { %6362 = vmatprep.mubr.msk.f32.mxu1 %vm1730_vm1, %v8118_v5  ;;  %v9927_v5 = vld [vmem:[#allocation6_spill] sm:$0xff] }
 0x260   : > { %6363 = vmatmul.mubr.msk.f32.gmra.mrb[2].mxu1 %vm1730_vm1, %v8603_v47 }
 0x261   : > { %6365 = vmatprep.mubr.msk.f32.mxu1 %vm1730_vm1, %v8151_v0 }
 0x264   : > { %6366 = vmatmul.mubr.msk.f32.gmra.mrb[4].mxu1 %vm1730_vm1, %v8623_v60 }
 0x265   : > { %6368 = vmatprep.mubr.msk.f32.mxu1 %vm1730_vm1, %v8162_v33 }
 0x268   : > { %6369 = vmatmul.mubr.msk.f32.gmra.mrb[6].mxu1 %vm1730_vm1, %v8643_v15 }
 0x269   : > { %6371 = vmatprep.mubr.msk.f32.mxu1 %vm1730_vm1, %v9851_v42 }
 0x26c   : > { %6372 = vmatmul.mubr.msk.f32.gmra.mrb[8].mxu1 %vm1730_vm1, %v8664_v26 }
 0x26d   : > { %6374 = vmatprep.mubr.msk.f32.mxu1 %vm1730_vm1, %v8225_v39 }
 0x270   : > { %6375 = vmatmul.mubr.msk.f32.gmra.mrb[10].mxu1 %vm1730_vm1, %v8684_v12 }
 0x271   : > { %6377 = vmatprep.mubr.msk.f32.mxu1 %vm1730_vm1, %v8242_v38 }
 0x274   : > { %v8996_v13 = vpop.f32.mrb[44].mxu0  ;;  %6378 = vmatmul.mubr.msk.f32.gmra.mrb[12].mxu1 %vm1730_vm1, %v8708_v50 }
 0x275   : > { %v9000_v63 = vpop.f32.mrb[45].mxu0  ;;  %6380 = vmatprep.mubr.msk.f32.mxu1 %vm1730_vm1, %v8263_v17 }
 0x278   : > { %v9004_v54 = vpop.f32.mrb[46].mxu0  ;;  %6381 = vmatmul.mubr.msk.f32.gmra.mrb[14].mxu1 %vm1730_vm1, %v8726_v31 }
 0x279   : > { %v9008_v40 = vpop.f32.mrb[47].mxu0  ;;  %6383 = vmatprep.mubr.msk.f32.mxu1 %vm1730_vm1, %v8731_v61 }
 0x27c   : > { %v9012_v36 = vpop.f32.mrb[48].mxu0  ;;  %6384 = vmatmul.mubr.msk.f32.gmra.mrb[16].mxu1 %vm1730_vm1, %v8747_v46 }
 0x27d   : > { %v9016_v19 = vpop.f32.mrb[49].mxu0  ;;  %6386 = vmatprep.mubr.msk.f32.mxu1 %vm1730_vm1, %v9927_v5 }
 0x280   : > { %v9020_v39 = vpop.f32.mrb[50].mxu0  ;;  %6387 = vmatmul.mubr.msk.f32.gmra.mrb[18].mxu1 %vm1730_vm1, %v8256_v62 }
 0x281   : > { %v9024_v0 = vpop.f32.mrb[51].mxu0 }
 0x284   : > { %v9026_v33 = vpop.f32.mrb[52].mxu0 }
 0x285   : > { %v9028_v38 = vpop.f32.mrb[53].mxu0 }
 0x288   : > { %v9030_v17 = vpop.f32.mrb[54].mxu0 }
 0x289   : > { %v9032_v45 = vpop.f32.mrb[55].mxu0 }
 0x28c   : > { %v9034_v6 = vpop.f32.mrb[56].mxu0 }
 0x28d   : > { %v9036_v1 = vpop.f32.mrb[57].mxu0 }
 0x290   : > { %v9038_v18 = vpop.f32.mrb[58].mxu0 }
 0x291   : > { %v9040_v3 = vpop.f32.mrb[59].mxu0 }
 0x294   : > { %v9042_v35 = vpop.f32.mrb[60].mxu0 }
 0x295   : > { %v9044_v62 = vpop.f32.mrb[61].mxu0 }
 0x298   : > { %v9046_v9 = vpop.f32.mrb[62].mxu0 }
 0x299   : > { %v9048_v43 = vpop.f32.mrb[63].mxu0 }
 0x29c   : > { %v6083_v4 = vpop.f32.mrb[32].mxu0 }
 0x29d   : > { %v2765_v47 = vpop.f32.mrb[33].mxu0 }
 0x2a0   : > { %v6086_v60 = vpop.f32.mrb[34].mxu0 }
 0x2a1   : > { %v2775_v15 = vpop.f32.mrb[35].mxu0 }
 0x2a4   : > { %v6089_v42 = vpop.f32.mrb[36].mxu0 }
 0x2a5   : > { %v2785_v26 = vpop.f32.mrb[37].mxu0 }
 0x2a8   : > { %v6092_v12 = vpop.f32.mrb[38].mxu0 }
 0x2a9   : > { %v2795_v50 = vpop.f32.mrb[39].mxu0 }
 0x2ac   : > { %v6095_v31 = vpop.f32.mrb[40].mxu0 }
 0x2ad   : > { %v2805_v61 = vpop.f32.mrb[41].mxu0 }
 0x2b0   : > { %v6098_v46 = vpop.f32.mrb[42].mxu0 }
 0x2b1   : > { %v2815_v20 = vpop.f32.mrb[43].mxu0 }
 0x2b4   : > { %v4512_v53 = vpop.f32.mrb[64].mxu0 }
 0x2b5   : > { %v4516_v52 = vmax.f32 %v4512_v53, 0.0  ;;  %v6399_v55 = vpop.f32.mrb[65].mxu0 }
 0x2b7   : > { %6405 = vmatmul.mubr.msk.f32.vlgmr.msra.gmra.mrb[66].mxu0 %vm1730_vm1, %v4516_v52  ;;  %vm9929_vm1 = vmmov %vm9839_vm4 }
 0x2b8   : > { %vm9930_vm2 = vmmov %vm9929_vm1 }
 0x2b9   : > { %vm9931_vm3 = vmmov %vm9929_vm1 }
 0x2ba   : > { %vm9932_vm14 = vmmov %vm9929_vm1 }
 0x2bb   : > { %vm9933_vm15 = vmmov %vm9929_vm1 }
 0x2bc   : > { %vm9934_vm4 = vmmov %vm9929_vm1 }
 0x2bd   : > { %vm9935_vm5 = vmmov %vm9929_vm1 }
 0x2be   : > { %vm9936_vm7 = vmmov %vm9929_vm1 }
 0x2bf   : > { %vm9937_vm0 = vmmov %vm9929_vm1 }
 0x2c0   : > { %vm9938_vm8 = vmmov %vm9937_vm0 }
 0x2c1   : > { %vm9939_vm9 = vmmov %vm9937_vm0 }
 0x2c2   : > { %vm9940_vm10 = vmmov %vm9937_vm0 }
 0x2c3   : > { %vm9941_vm11 = vmmov %vm9937_vm0 }
 0x2c4   : > { %vm9943_vm12 = vmmov %vm9937_vm0 }
 0x2c5   : > { %vm9944_vm6 = vmmov %vm9937_vm0 }
 0x2c6   : > { %vm9947_vm13 = vmmov %vm9937_vm0 }
 0x317   : > { %v6343_v11 = vpop.f32.mrb[20].mxu1 }
 0x318   : > { %v9051_v56 = vadd.f32 %v6343_v11, %v6083_v4  ;;  %v4141_v59 = vpop.f32.mrb[21].mxu1 }
 0x319   : > { %v9053_v32 = vadd.f32 %v4141_v59, %v2765_v47 }
 0x31b   : > { %v6346_v8 = vpop.f32.mrb[22].mxu1 }
 0x31c   : > { %v9055_v25 = vadd.f32 %v6346_v8, %v6086_v60  ;;  %v4151_v57 = vpop.f32.mrb[23].mxu1 }
 0x31d   : > { %v9057_v28 = vadd.f32 %v4151_v57, %v2775_v15 }
 0x31f   : > { %v6349_v48 = vpop.f32.mrb[24].mxu1 }
 0x320   : > { %v9059_v2 = vadd.f32 %v6349_v48, %v6089_v42  ;;  %v4161_v24 = vpop.f32.mrb[25].mxu1  ;;  %v4666_v42 = vld [vmem:[%s9365_s6] sm:$0xff] }
 0x321   : > { %v9061_v34 = vadd.f32 %v4161_v24, %v2785_v26 }
 0x323   : > { %v6352_v21 = vpop.f32.mrb[26].mxu1 }
 0x324   : > { %v9063_v51 = vadd.f32 %v6352_v21, %v6092_v12  ;;  %v4171_v7 = vpop.f32.mrb[27].mxu1 }
 0x325   : > { %v9065_v37 = vadd.f32 %v4171_v7, %v2795_v50 }
 0x327   : > { %v6355_v44 = vpop.f32.mrb[28].mxu1 }
 0x328   : > { %v9067_v22 = vadd.f32 %v6355_v44, %v6095_v31  ;;  %v4181_v23 = vpop.f32.mrb[29].mxu1 }
 0x329   : > { %v9069_v41 = vadd.f32 %v4181_v23, %v2805_v61 }
 0x32b   : > { %v6358_v29 = vpop.f32.mrb[30].mxu1 }
 0x32c   : > { %v9071_v10 = vadd.f32 %v6358_v29, %v6098_v46  ;;  %v4191_v30 = vpop.f32.mrb[31].mxu1 }
 0x32d   : > { %v9073_v49 = vadd.f32 %v4191_v30, %v2815_v20 }
 0x32f   : > { %v6361_v16 = vpop.f32.mrb[0].mxu1 }
 0x330   : > { %v9076_v27 = vadd.f32 %v6361_v16, %v8996_v13  ;;  %v4201_v58 = vpop.f32.mrb[1].mxu1  ;;  %v4667_v13 = vld [vmem:[%s9365_s6 + $0x8] sm:$0xff] }
 0x331   : > { %v9079_v5 = vadd.f32 %v4201_v58, %v9000_v63  ;;  %v4668_v63 = vld [vmem:[%s9365_s6 + $0x10] sm:$0xff]  ;;  %v6516_v12 = vpack.c.bf16 %v4667_v13, %v4666_v42 }
 0x333   : > { %v6364_v4 = vpop.f32.mrb[2].mxu1  ;;  %6517 = vmatprep.subr.bf16.mxu0 %v6516_v12 }
 0x334   : > { %v9082_v47 = vadd.f32 %v6364_v4, %v9004_v54  ;;  %v4211_v60 = vpop.f32.mrb[3].mxu1  ;;  %v4669_v54 = vld [vmem:[%s9365_s6 + $0x18] sm:$0xff]  ;;  %6519 = vmatpush3.bf16.msra.mxu0 %v6516_v12 }
 0x335   : > { %v9085_v15 = vadd.f32 %v4211_v60, %v9008_v40  ;;  %v6520_v31 = vpack.c.bf16 %v4669_v54, %v4668_v63 }
 0x337   : > { %v6367_v26 = vpop.f32.mrb[4].mxu1  ;;  %6521 = vmatprep.subr.bf16.mxu0 %v6520_v31 }
 0x338   : > { %v6542_v40 = vadd.f32 %v6367_v26, %v9012_v36  ;;  %v4221_v50 = vpop.f32.mrb[5].mxu1  ;;  %6523 = vmatpush3.bf16.msra.mxu0 %v6520_v31 }
 0x339   : > { %v6543_v61 = vadd.f32 %v4221_v50, %v9016_v19 }
 0x33b   : > { %v6370_v46 = vpop.f32.mrb[6].mxu1 }
 0x33c   : > { %v6544_v20 = vadd.f32 %v6370_v46, %v9020_v39  ;;  %v4231_v53 = vpop.f32.mrb[7].mxu1 }
 0x33d   : > { %v6545_v52 = vadd.f32 %v4231_v53, %v9024_v0 }
 0x33f   : > { %v6373_v55 = vpop.f32.mrb[8].mxu1 }
 0x340   : > { %v6546_v11 = vadd.f32 %v6373_v55, %v9026_v33  ;;  %v4241_v59 = vpop.f32.mrb[9].mxu1 }
 0x341   : > { %v6547_v36 = vadd.f32 %v4241_v59, %v9028_v38 }
 0x343   : > { %v6376_v8 = vpop.f32.mrb[10].mxu1 }
 0x344   : > { %v6548_v57 = vadd.f32 %v6376_v8, %v9030_v17  ;;  %v4251_v19 = vpop.f32.mrb[11].mxu1 }
 0x345   : > { %v6549_v48 = vadd.f32 %v4251_v19, %v9032_v45 }
 0x347   : > { %v6379_v24 = vpop.f32.mrb[12].mxu1 }
 0x348   : > { %v6550_v21 = vadd.f32 %v6379_v24, %v9034_v6  ;;  %v4261_v39 = vpop.f32.mrb[13].mxu1 }
 0x349   : > { %v6551_v7 = vadd.f32 %v4261_v39, %v9036_v1 }
 0x34b   : > { %v6382_v0 = vpop.f32.mrb[14].mxu1 }
 0x34c   : > { %v6552_v44 = vadd.f32 %v6382_v0, %v9038_v18  ;;  %v4271_v23 = vpop.f32.mrb[15].mxu1  ;;  %v4334_v18 = vsub.s32 1, %v9778_v14 }
 0x34d   : > { %v6553_v33 = vadd.f32 %v4271_v23, %v9040_v3 }
 0x34f   : > { %v6385_v29 = vpop.f32.mrb[16].mxu1 }
 0x350   : > { %v6554_v38 = vadd.f32 %v6385_v29, %v9042_v35  ;;  %v4281_v30 = vpop.f32.mrb[17].mxu1  ;;  %v9119_v35 = vld [vmem:[%s9362_s3] sm:$0x7] }
 0x351   : > { %v6555_v17 = vadd.f32 %v4281_v30, %v9044_v62  ;;  %v4335_v62 = vrot.slane %v9119_v35, %v4334_v18 }
 0x353   : > { %v6388_v16 = vpop.f32.mrb[18].mxu1  ;;  %v4339_v13 = vadd.f32 %v9055_v25, %v4335_v62  ;;  %v4338_v63 = vadd.f32 %v9057_v28, %v4335_v62  ;;  %v4341_v26 = vadd.f32 %v9059_v2, %v4335_v62  ;;  %v4340_v12 = vadd.f32 %v9061_v34, %v4335_v62 }
 0x354   : > { %v6556_v45 = vadd.f32 %v6388_v16, %v9046_v9  ;;  %v4291_v58 = vpop.f32.mrb[19].mxu1  ;;  %v4337_v9 = vadd.f32 %v9051_v56, %v4335_v62  ;;  %v4343_v54 = vadd.f32 %v9063_v51, %v4335_v62  ;;  %v4342_v50 = vadd.f32 %v9065_v37, %v4335_v62 }
 0x355   : > { %v6557_v6 = vadd.f32 %v4291_v58, %v9048_v43  ;;  %v4336_v43 = vadd.f32 %v9053_v32, %v4335_v62  ;;  %v4345_v31 = vadd.f32 %v9067_v22, %v4335_v62  ;;  %v4344_v46 = vadd.f32 %v9069_v41, %v4335_v62 }
 0x356   : > { %v4347_v56 = vadd.f32 %v9071_v10, %v4335_v62  ;;  %v4346_v32 = vadd.f32 %v9073_v49, %v4335_v62  ;;  %v4349_v25 = vadd.f32 %v9076_v27, %v4335_v62  ;;  %v4348_v28 = vadd.f32 %v9079_v5, %v4335_v62 }
 0x357   : > { %v4351_v2 = vadd.f32 %v9082_v47, %v4335_v62  ;;  %v4350_v34 = vadd.f32 %v9085_v15, %v4335_v62  ;;  %v4353_v53 = vadd.f32 %v6542_v40, %v4335_v62  ;;  %v4352_v51 = vadd.f32 %v6543_v61, %v4335_v62 }
 0x358   : > { %v4355_v55 = vadd.f32 %v6544_v20, %v4335_v62  ;;  %v4354_v37 = vadd.f32 %v6545_v52, %v4335_v62  ;;  %v4357_v59 = vadd.f32 %v6546_v11, %v4335_v62  ;;  %v4356_v8 = vadd.f32 %v6547_v36, %v4335_v62 }
 0x359   : > { %v4359_v41 = vadd.f32 %v6548_v57, %v4335_v62  ;;  %v4358_v19 = vadd.f32 %v6549_v48, %v4335_v62  ;;  %v4361_v10 = vadd.f32 %v6550_v21, %v4335_v62  ;;  %v4360_v24 = vadd.f32 %v6551_v7, %v4335_v62 }
 0x35a   : > { %v4363_v49 = vadd.f32 %v6552_v44, %v4335_v62  ;;  %v4362_v39 = vadd.f32 %v6553_v33, %v4335_v62  ;;  %v9928_v27 = vsub.s32 0, %v9778_v14  ;;  %v4365_v0 = vadd.f32 %v6554_v38, %v4335_v62 }
 0x35b   : > { %v4364_v47 = vadd.f32 %v6555_v17, %v4335_v62  ;;  %v4367_v23 = vadd.f32 %v6556_v45, %v4335_v62  ;;  %v4366_v15 = vadd.f32 %v6557_v6, %v4335_v62 }
 0x38a   : > { %v4588_v4 = vpop.f32.mrb[66].mxu0 }
 0x38b   : > { %v5442_v1 = vmul.f32 -1.442695, %v4588_v4  ;;  %v6406_v60 = vpop.f32.mrb[67].mxu0 }
 0x38d   : > { %6793 = vpow2.f32 %v5442_v1 }
 0x397   : > { %v6794_v42 = vpop.eup %6793 }
 0x398   : > { %v4595_v3 = vadd.f32 1.0, %v6794_v42 }
 0x39a   : > { %6795 = vrcp.f32 %v4595_v3 }
 0x3a4   : > { %v6796_v22 = vpop.eup %6795 }
 0x3a5   : > { %v4601_v5 = vrot.slane %v6796_v22, %v9928_v27  ;;  %v6832_v22 = vld [vmem:[%s6923_s18 + $0x40] sm:$0xff] }
 0x3a6   : > { %v6836_v27 = vld [vmem:[%s6923_s18 + $0x60] sm:$0xff] }
 0x3a7   : > { %v4602_v40 = vmul.f32 %v4601_v5, %v4336_v43  ;;  %v4603_v61 = vmul.f32 %v4601_v5, %v4337_v9  ;;  %v4604_v20 = vmul.f32 %v4601_v5, %v4338_v63  ;;  %v4605_v52 = vmul.f32 %v4601_v5, %v4339_v13 }
 0x3a8   : > { %v4606_v11 = vmul.f32 %v4601_v5, %v4340_v12  ;;  %v4607_v29 = vmul.f32 %v4601_v5, %v4341_v26  ;;  %v4608_v36 = vmul.f32 %v4601_v5, %v4342_v50  ;;  %v4609_v57 = vmul.f32 %v4601_v5, %v4343_v54  ;;  %v6824_v12 = vld [vmem:[%s6923_s18] sm:$0xff]  ;;  %v6825_v50 = vld [vmem:[%s6923_s18 + $0x8] sm:$0xff] }
 0x3a9   : > { %v4610_v48 = vmul.f32 %v4601_v5, %v4344_v46  ;;  %v4611_v21 = vmul.f32 %v4601_v5, %v4345_v31  ;;  %v4612_v7 = vmul.f32 %v4601_v5, %v4346_v32  ;;  %v4613_v44 = vmul.f32 %v4601_v5, %v4347_v56  ;;  %v6826_v46 = vld [vmem:[%s6923_s18 + $0x10] sm:$0xff]  ;;  %v6827_v32 = vld [vmem:[%s6923_s18 + $0x18] sm:$0xff] }
 0x3aa   : > { %v4614_v33 = vmul.f32 %v4601_v5, %v4348_v28  ;;  %v4615_v30 = vmul.f32 %v4601_v5, %v4349_v25  ;;  %v4616_v16 = vmul.f32 %v4601_v5, %v4350_v34  ;;  %v4617_v58 = vmul.f32 %v4601_v5, %v4351_v2  ;;  %v6828_v28 = vld [vmem:[%s6923_s18 + $0x20] sm:$0xff]  ;;  %v6829_v34 = vld [vmem:[%s6923_s18 + $0x28] sm:$0xff] }
 0x3ab   : > { %v4618_v38 = vmul.f32 %v4601_v5, %v4352_v51  ;;  %v9140_v17 = vmul.f32 %v4601_v5, %v4353_v53  ;;  %v9142_v45 = vmul.f32 %v4601_v5, %v4354_v37  ;;  %v9144_v6 = vmul.f32 %v4601_v5, %v4355_v55  ;;  %v6830_v51 = vld [vmem:[%s6923_s18 + $0x30] sm:$0xff]  ;;  %v6831_v37 = vld [vmem:[%s6923_s18 + $0x38] sm:$0xff] }
 0x3ac   : > { %v9146_v4 = vmul.f32 %v4601_v5, %v4356_v8  ;;  %v9148_v1 = vmul.f32 %v4601_v5, %v4357_v59  ;;  %v9150_v60 = vmul.f32 %v4601_v5, %v4358_v19  ;;  %v9152_v18 = vmul.f32 %v4601_v5, %v4359_v41  ;;  %v6833_v41 = vld [vmem:[%s6923_s18 + $0x48] sm:$0xff] }
 0x3ad   : > { %v9154_v42 = vmul.f32 %v4601_v5, %v4360_v24  ;;  %v9156_v3 = vmul.f32 %v4601_v5, %v4361_v10  ;;  %v9158_v62 = vmul.f32 %v4601_v5, %v4362_v39  ;;  %v9160_v9 = vmul.f32 %v4601_v5, %v4363_v49  ;;  %v6834_v10 = vld [vmem:[%s6923_s18 + $0x50] sm:$0xff]  ;;  %v6835_v49 = vld [vmem:[%s6923_s18 + $0x58] sm:$0xff] }
 0x3ae   : > { %v9162_v43 = vmul.f32 %v4601_v5, %v4364_v47  ;;  %v9164_v13 = vmul.f32 %v4601_v5, %v4365_v0  ;;  %v9166_v63 = vmul.f32 %v4601_v5, %v4366_v15  ;;  %v9168_v26 = vmul.f32 %v4601_v5, %v4367_v23  ;;  %v6837_v0 = vld [vmem:[%s6923_s18 + $0x68] sm:$0xff]  ;;  %v9942_v23 = vld [vmem:[#allocation20_spill] sm:$0xff] }
 0x3af   : > { %v4634_v54 = vadd.f32 %v6824_v12, %v4602_v40  ;;  %v4635_v31 = vadd.f32 %v6825_v50, %v4603_v61  ;;  %v4636_v56 = vadd.f32 %v6826_v46, %v4604_v20  ;;  %v4637_v25 = vadd.f32 %v6827_v32, %v4605_v52  ;;  %v9945_v40 = vld [vmem:[#allocation25_spill] sm:$0xff]  ;;  %v9965_v12 = vld [vmem:[#allocation50_spill] sm:$0xff] }
 0x3b0   : > { %v4638_v2 = vadd.f32 %v6828_v28, %v4606_v11  ;;  %v4639_v53 = vadd.f32 %v6829_v34, %v4607_v29  ;;  %v4640_v55 = vadd.f32 %v6830_v51, %v4608_v36  ;;  %v4641_v59 = vadd.f32 %v6831_v37, %v4609_v57  ;;  %v9946_v20 = vld [vmem:[#allocation29_spill] sm:$0xff]  ;;  %v9949_v11 = vld [vmem:[#allocation31_spill] sm:$0xff]  ;;  %v9950_v36 = vld [vmem:[#allocation36_spill] sm:$0xff] }
 0x3b1   : > { %6415 = vmatprep.mubr.msk.f32.mxu0 %vm9929_vm1, %v4634_v54  ;;  %v4642_v8 = vadd.f32 %v6832_v22, %v4610_v48  ;;  %v4643_v19 = vadd.f32 %v6833_v41, %v4611_v21  ;;  %v4644_v24 = vadd.f32 %v6834_v10, %v4612_v7  ;;  %v4645_v39 = vadd.f32 %v6835_v49, %v4613_v44  ;;  %vm9948_vm1 = vmmov %vm9937_vm0  ;;  %v9953_v48 = vld [vmem:[#allocation32_spill] sm:$0xff] }
 0x3b2   : > { %6416 = vmatmul.mubr.msk.f32.vlgmr.msra.gmra.mrb[68].mxu0 %vm9930_vm2, %v4635_v31  ;;  %v4646_v5 = vadd.f32 %v6836_v27, %v4614_v33  ;;  %v4647_v47 = vadd.f32 %v6837_v0, %v4615_v30  ;;  %v4648_v15 = vadd.f32 %v9942_v23, %v4616_v16  ;;  %v4649_v61 = vadd.f32 %v9945_v40, %v4617_v58  ;;  %vm9951_vm2 = vmmov %vm9937_vm0  ;;  %v9954_v7 = vld [vmem:[#allocation40_spill] sm:$0xff]  ;;  %v9957_v33 = vld [vmem:[#allocation39_spill] sm:$0xff] }
 0x3b3   : > { %6418 = vmatprep.mubr.msk.f32.mxu0 %vm9931_vm3, %v4636_v56  ;;  %v4650_v52 = vadd.f32 %v9946_v20, %v4618_v38  ;;  %v4651_v29 = vadd.f32 %v9949_v11, %v9140_v17  ;;  %v4652_v57 = vadd.f32 %v9950_v36, %v9142_v45  ;;  %vm9952_vm3 = vmmov %vm9937_vm0  ;;  %v4653_v21 = vadd.f32 %v9953_v48, %v9144_v6  ;;  %v9958_v16 = vld [vmem:[#allocation41_spill] sm:$0xff]  ;;  %v9961_v38 = vld [vmem:[#allocation4_spill] sm:$0xff] }
 0x3b4   : > { %v4654_v44 = vadd.f32 %v9954_v7, %v9146_v4  ;;  %v4655_v30 = vadd.f32 %v9957_v33, %v9148_v1  ;;  %v4656_v58 = vadd.f32 %v9958_v16, %v9150_v60  ;;  %v4657_v17 = vadd.f32 %v9961_v38, %v9152_v18  ;;  %v9962_v45 = vld [vmem:[#allocation45_spill] sm:$0xff]  ;;  %v9964_v4 = vld [vmem:[#allocation48_spill] sm:$0xff] }
 0x3b5   : > { %v4658_v6 = vadd.f32 %v9962_v45, %v9154_v42  ;;  %v4659_v1 = vadd.f32 %v9964_v4, %v9156_v3  ;;  %v4660_v60 = vadd.f32 %v9965_v12, %v9158_v62  ;;  %v9968_v54 = vld [vmem:[#allocation52_spill] sm:$0xff]  ;;  %v9969_v42 = vld [vmem:[#allocation57_spill] sm:$0xff]  ;;  %v9972_v3 = vld [vmem:[#allocation59_spill] sm:$0xff] }
 0x3b6   : > { %6419 = vmatmul.mubr.msk.f32.gmra.mrb[70].mxu0 %vm9932_vm14, %v4637_v25  ;;  %vm9955_vm14 = vmmov %vm9937_vm0  ;;  %v4661_v18 = vadd.f32 %v9968_v54, %v9160_v9  ;;  %v4662_v50 = vadd.f32 %v9969_v42, %v9162_v43  ;;  %v4663_v31 = vadd.f32 %v9972_v3, %v9164_v13  ;;  %v9973_v62 = vld [vmem:[#allocation60_spill] sm:$0xff]  ;;  %v4672_v43 = vsub.s32 2, %v9778_v14 }
 0x3b7   : > { %6421 = vmatprep.mubr.msk.f32.mxu0 %vm9933_vm15, %v4638_v2  ;;  %vm9956_vm15 = vmmov %vm9937_vm0  ;;  %v4664_v46 = vadd.f32 %v9973_v62, %v9166_v63  ;;  %v9976_v56 = vld [vmem:[#allocation8_spill] sm:$0xff] }
 0x3b8   : > { %v4665_v9 = vadd.f32 %v9976_v56, %v9168_v26  ;;  %v9251_v32 = vrot.slane %v9119_v35, %v4672_v43 }
 0x3ba   : > { %6422 = vmatmul.mubr.msk.f32.gmra.mrb[72].mxu0 %vm9934_vm4, %v4639_v53  ;;  %vm9959_vm4 = vmmov %vm9937_vm0 }
 0x3bb   : > { %6424 = vmatprep.mubr.msk.f32.mxu0 %vm9935_vm5, %v4640_v55  ;;  %vm9960_vm5 = vmmov %vm9937_vm0 }
 0x3be   : > { %6425 = vmatmul.mubr.msk.f32.gmra.mrb[74].mxu0 %vm9936_vm7, %v4641_v59  ;;  %vm9963_vm7 = vmmov %vm9937_vm0 }
 0x3bf   : > { %6427 = vmatprep.mubr.msk.f32.mxu0 %vm9937_vm0, %v4642_v8 }
 0x3c2   : > { %6428 = vmatmul.mubr.msk.f32.gmra.mrb[76].mxu0 %vm9938_vm8, %v4643_v19  ;;  %vm9966_vm8 = vmmov %vm9937_vm0 }
 0x3c3   : > { %6430 = vmatprep.mubr.msk.f32.mxu0 %vm9939_vm9, %v4644_v24  ;;  %vm9967_vm9 = vmmov %vm9937_vm0 }
 0x3c6   : > { %6431 = vmatmul.mubr.msk.f32.gmra.mrb[78].mxu0 %vm9940_vm10, %v4645_v39  ;;  %vm9970_vm10 = vmmov %vm9937_vm0 }
 0x3c7   : > { %6433 = vmatprep.mubr.msk.f32.mxu0 %vm9941_vm11, %v4646_v5  ;;  %vm9971_vm11 = vmmov %vm9937_vm0 }
 0x3ca   : > { %6434 = vmatmul.mubr.msk.f32.gmra.mrb[80].mxu0 %vm9943_vm12, %v4647_v47  ;;  %vm9974_vm12 = vmmov %vm9937_vm0 }
 0x3cb   : > { %6436 = vmatprep.mubr.msk.f32.mxu0 %vm9944_vm6, %v4648_v15  ;;  %vm9975_vm6 = vmmov %vm9937_vm0 }
 0x3ce   : > { %6437 = vmatmul.mubr.msk.f32.gmra.mrb[82].mxu0 %vm9947_vm13, %v4649_v61  ;;  %vm9977_vm13 = vmmov %vm9937_vm0 }
 0x3cf   : > { %6439 = vmatprep.mubr.msk.f32.mxu0 %vm9948_vm1, %v4650_v52  ;;  %vm9978_vm1 = vmmov %vm9937_vm0 }
 0x3d2   : > { %6440 = vmatmul.mubr.msk.f32.gmra.mrb[84].mxu0 %vm9951_vm2, %v4651_v29  ;;  %vm9979_vm2 = vmmov %vm9937_vm0 }
 0x3d3   : > { %6442 = vmatprep.mubr.msk.f32.mxu0 %vm9952_vm3, %v4652_v57  ;;  %vm9980_vm3 = vmmov %vm9937_vm0 }
 0x3d6   : > { %6443 = vmatmul.mubr.msk.f32.gmra.mrb[86].mxu0 %vm9955_vm14, %v4653_v21  ;;  %vm9981_vm14 = vmmov %vm9937_vm0 }
 0x3d7   : > { %6445 = vmatprep.mubr.msk.f32.mxu0 %vm9956_vm15, %v4654_v44  ;;  %vm9982_vm15 = vmmov %vm9937_vm0 }
 0x3da   : > { %6446 = vmatmul.mubr.msk.f32.gmra.mrb[88].mxu0 %vm9959_vm4, %v4655_v30  ;;  %vm9983_vm4 = vmmov %vm9937_vm0 }
 0x3db   : > { %6448 = vmatprep.mubr.msk.f32.mxu0 %vm9960_vm5, %v4656_v58  ;;  %vm9984_vm5 = vmmov %vm9937_vm0 }
 0x3de   : > { %6449 = vmatmul.mubr.msk.f32.gmra.mrb[90].mxu0 %vm9963_vm7, %v4657_v17  ;;  %vm9985_vm7 = vmmov %vm9937_vm0 }
 0x3df   : > { %6451 = vmatprep.mubr.msk.f32.mxu0 %vm9937_vm0, %v4658_v6 }
 0x3e2   : > { %6452 = vmatmul.mubr.msk.f32.gmra.mrb[92].mxu0 %vm9966_vm8, %v4659_v1  ;;  %vm9986_vm8 = vmmov %vm9937_vm0 }
 0x3e3   : > { %6454 = vmatprep.mubr.msk.f32.mxu0 %vm9967_vm9, %v4660_v60  ;;  %vm9987_vm9 = vmmov %vm9937_vm0 }
 0x3e6   : > { %6455 = vmatmul.mubr.msk.f32.gmra.mrb[94].mxu0 %vm9970_vm10, %v4661_v18  ;;  %vm9988_vm10 = vmmov %vm9937_vm0 }
 0x3e7   : > { %6457 = vmatprep.mubr.msk.f32.mxu0 %vm9971_vm11, %v4662_v50  ;;  %vm9989_vm11 = vmmov %vm9937_vm0 }
 0x3ea   : > { %6458 = vmatmul.mubr.msk.f32.gmra.mrb[96].mxu0 %vm9974_vm12, %v4663_v31  ;;  %vm9990_vm12 = vmmov %vm9937_vm0 }
 0x3eb   : > { %6460 = vmatprep.mubr.msk.f32.mxu0 %vm9975_vm6, %v4664_v46  ;;  %vm9991_vm6 = vmmov %vm9937_vm0 }
 0x3ee   : > { %6461 = vmatmul.mubr.msk.f32.gmra.mrb[98].mxu0 %vm9977_vm13, %v4665_v9  ;;  %vm9992_vm13 = vmmov %vm9937_vm0 }
 0x485   : > { %v6417_v25 = vpop.f32.mrb[68].mxu0 }
 0x486   : > { %v4842_v13 = vadd.f32 %v6417_v25, %v9251_v32  ;;  %v4836_v28 = vpop.f32.mrb[69].mxu0 }
 0x487   : > { %v4837_v63 = vadd.f32 %v4836_v28, %v9251_v32 }
 0x488   : > { %v4996_v14 = vmax.f32 %v4842_v13, 0.0 }
 0x489   : > { %v4995_v26 = vmax.f32 %v4837_v63, 0.0  ;;  %v6420_v35 = vpop.f32.mrb[70].mxu0 }
 0x48a   : > { %5028 = vst.msk [vmem:[%s9259_s19 + $0x8] sm:$0xff] %vm9978_vm1, %v4996_v14  ;;  %v4852_v2 = vadd.f32 %v6420_v35, %v9251_v32  ;;  %v4846_v34 = vpop.f32.mrb[71].mxu0  ;;  %vm9993_vm1 = vmmov %vm9937_vm0 }
 0x48b   : > { %5027 = vst.msk [vmem:[%s9259_s19] sm:$0xff] %vm9979_vm2, %v4995_v26  ;;  %v4847_v53 = vadd.f32 %v4846_v34, %v9251_v32  ;;  %vm9994_vm2 = vmmov %vm9937_vm0 }
 0x48c   : > { %v4998_v51 = vmax.f32 %v4852_v2, 0.0 }
 0x48d   : > { %v4997_v55 = vmax.f32 %v4847_v53, 0.0  ;;  %v6423_v37 = vpop.f32.mrb[72].mxu0 }
 0x48e   : > { %5030 = vst.msk [vmem:[%s9259_s19 + $0x18] sm:$0xff] %vm9980_vm3, %v4998_v51  ;;  %v4862_v59 = vadd.f32 %v6423_v37, %v9251_v32  ;;  %v4856_v22 = vpop.f32.mrb[73].mxu0  ;;  %vm9995_vm3 = vmmov %vm9937_vm0 }
 0x48f   : > { %5029 = vst.msk [vmem:[%s9259_s19 + $0x10] sm:$0xff] %vm9981_vm14, %v4997_v55  ;;  %v4857_v8 = vadd.f32 %v4856_v22, %v9251_v32  ;;  %vm9996_vm14 = vmmov %vm9937_vm0 }
 0x490   : > { %v5000_v41 = vmax.f32 %v4862_v59, 0.0 }
 0x491   : > { %v4999_v19 = vmax.f32 %v4857_v8, 0.0  ;;  %v6426_v10 = vpop.f32.mrb[74].mxu0 }
 0x492   : > { %5032 = vst.msk [vmem:[%s9259_s19 + $0x28] sm:$0xff] %vm9982_vm15, %v5000_v41  ;;  %v4872_v24 = vadd.f32 %v6426_v10, %v9251_v32  ;;  %v4866_v49 = vpop.f32.mrb[75].mxu0  ;;  %vm9997_vm15 = vmmov %vm9937_vm0 }
 0x493   : > { %5031 = vst.msk [vmem:[%s9259_s19 + $0x20] sm:$0xff] %vm9983_vm4, %v4999_v19  ;;  %v4867_v39 = vadd.f32 %v4866_v49, %v9251_v32  ;;  %vm9998_vm4 = vmmov %vm9937_vm0 }
 0x494   : > { %v5002_v27 = vmax.f32 %v4872_v24, 0.0 }
 0x495   : > { %v5001_v5 = vmax.f32 %v4867_v39, 0.0  ;;  %v6429_v0 = vpop.f32.mrb[76].mxu0 }
 0x496   : > { %5034 = vst.msk [vmem:[%s9259_s19 + $0x38] sm:$0xff] %vm9984_vm5, %v5002_v27  ;;  %v4882_v47 = vadd.f32 %v6429_v0, %v9251_v32  ;;  %v4876_v23 = vpop.f32.mrb[77].mxu0  ;;  %vm9999_vm5 = vmmov %vm9937_vm0 }
 0x497   : > { %5033 = vst.msk [vmem:[%s9259_s19 + $0x30] sm:$0xff] %vm9985_vm7, %v5001_v5  ;;  %v4877_v15 = vadd.f32 %v4876_v23, %v9251_v32  ;;  %vm10000_vm7 = vmmov %vm9937_vm0 }
 0x498   : > { %v5004_v40 = vmax.f32 %v4882_v47, 0.0 }
 0x499   : > { %v5003_v61 = vmax.f32 %v4877_v15, 0.0  ;;  %v6432_v20 = vpop.f32.mrb[78].mxu0 }
 0x49a   : > { %5036 = vst.msk [vmem:[%s9259_s19 + $0x48] sm:$0xff] %vm9937_vm0, %v5004_v40  ;;  %v4892_v52 = vadd.f32 %v6432_v20, %v9251_v32  ;;  %v4886_v11 = vpop.f32.mrb[79].mxu0 }
 0x49b   : > { %5035 = vst.msk [vmem:[%s9259_s19 + $0x40] sm:$0xff] %vm9986_vm8, %v5003_v61  ;;  %v4887_v29 = vadd.f32 %v4886_v11, %v9251_v32  ;;  %vm10001_vm8 = vmmov %vm9937_vm0 }
 0x49c   : > { %v5006_v36 = vmax.f32 %v4892_v52, 0.0 }
 0x49d   : > { %v5005_v57 = vmax.f32 %v4887_v29, 0.0  ;;  %v6435_v48 = vpop.f32.mrb[80].mxu0 }
 0x49e   : > { %5038 = vst.msk [vmem:[%s9259_s19 + $0x58] sm:$0xff] %vm9987_vm9, %v5006_v36  ;;  %v4902_v21 = vadd.f32 %v6435_v48, %v9251_v32  ;;  %v4896_v7 = vpop.f32.mrb[81].mxu0  ;;  %vm10002_vm9 = vmmov %vm9937_vm0 }
 0x49f   : > { %5037 = vst.msk [vmem:[%s9259_s19 + $0x50] sm:$0xff] %vm9988_vm10, %v5005_v57  ;;  %v4897_v44 = vadd.f32 %v4896_v7, %v9251_v32  ;;  %vm10003_vm10 = vmmov %vm9937_vm0 }
 0x4a0   : > { %v5008_v33 = vmax.f32 %v4902_v21, 0.0 }
 0x4a1   : > { %v5007_v30 = vmax.f32 %v4897_v44, 0.0  ;;  %v6438_v16 = vpop.f32.mrb[82].mxu0 }
 0x4a2   : > { %5040 = vst.msk [vmem:[%s9259_s19 + $0x68] sm:$0xff] %vm9989_vm11, %v5008_v33  ;;  %v4912_v58 = vadd.f32 %v6438_v16, %v9251_v32  ;;  %v4906_v38 = vpop.f32.mrb[83].mxu0  ;;  %vm10004_vm11 = vmmov %vm9937_vm0 }
 0x4a3   : > { %5039 = vst.msk [vmem:[%s9259_s19 + $0x60] sm:$0xff] %vm9990_vm12, %v5007_v30  ;;  %v4907_v17 = vadd.f32 %v4906_v38, %v9251_v32  ;;  %vm10005_vm12 = vmmov %vm9937_vm0 }
 0x4a4   : > { %v5010_v45 = vmax.f32 %v4912_v58, 0.0 }
 0x4a5   : > { %v5009_v6 = vmax.f32 %v4907_v17, 0.0  ;;  %v6441_v4 = vpop.f32.mrb[84].mxu0 }
 0x4a6   : > { %5042 = vst.msk [vmem:[%s9259_s19 + $0x78] sm:$0xff] %vm9991_vm6, %v5010_v45  ;;  %v4922_v1 = vadd.f32 %v6441_v4, %v9251_v32  ;;  %v4916_v12 = vpop.f32.mrb[85].mxu0  ;;  %vm10006_vm6 = vmmov %vm9937_vm0 }
 0x4a7   : > { %5041 = vst.msk [vmem:[%s9259_s19 + $0x70] sm:$0xff] %vm9992_vm13, %v5009_v6  ;;  %v4917_v60 = vadd.f32 %v4916_v12, %v9251_v32  ;;  %vm10007_vm13 = vmmov %vm9937_vm0 }
 0x4a8   : > { %v5012_v54 = vmax.f32 %v4922_v1, 0.0 }
 0x4a9   : > { %v5011_v18 = vmax.f32 %v4917_v60, 0.0  ;;  %v6444_v42 = vpop.f32.mrb[86].mxu0 }
 0x4aa   : > { %5044 = vst.msk [vmem:[%s9259_s19 + $0x88] sm:$0xff] %vm9993_vm1, %v5012_v54  ;;  %v4932_v50 = vadd.f32 %v6444_v42, %v9251_v32  ;;  %v4926_v3 = vpop.f32.mrb[87].mxu0 }
 0x4ab   : > { %5043 = vst.msk [vmem:[%s9259_s19 + $0x80] sm:$0xff] %vm9994_vm2, %v5011_v18  ;;  %v4927_v31 = vadd.f32 %v4926_v3, %v9251_v32 }
 0x4ac   : > { %v5014_v62 = vmax.f32 %v4932_v50, 0.0 }
 0x4ad   : > { %v5013_v46 = vmax.f32 %v4927_v31, 0.0  ;;  %v6447_v56 = vpop.f32.mrb[88].mxu0 }
 0x4ae   : > { %5046 = vst.msk [vmem:[%s9259_s19 + $0x98] sm:$0xff] %vm9995_vm3, %v5014_v62  ;;  %v4942_v9 = vadd.f32 %v6447_v56, %v9251_v32  ;;  %v4936_v43 = vpop.f32.mrb[89].mxu0 }
 0x4af   : > { %5045 = vst.msk [vmem:[%s9259_s19 + $0x90] sm:$0xff] %vm9996_vm14, %v5013_v46  ;;  %v4937_v25 = vadd.f32 %v4936_v43, %v9251_v32 }
 0x4b0   : > { %v5016_v13 = vmax.f32 %v4942_v9, 0.0 }
 0x4b1   : > { %v5015_v28 = vmax.f32 %v4937_v25, 0.0  ;;  %v6450_v63 = vpop.f32.mrb[90].mxu0 }
 0x4b2   : > { %5048 = vst.msk [vmem:[%s9259_s19 + $0xa8] sm:$0xff] %vm9997_vm15, %v5016_v13  ;;  %v4952_v14 = vadd.f32 %v6450_v63, %v9251_v32  ;;  %v4946_v26 = vpop.f32.mrb[91].mxu0 }
 0x4b3   : > { %5047 = vst.msk [vmem:[%s9259_s19 + $0xa0] sm:$0xff] %vm9998_vm4, %v5015_v28  ;;  %v4947_v35 = vadd.f32 %v4946_v26, %v9251_v32 }
 0x4b4   : > { %v5018_v2 = vmax.f32 %v4952_v14, 0.0 }
 0x4b5   : > { %v5017_v34 = vmax.f32 %v4947_v35, 0.0  ;;  %v6453_v53 = vpop.f32.mrb[92].mxu0 }
 0x4b6   : > { %5050 = vst.msk [vmem:[%s9259_s19 + $0xb8] sm:$0xff] %vm9999_vm5, %v5018_v2  ;;  %v4962_v51 = vadd.f32 %v6453_v53, %v9251_v32  ;;  %v4956_v55 = vpop.f32.mrb[93].mxu0 }
 0x4b7   : > { %5049 = vst.msk [vmem:[%s9259_s19 + $0xb0] sm:$0xff] %vm10000_vm7, %v5017_v34  ;;  %v4957_v37 = vadd.f32 %v4956_v55, %v9251_v32 }
 0x4b8   : > { %v5020_v59 = vmax.f32 %v4962_v51, 0.0 }
 0x4b9   : > { %v5019_v22 = vmax.f32 %v4957_v37, 0.0  ;;  %v6456_v8 = vpop.f32.mrb[94].mxu0 }
 0x4ba   : > { %5052 = vst.msk [vmem:[%s9259_s19 + $0xc8] sm:$0xff] %vm9937_vm0, %v5020_v59  ;;  %v4972_v41 = vadd.f32 %v6456_v8, %v9251_v32  ;;  %v4966_v19 = vpop.f32.mrb[95].mxu0 }
 0x4bb   : > { %5051 = vst.msk [vmem:[%s9259_s19 + $0xc0] sm:$0xff] %vm10001_vm8, %v5019_v22  ;;  %v4967_v10 = vadd.f32 %v4966_v19, %v9251_v32 }
 0x4bc   : > { %v5022_v24 = vmax.f32 %v4972_v41, 0.0 }
 0x4bd   : > { %v5021_v49 = vmax.f32 %v4967_v10, 0.0  ;;  %v6459_v39 = vpop.f32.mrb[96].mxu0 }
 0x4be   : > { %5054 = vst.msk [vmem:[%s9259_s19 + $0xd8] sm:$0xff] %vm10002_vm9, %v5022_v24  ;;  %v4982_v27 = vadd.f32 %v6459_v39, %v9251_v32  ;;  %v4976_v5 = vpop.f32.mrb[97].mxu0 }
 0x4bf   : > { %5053 = vst.msk [vmem:[%s9259_s19 + $0xd0] sm:$0xff] %vm10003_vm10, %v5021_v49  ;;  %v4977_v0 = vadd.f32 %v4976_v5, %v9251_v32 }
 0x4c0   : > { %v5024_v47 = vmax.f32 %v4982_v27, 0.0 }
 0x4c1   : > { %v5023_v23 = vmax.f32 %v4977_v0, 0.0  ;;  %v6462_v15 = vpop.f32.mrb[98].mxu0 }
 0x4c2   : > { %5056 = vst.msk [vmem:[%s9259_s19 + $0xe8] sm:$0xff] %vm10004_vm11, %v5024_v47  ;;  %v4992_v40 = vadd.f32 %v6462_v15, %v9251_v32  ;;  %v4986_v61 = vpop.f32.mrb[99].mxu0 }
 0x4c3   : > { %5055 = vst.msk [vmem:[%s9259_s19 + $0xe0] sm:$0xff] %vm10005_vm12, %v5023_v23  ;;  %v4987_v20 = vadd.f32 %v4986_v61, %v9251_v32 }
 0x4c4   : > { %v5026_v52 = vmax.f32 %v4992_v40, 0.0 }
 0x4c5   : > { %v5025_v11 = vmax.f32 %v4987_v20, 0.0 }
 0x4c6   : > { %5058 = vst.msk [vmem:[%s9259_s19 + $0xf8] sm:$0xff] %vm10006_vm6, %v5026_v52 }
 0x4c7   : > { %5057 = vst.msk [vmem:[%s9259_s19 + $0xf0] sm:$0xff] %vm10007_vm13, %v5025_v11 }
 0x4c8 PF: > { %s17_s24 = sadd.s32 1, %s6844_s24  }
 0x4c9   : > { %p14_p4 = scmp.ge.s32.totalorder %s17_s24, 4  }
 0x4cb   :  { %16 = sbr.rel (!%p14_p4) target bundleno = 1 (0x1), region = 78 }

</bundles_post_ra>
